<compile_context>
chip_gen: v7x
topology: tpu7x:2x2x1
jax: 0.10.0
libtpu: 0.0.40
codegen_flags: <defaults>
</compile_context>

<pallas_src>
import functools

import jax
import jax.numpy as jnp
from jax.experimental import pallas as pl
from jax.experimental.pallas import tpu as pltpu

EPS = 1e-5  # nn.BatchNorm2d default eps


def _round_up(x, m):
    return (x + m - 1) // m * m


def _hw_config():
    """Per-TPU-generation tiling/VMEM knobs (safe defaults if unknown)."""
    kind = ""
    try:
        kind = jax.devices()[0].device_kind.lower()
    except Exception:
        pass
    if "v5e" in kind or "v5 lite" in kind or "v5lite" in kind:
        # 128x128 MXU quads -> tn=128; 128 MiB physical VMEM.
        return dict(tn_base=128, tm_max=1024, vmem_limit=96 * 1024 * 1024, cores=1)
    if "7x" in kind or "v7" in kind:
        # 256-wide MXU, but only 64 MiB VMEM and 2 TensorCores per chip.
        return dict(tn_base=256, tm_max=512, vmem_limit=44 * 1024 * 1024, cores=2)
    if "v6" in kind:
        return dict(tn_base=256, tm_max=1024, vmem_limit=64 * 1024 * 1024, cores=1)
    # Unknown generation: conservative budget that fits every listed chip.
    return dict(tn_base=256, tm_max=1024, vmem_limit=40 * 1024 * 1024, cores=1)


HW = _hw_config()


def _select_kn(K, Cout):
    """N/K tile sizes (depend only on static layer dims -> usable at build time)."""
    tn = 256 if (HW["tn_base"] == 256 and Cout > 128) else 128
    Np = _round_up(Cout, tn)
    if K > 512:
        tk = 512
        Kp = _round_up(K, tk)
    else:
        tk = K          # full-extent K block (legal even if not 128-aligned)
        Kp = K
    return tk, tn, Kp, Np


def _select_m(M, Np, tn):
    Mp = _round_up(M, 8)
    if Mp <= HW["tm_max"]:
        tm = Mp
    else:
        tm = HW["tm_max"]
        Mp = _round_up(Mp, tm)
    # Keep at least two parallel tiles so both TensorCores get work on v7x.
    if HW["cores"] >= 2 and (Mp // tm) * (Np // tn) < 2 and tm % 16 == 0:
        tm //= 2
    return tm, Mp


# ---------------------------------------------------------------------------
# Pallas kernels
# ---------------------------------------------------------------------------
def _act(y, act):
    if act == "leaky":
        return jnp.where(y > 0, y, 0.1 * y)
    if act == "relu":
        return jnp.maximum(y, 0.0)
    return y


def _conv_bias_act_kernel(p_ref, w_ref, b_ref, o_ref, acc_ref, *, act):
    """Tiled matmul + bias + activation (no BN).  Grid = (M, N, K)."""
    @pl.when(pl.program_id(2) == 0)
    def _():
        acc_ref[...] = jnp.zeros_like(acc_ref)

    acc_ref[...] += jnp.dot(p_ref[...], w_ref[...],
                            preferred_element_type=jnp.float32)

    @pl.when(pl.program_id(2) == pl.num_programs(2) - 1)
    def _():
        y = _act(acc_ref[...] + b_ref[...], act)
        o_ref[...] = y.astype(o_ref.dtype)


def _conv_stats_kernel(p_ref, w_ref, o_ref, stats_ref, acc_ref):
    """Tiled matmul (bf16 out) + per-M-tile column sum / sumsq for BN."""
    @pl.when(pl.program_id(2) == 0)
    def _():
        acc_ref[...] = jnp.zeros_like(acc_ref)

    acc_ref[...] += jnp.dot(p_ref[...], w_ref[...],
                            preferred_element_type=jnp.float32)

    @pl.when(pl.program_id(2) == pl.num_programs(2) - 1)
    def _():
        acc = acc_ref[...]
        o_ref[...] = acc.astype(o_ref.dtype)
        col_sum = jnp.sum(acc, axis=0, keepdims=True)
        col_ss = jnp.sum(acc * acc, axis=0, keepdims=True)
        # Single (8, tn) store: rows 0/1 = sum / sumsq, rest zero.
        stats_ref[...] = jnp.concatenate(
            [col_sum, col_ss, jnp.zeros((6, acc.shape[1]), jnp.float32)], axis=0)


def _bn_act_kernel(y_ref, scale_ref, shift_ref, o_ref, *, act):
    """BN apply pass: y * scale + shift, activation.  Grid = (M, N)."""
    y = y_ref[...].astype(jnp.float32) * scale_ref[...] + shift_ref[...]
    o_ref[...] = _act(y, act).astype(o_ref.dtype)


def _bn_act_add_kernel(y_ref, scale_ref, shift_ref, res_ref, o_ref, *, act):
    """BN apply + fused residual shortcut (activation first, then add)."""
    y = y_ref[...].astype(jnp.float32) * scale_ref[...] + shift_ref[...]
    y = _act(y, act) + res_ref[...].astype(jnp.float32)
    o_ref[...] = y.astype(o_ref.dtype)


def _add_kernel(a_ref, b_ref, o_ref):
    o_ref[...] = a_ref[...] + b_ref[...]


# ---------------------------------------------------------------------------
# Conv wrapper: tiling, bf16 MXU inputs, two-pass BN with fused shortcut
# ---------------------------------------------------------------------------
def conv_bn_act(patches_bf, M, K, Cout, p, use_bn, act, residual2d=None):
    tk, tn, Kp, Np = _select_kn(K, Cout)
    tm, Mp = _select_m(M, Np, tn)
    gm, gn, gk = Mp // tm, Np // tn, Kp // tk

    assert p["w2d"].shape == (Kp, Np)

    p_bf = patches_bf
    if Mp != M or Kp != K:
        p_bf = jnp.pad(p_bf, ((0, Mp - M), (0, Kp - K)))
    w_bf = p["w2d"]

    cp3 = pltpu.CompilerParams(
        dimension_semantics=("parallel", "parallel", "arbitrary"),
        vmem_limit_bytes=HW["vmem_limit"])
    cp2 = pltpu.CompilerParams(
        dimension_semantics=("parallel", "parallel"),
        vmem_limit_bytes=HW["vmem_limit"])

    # Deeper input buffering only where the serial K loop is long and the
    # extra buffers comfortably fit the VMEM budget.
    if gk >= 4:
        p_spec = pl.BlockSpec((tm, tk), lambda m, n, k: (m, k),
                              pipeline_mode=pl.Buffered(3))
        w_spec = pl.BlockSpec((tk, tn), lambda m, n, k: (k, n),
                              pipeline_mode=pl.Buffered(3))
    else:
        p_spec = pl.BlockSpec((tm, tk), lambda m, n, k: (m, k))
        w_spec = pl.BlockSpec((tk, tn), lambda m, n, k: (k, n))

    if use_bn:
        conv_bf, stats = pl.pallas_call(
            _conv_stats_kernel,
            out_shape=(jax.ShapeDtypeStruct((Mp, Np), jnp.bfloat16),
                       jax.ShapeDtypeStruct((gm * 8, Np), jnp.float32)),
            grid=(gm, gn, gk),
            in_specs=[p_spec, w_spec],
            out_specs=(
                pl.BlockSpec((tm, tn), lambda m, n, k: (m, n)),
                pl.BlockSpec((8, tn), lambda m, n, k: (m, n)),
            ),
            scratch_shapes=[pltpu.VMEM((tm, tn), jnp.float32)],
            compiler_params=cp3,
        )(p_bf, w_bf)

        # Tiny cross-tile reduction (gm partial sums) -> batch statistics.
        s = stats.reshape(gm, 8, Np)
        col_sum = jnp.sum(s[:, 0, :], axis=0)
        col_ss = jnp.sum(s[:, 1, :], axis=0)
        mean = col_sum / M                        # padded rows are zero -> exact
        # TODO(synk): E[x^2]-E[x]^2 can cancel for |mean| >> std; a centered
        # second pass would match PyTorch BN more tightly.
        var = jnp.maximum(col_ss / M - mean * mean, 0.0)
        inv_std = jax.lax.rsqrt(var + EPS)
        scale = (p["gamma_p"] * inv_std).reshape(1, Np)
        shift = (p["beta_p"] - mean * p["gamma_p"] * inv_std).reshape(1, Np)

        if residual2d is not None:
            res_p = residual2d
            if res_p.shape != (Mp, Np):
                res_p = jnp.pad(res_p, ((0, Mp - res_p.shape[0]),
                                        (0, Np - res_p.shape[1])))
            out = pl.pallas_call(
                functools.partial(_bn_act_add_kernel, act=act),
                out_shape=jax.ShapeDtypeStruct((Mp, Np), jnp.bfloat16),
                grid=(gm, gn),
                in_specs=[
                    pl.BlockSpec((tm, tn), lambda m, n: (m, n)),
                    pl.BlockSpec((1, tn), lambda m, n: (0, n)),
                    pl.BlockSpec((1, tn), lambda m, n: (0, n)),
                    pl.BlockSpec((tm, tn), lambda m, n: (m, n)),
                ],
                out_specs=pl.BlockSpec((tm, tn), lambda m, n: (m, n)),
                compiler_params=cp2,
            )(conv_bf, scale, shift, res_p)
        else:
            out = pl.pallas_call(
                functools.partial(_bn_act_kernel, act=act),
                out_shape=jax.ShapeDtypeStruct((Mp, Np), jnp.bfloat16),
                grid=(gm, gn),
                in_specs=[
                    pl.BlockSpec((tm, tn), lambda m, n: (m, n)),
                    pl.BlockSpec((1, tn), lambda m, n: (0, n)),
                    pl.BlockSpec((1, tn), lambda m, n: (0, n)),
                ],
                out_specs=pl.BlockSpec((tm, tn), lambda m, n: (m, n)),
                compiler_params=cp2,
            )(conv_bf, scale, shift)
    else:
        out = pl.pallas_call(
            functools.partial(_conv_bias_act_kernel, act=act),
            out_shape=jax.ShapeDtypeStruct((Mp, Np), jnp.float32),
            grid=(gm, gn, gk),
            in_specs=[p_spec, w_spec,
                      pl.BlockSpec((1, tn), lambda m, n, k: (0, n))],
            out_specs=pl.BlockSpec((tm, tn), lambda m, n, k: (m, n)),
            scratch_shapes=[pltpu.VMEM((tm, tn), jnp.float32)],
            compiler_params=cp3,
        )(p_bf, w_bf, p["bias_p"].reshape(1, Np))

    return out[:M, :Cout]


def shortcut_add_pallas(a, b):
    """Fallback elementwise residual add (used only if the producing conv
    cannot host the fused add, i.e. has no BN)."""
    shape = a.shape
    n = a.size
    LANE = 128
    tr = 1024
    npad = _round_up(n, 8 * LANE)
    R = npad // LANE
    if R <= tr:
        tr = R
    elif R % tr != 0:
        npad = _round_up(n, tr * LANE)
        R = npad // LANE
    af = jnp.pad(a.reshape(-1), (0, npad - n)).reshape(R, LANE)
    bf = jnp.pad(b.reshape(-1), (0, npad - n)).reshape(R, LANE)
    out = pl.pallas_call(
        _add_kernel,
        out_shape=jax.ShapeDtypeStruct((R, LANE), a.dtype),
        grid=(R // tr,),
        in_specs=[pl.BlockSpec((tr, LANE), lambda i: (i, 0)),
                  pl.BlockSpec((tr, LANE), lambda i: (i, 0))],
        out_specs=pl.BlockSpec((tr, LANE), lambda i: (i, 0)),
        compiler_params=pltpu.CompilerParams(
            dimension_semantics=("parallel",),
            vmem_limit_bytes=HW["vmem_limit"]),
    )(af, bf)
    return out.reshape(-1)[:n].reshape(shape)


# ---------------------------------------------------------------------------
# Plain-JAX glue (layout transforms only), NHWC bf16 end-to-end
# ---------------------------------------------------------------------------
def _im2col(x_nhwc, k, stride, pad):
    B, H, W, C = x_nhwc.shape
    OH = (H + 2 * pad - k) // stride + 1
    OW = (W + 2 * pad - k) // stride + 1
    if k == 1 and stride == 1 and pad == 0:
        return x_nhwc.reshape(B * H * W, C), OH, OW
    xp = jnp.pad(x_nhwc, ((0, 0), (pad, pad), (pad, pad), (0, 0)))
    cols = []
    for kh in range(k):
        for kw in range(k):
            cols.append(xp[:, kh:kh + stride * OH:stride,
                           kw:kw + stride * OW:stride, :])
    patches = jnp.concatenate(cols, axis=-1)      # (B, OH, OW, k*k*C), (kh,kw,c)
    return patches.reshape(B * OH * OW, k * k * C), OH, OW


def conv_layer(x_nhwc, p, info, residual=None):
    k = int(info["size"])
    stride = int(info["stride"])
    pad = (k - 1) // 2
    use_bn = info["batch_normalize"] == "1"
    act = info["activation"]
    Cout = int(info["filters"])
    B, H, W, Cin = x_nhwc.shape
    patches, OH, OW = _im2col(x_nhwc, k, stride, pad)
    M, K = patches.shape
    res2d = residual.reshape(M, Cout) if residual is not None else None
    out2d = conv_bn_act(patches, M, K, Cout, p, use_bn, act, res2d)
    return out2d.reshape(B, OH, OW, Cout)


# ---------------------------------------------------------------------------
# Synthetic DarkNet-style config (parse_model_config reads a file -> replaced
# by an in-script cfg with the same layer-type semantics).
# ---------------------------------------------------------------------------
ANCHORS = "10,13,16,30,33,23,30,61,62,45,59,119"
TINY_CFG = [
    {"type": "convolutional", "batch_normalize": "1", "filters": "8",  "size": "3", "stride": "1", "activation": "leaky"},
    {"type": "convolutional", "batch_normalize": "1", "filters": "16", "size": "3", "stride": "2", "activation": "leaky"},
    {"type": "convolutional", "batch_normalize": "1", "filters": "8",  "size": "1", "stride": "1", "activation": "leaky"},
    {"type": "convolutional", "batch_normalize": "1", "filters": "16", "size": "3", "stride": "1", "activation": "leaky"},
    {"type": "shortcut", "from": "-3", "activation": "linear"},
    {"type": "convolutional", "batch_normalize": "1", "filters": "32", "size": "3", "stride": "2", "activation": "leaky"},
    {"type": "convolutional", "batch_normalize": "0", "filters": "27", "size": "1", "stride": "1", "activation": "linear"},
    {"type": "yolo", "mask": "3,4,5", "anchors": ANCHORS, "classes": "4", "ignore_thresh": "0.7"},
    {"type": "route", "layers": "-4"},
    {"type": "convolutional", "batch_normalize": "1", "filters": "8",  "size": "1", "stride": "1", "activation": "leaky"},
    {"type": "upsample", "stride": "2"},
    {"type": "route", "layers": "-1,0"},
    {"type": "convolutional", "batch_normalize": "0", "filters": "27", "size": "1", "stride": "1", "activation": "linear"},
    {"type": "yolo", "mask": "0,1,2", "anchors": ANCHORS, "classes": "4", "ignore_thresh": "0.7"},
]


def build_params(cfg, in_channels, key):
    """Pre-transpose / pre-pad / pre-cast all conv parameters once."""
    params = []
    chans = [in_channels]
    for info in cfg:
        t = info["type"]
        if t == "convolutional":
            cout = int(info["filters"])
            k = int(info["size"])
            cin = chans[-1]
            K = k * k * cin
            _, _, Kp, Np = _select_kn(K, cout)
            key, k1, k2 = jax.random.split(key, 3)
            w = jax.random.normal(k1, (cout, cin, k, k), jnp.float32) * 0.1
            b = jax.random.normal(k2, (cout,), jnp.float32) * 0.01
            # PyTorch conv weight (Cout, Cin, kh, kw) -> (kh, kw, Cin, Cout) flat,
            # padded to (Kp, Np) and cast to bf16 for the MXU.
            w2d = jnp.transpose(w, (2, 3, 1, 0)).reshape(K, cout)
            w2d = jnp.pad(w2d, ((0, Kp - K), (0, Np - cout))).astype(jnp.bfloat16)
            params.append(dict(
                w2d=w2d,
                bias_p=jnp.pad(b, (0, Np - cout)),
                gamma_p=jnp.pad(jnp.ones((cout,), jnp.float32), (0, Np - cout)),
                beta_p=jnp.zeros((Np,), jnp.float32),
            ))
            chans.append(cout)
        elif t == "route":
            layers = [int(y) for y in info["layers"].split(",")]
            if len(layers) == 1:
                chans.append(chans[layers[0]])
            else:
                chans.append(chans[layers[0]] + chans[layers[1] + 1])
            params.append(None)
        else:  # shortcut / upsample / yolo
            params.append(None)
            chans.append(chans[-1])
    return params


def darknet_forward(x_nchw, cfg, params):
    x = jnp.transpose(x_nchw, (0, 2, 3, 1)).astype(jnp.bfloat16)  # NCHW->NHWC, bf16 once
    yolo_result = []
    layer_result = []
    skip_shortcut_add = False
    for idx, (info, p) in enumerate(zip(cfg, params)):
        t = info["type"]
        if t == "convolutional":
            residual = None
            fuse_next = False
            if (idx + 1 < len(cfg) and cfg[idx + 1]["type"] == "shortcut"
                    and info["batch_normalize"] == "1"):
                # shortcut 'from' is relative to the list AFTER this conv is
                # appended; +1 converts it to the current (pre-append) list.
                residual = layer_result[int(cfg[idx + 1]["from"]) + 1]
                fuse_next = True
            x = conv_layer(x, p, info, residual)
            layer_result.append(x)
            skip_shortcut_add = fuse_next
        elif t == "shortcut":
            if not skip_shortcut_add:
                x = shortcut_add_pallas(x, layer_result[int(info["from"])])
            skip_shortcut_add = False
            layer_result.append(x)
        elif t == "yolo":
            n_classes = int(info["classes"])
            box_attr = n_classes + 5
            n_anchor = len(info["mask"].split(","))
            B, H, W, C = x.shape
            # match PyTorch: view(B, A, attr, H, W).permute(0, 1, 3, 4, 2)
            yx = jnp.transpose(x, (0, 3, 1, 2)).reshape(B, n_anchor, box_attr, H, W)
            yx = jnp.transpose(yx, (0, 1, 3, 4, 2))
            layer_result.append(yx)
            yolo_result.append(yx)
        elif t == "upsample":
            s = int(info["stride"])
            x = jnp.repeat(jnp.repeat(x, s, axis=1), s, axis=2)
            layer_result.append(x)
        elif t == "route":
            layers = [int(y) for y in info["layers"].split(",")]
            feats = [layer_result[l] for l in layers]
            x = jnp.concatenate(feats, axis=-1)   # channels-last concat
            layer_result.append(x)
    return yolo_result


if __name__ == "__main__":
    param = {"batch": "2", "in_channels": "3", "in_width": "16", "in_height": "16", "class": "4"}
    B = int(param["batch"])
    C = int(param["in_channels"])
    H = int(param["in_height"])
    W = int(param["in_width"])

    key = jax.random.PRNGKey(0)
    kx, kp = jax.random.split(key)
    x = jax.random.normal(kx, (B, C, H, W), jnp.float32)
    params = build_params(TINY_CFG, C, kp)

    fwd = jax.jit(lambda a, p: darknet_forward(a, TINY_CFG, p))
    outs = fwd(x, params)
    outs = [jax.block_until_ready(o) for o in outs]

    # YOLO head shapes: (B, n_anchors, lh, lw, box_attr) with box_attr = classes + 5
    assert outs[0].shape == (B, 3, 4, 4, 9), outs[0].shape
    assert outs[1].shape == (B, 3, 16, 16, 9), outs[1].shape
    assert all(bool(jnp.all(jnp.isfinite(o.astype(jnp.float32)))) for o in outs)
    print("KERNEL_OK")
</pallas_src>

<mosaic_0001>
module attributes {stable_mosaic.version = 11 : i64} {
  func.func @_conv_stats_kernel(%arg0: i32, %arg1: i32, %arg2: i32, %arg3: memref<512x27xbf16, #tpu.memory_space<vmem>>, %arg4: memref<27x128xbf16, #tpu.memory_space<vmem>>, %arg5: memref<512x128xbf16, #tpu.memory_space<vmem>>, %arg6: memref<8x128xf32, #tpu.memory_space<vmem>>, %arg7: memref<512x128xf32, #tpu.memory_space<vmem>>) attributes {dimension_semantics = [#tpu.dimension_semantics<parallel>, #tpu.dimension_semantics<parallel>, #tpu.dimension_semantics<arbitrary>], iteration_bounds = array<i64: 1, 1, 1>, scalar_prefetch = 0 : i64, scratch_operands = 1 : i64, tpu.core_type = #tpu.core_type<tc>, window_params = [{transform_indices = @transform_0, window_bounds = array<i64: 512, 27>}, {transform_indices = @transform_1, window_bounds = array<i64: 27, 128>}, {transform_indices = @transform_2, window_bounds = array<i64: 512, 128>}, {transform_indices = @transform_3, window_bounds = array<i64: 8, 128>}]} {
    %c0_i32 = arith.constant 0 : i32
    %0 = arith.cmpi eq, %arg2, %c0_i32 : i32
    %1 = arith.extui %0 : i1 to i32
    %c0_i32_0 = arith.constant 0 : i32
    %2 = arith.cmpi ne, %1, %c0_i32_0 : i32
    scf.if %2 {
      %cst_10 = arith.constant 0.000000e+00 : f32
      %12 = vector.broadcast %cst_10 : f32 to vector<512x128xf32>
      %c0_11 = arith.constant 0 : index
      %c0_12 = arith.constant 0 : index
      %13 = vector.load %arg7[%c0_11, %c0_12] : memref<512x128xf32, #tpu.memory_space<vmem>>, vector<512x128xf32>
      tpu.vector_store %arg7[%c0_11, %c0_12], %12 {strides = array<i32>} : memref<512x128xf32, #tpu.memory_space<vmem>>, vector<512x128xf32>,
    } else {
    }
    %c0 = arith.constant 0 : index
    %c0_1 = arith.constant 0 : index
    %3 = vector.load %arg7[%c0, %c0_1] : memref<512x128xf32, #tpu.memory_space<vmem>>, vector<512x128xf32>
    %c0_2 = arith.constant 0 : index
    %c0_3 = arith.constant 0 : index
    %4 = vector.load %arg3[%c0_2, %c0_3] : memref<512x27xbf16, #tpu.memory_space<vmem>>, vector<512x27xbf16>
    %c0_4 = arith.constant 0 : index
    %c0_5 = arith.constant 0 : index
    %5 = vector.load %arg4[%c0_4, %c0_5] : memref<27x128xbf16, #tpu.memory_space<vmem>>, vector<27x128xbf16>
    %cst = arith.constant dense<0.000000e+00> : vector<512x128xf32>
    %6 = tpu.matmul %4, %5, %cst {dimension_numbers = #tpu.dot_dimension_numbers<[1], [0], [0], [1], [0, 0, 1, 1], [], []>} : vector<512x27xbf16>, vector<27x128xbf16>, vector<512x128xf32> -> vector<512x128xf32>
    %7 = arith.addf %3, %6 : vector<512x128xf32>
    %c0_6 = arith.constant 0 : index
    %c0_7 = arith.constant 0 : index
    %8 = vector.load %arg7[%c0_6, %c0_7] : memref<512x128xf32, #tpu.memory_space<vmem>>, vector<512x128xf32>
    tpu.vector_store %arg7[%c0_6, %c0_7], %7 {strides = array<i32>} : memref<512x128xf32, #tpu.memory_space<vmem>>, vector<512x128xf32>,
    %c0_i32_8 = arith.constant 0 : i32
    %9 = arith.cmpi eq, %arg2, %c0_i32_8 : i32
    %10 = arith.extui %9 : i1 to i32
    %c0_i32_9 = arith.constant 0 : i32
    %11 = arith.cmpi ne, %10, %c0_i32_9 : i32
    scf.if %11 {
      %c0_10 = arith.constant 0 : index
      %c0_11 = arith.constant 0 : index
      %12 = vector.load %arg7[%c0_10, %c0_11] : memref<512x128xf32, #tpu.memory_space<vmem>>, vector<512x128xf32>
      %13 = arith.truncf %12 : vector<512x128xf32> to vector<512x128xbf16>
      %c0_12 = arith.constant 0 : index
      %c0_13 = arith.constant 0 : index
      %14 = vector.load %arg5[%c0_12, %c0_13] : memref<512x128xbf16, #tpu.memory_space<vmem>>, vector<512x128xbf16>
      tpu.vector_store %arg5[%c0_12, %c0_13], %13 {strides = array<i32>} : memref<512x128xbf16, #tpu.memory_space<vmem>>, vector<512x128xbf16>,
      %cst_14 = arith.constant dense<0.000000e+00> : vector<128xf32>
      %15 = vector.multi_reduction <add>, %12, %cst_14 [0] : vector<512x128xf32> to vector<128xf32>
      %16 = vector.shape_cast %15 : vector<128xf32> to vector<1x128xf32>
      %17 = arith.mulf %12, %12 : vector<512x128xf32>
      %cst_15 = arith.constant dense<0.000000e+00> : vector<128xf32>
      %18 = vector.multi_reduction <add>, %17, %cst_15 [0] : vector<512x128xf32> to vector<128xf32>
      %19 = vector.shape_cast %18 : vector<128xf32> to vector<1x128xf32>
      %cst_16 = arith.constant 0.000000e+00 : f32
      %20 = vector.broadcast %cst_16 : f32 to vector<6x128xf32>
      %21 = tpu.concatenate %16, %19, %20 in 0 : vector<1x128xf32>, vector<1x128xf32>, vector<6x128xf32> -> vector<8x128xf32>
      %c0_17 = arith.constant 0 : index
      %c0_18 = arith.constant 0 : index
      %22 = vector.load %arg6[%c0_17, %c0_18] : memref<8x128xf32, #tpu.memory_space<vmem>>, vector<8x128xf32>
      tpu.vector_store %arg6[%c0_17, %c0_18], %21 {strides = array<i32>} : memref<8x128xf32, #tpu.memory_space<vmem>>, vector<8x128xf32>,
    } else {
    }
    return
  }
  func.func @transform_0(%arg0: i32, %arg1: i32, %arg2: i32) -> (i32, i32) {
    %c0_i32 = arith.constant 0 : i32
    return %arg0, %arg2 : i32, i32
  }
  func.func @transform_1(%arg0: i32, %arg1: i32, %arg2: i32) -> (i32, i32) {
    %c0_i32 = arith.constant 0 : i32
    return %arg2, %arg1 : i32, i32
  }
  func.func @transform_2(%arg0: i32, %arg1: i32, %arg2: i32) -> (i32, i32) {
    %c0_i32 = arith.constant 0 : i32
    return %arg0, %arg1 : i32, i32
  }
  func.func @transform_3(%arg0: i32, %arg1: i32, %arg2: i32) -> (i32, i32) {
    %c0_i32 = arith.constant 0 : i32
    return %arg0, %arg1 : i32, i32
  }
}

module attributes {stable_mosaic.version = 11 : i64} {
  func.func @_bn_act_kernel(%arg0: i32, %arg1: i32, %arg2: memref<512x128xbf16, #tpu.memory_space<vmem>>, %arg3: memref<1x128xf32, #tpu.memory_space<vmem>>, %arg4: memref<1x128xf32, #tpu.memory_space<vmem>>, %arg5: memref<512x128xbf16, #tpu.memory_space<vmem>>) attributes {dimension_semantics = [#tpu.dimension_semantics<parallel>, #tpu.dimension_semantics<parallel>], iteration_bounds = array<i64: 1, 1>, scalar_prefetch = 0 : i64, scratch_operands = 0 : i64, tpu.core_type = #tpu.core_type<tc>, window_params = [{transform_indices = @transform_0, window_bounds = array<i64: 512, 128>}, {transform_indices = @transform_1, window_bounds = array<i64: 1, 128>}, {transform_indices = @transform_2, window_bounds = array<i64: 1, 128>}, {transform_indices = @transform_3, window_bounds = array<i64: 512, 128>}]} {
    %c0 = arith.constant 0 : index
    %c0_0 = arith.constant 0 : index
    %0 = vector.load %arg2[%c0, %c0_0] : memref<512x128xbf16, #tpu.memory_space<vmem>>, vector<512x128xbf16>
    %1 = arith.extf %0 : vector<512x128xbf16> to vector<512x128xf32>
    %c0_1 = arith.constant 0 : index
    %c0_2 = arith.constant 0 : index
    %2 = vector.load %arg3[%c0_1, %c0_2] : memref<1x128xf32, #tpu.memory_space<vmem>>, vector<1x128xf32>
    %3 = vector.broadcast %2 : vector<1x128xf32> to vector<512x128xf32>
    %4 = arith.mulf %1, %3 : vector<512x128xf32>
    %c0_3 = arith.constant 0 : index
    %c0_4 = arith.constant 0 : index
    %5 = vector.load %arg4[%c0_3, %c0_4] : memref<1x128xf32, #tpu.memory_space<vmem>>, vector<1x128xf32>
    %6 = vector.broadcast %5 : vector<1x128xf32> to vector<512x128xf32>
    %7 = arith.addf %4, %6 : vector<512x128xf32>
    %cst = arith.constant 0.000000e+00 : f32
    %8 = vector.broadcast %cst : f32 to vector<512x128xf32>
    %9 = arith.cmpf ogt, %7, %8 : vector<512x128xf32>
    %cst_5 = arith.constant 1.000000e-01 : f32
    %10 = vector.broadcast %cst_5 : f32 to vector<512x128xf32>
    %11 = arith.mulf %10, %7 : vector<512x128xf32>
    %12 = arith.select %9, %7, %11 : vector<512x128xi1>, vector<512x128xf32>
    %13 = arith.truncf %12 : vector<512x128xf32> to vector<512x128xbf16>
    %c0_6 = arith.constant 0 : index
    %c0_7 = arith.constant 0 : index
    %14 = vector.load %arg5[%c0_6, %c0_7] : memref<512x128xbf16, #tpu.memory_space<vmem>>, vector<512x128xbf16>
    tpu.vector_store %arg5[%c0_6, %c0_7], %13 {strides = array<i32>} : memref<512x128xbf16, #tpu.memory_space<vmem>>, vector<512x128xbf16>,
    return
  }
  func.func @transform_0(%arg0: i32, %arg1: i32) -> (i32, i32) {
    %c0_i32 = arith.constant 0 : i32
    return %arg0, %arg1 : i32, i32
  }
  func.func @transform_1(%arg0: i32, %arg1: i32) -> (i32, i32) {
    %c0_i32 = arith.constant 0 : i32
    %c0_i32_0 = arith.constant 0 : i32
    return %c0_i32, %arg1 : i32, i32
  }
  func.func @transform_2(%arg0: i32, %arg1: i32) -> (i32, i32) {
    %c0_i32 = arith.constant 0 : i32
    %c0_i32_0 = arith.constant 0 : i32
    return %c0_i32, %arg1 : i32, i32
  }
  func.func @transform_3(%arg0: i32, %arg1: i32) -> (i32, i32) {
    %c0_i32 = arith.constant 0 : i32
    return %arg0, %arg1 : i32, i32
  }
}

module attributes {stable_mosaic.version = 11 : i64} {
  func.func @_conv_stats_kernel(%arg0: i32, %arg1: i32, %arg2: i32, %arg3: memref<128x72xbf16, #tpu.memory_space<vmem>>, %arg4: memref<72x128xbf16, #tpu.memory_space<vmem>>, %arg5: memref<128x128xbf16, #tpu.memory_space<vmem>>, %arg6: memref<8x128xf32, #tpu.memory_space<vmem>>, %arg7: memref<128x128xf32, #tpu.memory_space<vmem>>) attributes {dimension_semantics = [#tpu.dimension_semantics<parallel>, #tpu.dimension_semantics<parallel>, #tpu.dimension_semantics<arbitrary>], iteration_bounds = array<i64: 1, 1, 1>, scalar_prefetch = 0 : i64, scratch_operands = 1 : i64, tpu.core_type = #tpu.core_type<tc>, window_params = [{transform_indices = @transform_0, window_bounds = array<i64: 128, 72>}, {transform_indices = @transform_1, window_bounds = array<i64: 72, 128>}, {transform_indices = @transform_2, window_bounds = array<i64: 128, 128>}, {transform_indices = @transform_3, window_bounds = array<i64: 8, 128>}]} {
    %c0_i32 = arith.constant 0 : i32
    %0 = arith.cmpi eq, %arg2, %c0_i32 : i32
    %1 = arith.extui %0 : i1 to i32
    %c0_i32_0 = arith.constant 0 : i32
    %2 = arith.cmpi ne, %1, %c0_i32_0 : i32
    scf.if %2 {
      %cst_10 = arith.constant 0.000000e+00 : f32
      %12 = vector.broadcast %cst_10 : f32 to vector<128x128xf32>
      %c0_11 = arith.constant 0 : index
      %c0_12 = arith.constant 0 : index
      %13 = vector.load %arg7[%c0_11, %c0_12] : memref<128x128xf32, #tpu.memory_space<vmem>>, vector<128x128xf32>
      tpu.vector_store %arg7[%c0_11, %c0_12], %12 {strides = array<i32>} : memref<128x128xf32, #tpu.memory_space<vmem>>, vector<128x128xf32>,
    } else {
    }
    %c0 = arith.constant 0 : index
    %c0_1 = arith.constant 0 : index
    %3 = vector.load %arg7[%c0, %c0_1] : memref<128x128xf32, #tpu.memory_space<vmem>>, vector<128x128xf32>
    %c0_2 = arith.constant 0 : index
    %c0_3 = arith.constant 0 : index
    %4 = vector.load %arg3[%c0_2, %c0_3] : memref<128x72xbf16, #tpu.memory_space<vmem>>, vector<128x72xbf16>
    %c0_4 = arith.constant 0 : index
    %c0_5 = arith.constant 0 : index
    %5 = vector.load %arg4[%c0_4, %c0_5] : memref<72x128xbf16, #tpu.memory_space<vmem>>, vector<72x128xbf16>
    %cst = arith.constant dense<0.000000e+00> : vector<128x128xf32>
    %6 = tpu.matmul %4, %5, %cst {dimension_numbers = #tpu.dot_dimension_numbers<[1], [0], [0], [1], [0, 0, 1, 1], [], []>} : vector<128x72xbf16>, vector<72x128xbf16>, vector<128x128xf32> -> vector<128x128xf32>
    %7 = arith.addf %3, %6 : vector<128x128xf32>
    %c0_6 = arith.constant 0 : index
    %c0_7 = arith.constant 0 : index
    %8 = vector.load %arg7[%c0_6, %c0_7] : memref<128x128xf32, #tpu.memory_space<vmem>>, vector<128x128xf32>
    tpu.vector_store %arg7[%c0_6, %c0_7], %7 {strides = array<i32>} : memref<128x128xf32, #tpu.memory_space<vmem>>, vector<128x128xf32>,
    %c0_i32_8 = arith.constant 0 : i32
    %9 = arith.cmpi eq, %arg2, %c0_i32_8 : i32
    %10 = arith.extui %9 : i1 to i32
    %c0_i32_9 = arith.constant 0 : i32
    %11 = arith.cmpi ne, %10, %c0_i32_9 : i32
    scf.if %11 {
      %c0_10 = arith.constant 0 : index
      %c0_11 = arith.constant 0 : index
      %12 = vector.load %arg7[%c0_10, %c0_11] : memref<128x128xf32, #tpu.memory_space<vmem>>, vector<128x128xf32>
      %13 = arith.truncf %12 : vector<128x128xf32> to vector<128x128xbf16>
      %c0_12 = arith.constant 0 : index
      %c0_13 = arith.constant 0 : index
      %14 = vector.load %arg5[%c0_12, %c0_13] : memref<128x128xbf16, #tpu.memory_space<vmem>>, vector<128x128xbf16>
      tpu.vector_store %arg5[%c0_12, %c0_13], %13 {strides = array<i32>} : memref<128x128xbf16, #tpu.memory_space<vmem>>, vector<128x128xbf16>,
      %cst_14 = arith.constant dense<0.000000e+00> : vector<128xf32>
      %15 = vector.multi_reduction <add>, %12, %cst_14 [0] : vector<128x128xf32> to vector<128xf32>
      %16 = vector.shape_cast %15 : vector<128xf32> to vector<1x128xf32>
      %17 = arith.mulf %12, %12 : vector<128x128xf32>
      %cst_15 = arith.constant dense<0.000000e+00> : vector<128xf32>
      %18 = vector.multi_reduction <add>, %17, %cst_15 [0] : vector<128x128xf32> to vector<128xf32>
      %19 = vector.shape_cast %18 : vector<128xf32> to vector<1x128xf32>
      %cst_16 = arith.constant 0.000000e+00 : f32
      %20 = vector.broadcast %cst_16 : f32 to vector<6x128xf32>
      %21 = tpu.concatenate %16, %19, %20 in 0 : vector<1x128xf32>, vector<1x128xf32>, vector<6x128xf32> -> vector<8x128xf32>
      %c0_17 = arith.constant 0 : index
      %c0_18 = arith.constant 0 : index
      %22 = vector.load %arg6[%c0_17, %c0_18] : memref<8x128xf32, #tpu.memory_space<vmem>>, vector<8x128xf32>
      tpu.vector_store %arg6[%c0_17, %c0_18], %21 {strides = array<i32>} : memref<8x128xf32, #tpu.memory_space<vmem>>, vector<8x128xf32>,
    } else {
    }
    return
  }
  func.func @transform_0(%arg0: i32, %arg1: i32, %arg2: i32) -> (i32, i32) {
    %c0_i32 = arith.constant 0 : i32
    return %arg0, %arg2 : i32, i32
  }
  func.func @transform_1(%arg0: i32, %arg1: i32, %arg2: i32) -> (i32, i32) {
    %c0_i32 = arith.constant 0 : i32
    return %arg2, %arg1 : i32, i32
  }
  func.func @transform_2(%arg0: i32, %arg1: i32, %arg2: i32) -> (i32, i32) {
    %c0_i32 = arith.constant 0 : i32
    return %arg0, %arg1 : i32, i32
  }
  func.func @transform_3(%arg0: i32, %arg1: i32, %arg2: i32) -> (i32, i32) {
    %c0_i32 = arith.constant 0 : i32
    return %arg0, %arg1 : i32, i32
  }
}

module attributes {stable_mosaic.version = 11 : i64} {
  func.func @_bn_act_kernel(%arg0: i32, %arg1: i32, %arg2: memref<128x128xbf16, #tpu.memory_space<vmem>>, %arg3: memref<1x128xf32, #tpu.memory_space<vmem>>, %arg4: memref<1x128xf32, #tpu.memory_space<vmem>>, %arg5: memref<128x128xbf16, #tpu.memory_space<vmem>>) attributes {dimension_semantics = [#tpu.dimension_semantics<parallel>, #tpu.dimension_semantics<parallel>], iteration_bounds = array<i64: 1, 1>, scalar_prefetch = 0 : i64, scratch_operands = 0 : i64, tpu.core_type = #tpu.core_type<tc>, window_params = [{transform_indices = @transform_0, window_bounds = array<i64: 128, 128>}, {transform_indices = @transform_1, window_bounds = array<i64: 1, 128>}, {transform_indices = @transform_2, window_bounds = array<i64: 1, 128>}, {transform_indices = @transform_3, window_bounds = array<i64: 128, 128>}]} {
    %c0 = arith.constant 0 : index
    %c0_0 = arith.constant 0 : index
    %0 = vector.load %arg2[%c0, %c0_0] : memref<128x128xbf16, #tpu.memory_space<vmem>>, vector<128x128xbf16>
    %1 = arith.extf %0 : vector<128x128xbf16> to vector<128x128xf32>
    %c0_1 = arith.constant 0 : index
    %c0_2 = arith.constant 0 : index
    %2 = vector.load %arg3[%c0_1, %c0_2] : memref<1x128xf32, #tpu.memory_space<vmem>>, vector<1x128xf32>
    %3 = vector.broadcast %2 : vector<1x128xf32> to vector<128x128xf32>
    %4 = arith.mulf %1, %3 : vector<128x128xf32>
    %c0_3 = arith.constant 0 : index
    %c0_4 = arith.constant 0 : index
    %5 = vector.load %arg4[%c0_3, %c0_4] : memref<1x128xf32, #tpu.memory_space<vmem>>, vector<1x128xf32>
    %6 = vector.broadcast %5 : vector<1x128xf32> to vector<128x128xf32>
    %7 = arith.addf %4, %6 : vector<128x128xf32>
    %cst = arith.constant 0.000000e+00 : f32
    %8 = vector.broadcast %cst : f32 to vector<128x128xf32>
    %9 = arith.cmpf ogt, %7, %8 : vector<128x128xf32>
    %cst_5 = arith.constant 1.000000e-01 : f32
    %10 = vector.broadcast %cst_5 : f32 to vector<128x128xf32>
    %11 = arith.mulf %10, %7 : vector<128x128xf32>
    %12 = arith.select %9, %7, %11 : vector<128x128xi1>, vector<128x128xf32>
    %13 = arith.truncf %12 : vector<128x128xf32> to vector<128x128xbf16>
    %c0_6 = arith.constant 0 : index
    %c0_7 = arith.constant 0 : index
    %14 = vector.load %arg5[%c0_6, %c0_7] : memref<128x128xbf16, #tpu.memory_space<vmem>>, vector<128x128xbf16>
    tpu.vector_store %arg5[%c0_6, %c0_7], %13 {strides = array<i32>} : memref<128x128xbf16, #tpu.memory_space<vmem>>, vector<128x128xbf16>,
    return
  }
  func.func @transform_0(%arg0: i32, %arg1: i32) -> (i32, i32) {
    %c0_i32 = arith.constant 0 : i32
    return %arg0, %arg1 : i32, i32
  }
  func.func @transform_1(%arg0: i32, %arg1: i32) -> (i32, i32) {
    %c0_i32 = arith.constant 0 : i32
    %c0_i32_0 = arith.constant 0 : i32
    return %c0_i32, %arg1 : i32, i32
  }
  func.func @transform_2(%arg0: i32, %arg1: i32) -> (i32, i32) {
    %c0_i32 = arith.constant 0 : i32
    %c0_i32_0 = arith.constant 0 : i32
    return %c0_i32, %arg1 : i32, i32
  }
  func.func @transform_3(%arg0: i32, %arg1: i32) -> (i32, i32) {
    %c0_i32 = arith.constant 0 : i32
    return %arg0, %arg1 : i32, i32
  }
}

module attributes {stable_mosaic.version = 11 : i64} {
  func.func @_conv_stats_kernel(%arg0: i32, %arg1: i32, %arg2: i32, %arg3: memref<128x16xbf16, #tpu.memory_space<vmem>>, %arg4: memref<16x128xbf16, #tpu.memory_space<vmem>>, %arg5: memref<128x128xbf16, #tpu.memory_space<vmem>>, %arg6: memref<8x128xf32, #tpu.memory_space<vmem>>, %arg7: memref<128x128xf32, #tpu.memory_space<vmem>>) attributes {dimension_semantics = [#tpu.dimension_semantics<parallel>, #tpu.dimension_semantics<parallel>, #tpu.dimension_semantics<arbitrary>], iteration_bounds = array<i64: 1, 1, 1>, scalar_prefetch = 0 : i64, scratch_operands = 1 : i64, tpu.core_type = #tpu.core_type<tc>, window_params = [{transform_indices = @transform_0, window_bounds = array<i64: 128, 16>}, {transform_indices = @transform_1, window_bounds = array<i64: 16, 128>}, {transform_indices = @transform_2, window_bounds = array<i64: 128, 128>}, {transform_indices = @transform_3, window_bounds = array<i64: 8, 128>}]} {
    %c0_i32 = arith.constant 0 : i32
    %0 = arith.cmpi eq, %arg2, %c0_i32 : i32
    %1 = arith.extui %0 : i1 to i32
    %c0_i32_0 = arith.constant 0 : i32
    %2 = arith.cmpi ne, %1, %c0_i32_0 : i32
    scf.if %2 {
      %cst_10 = arith.constant 0.000000e+00 : f32
      %12 = vector.broadcast %cst_10 : f32 to vector<128x128xf32>
      %c0_11 = arith.constant 0 : index
      %c0_12 = arith.constant 0 : index
      %13 = vector.load %arg7[%c0_11, %c0_12] : memref<128x128xf32, #tpu.memory_space<vmem>>, vector<128x128xf32>
      tpu.vector_store %arg7[%c0_11, %c0_12], %12 {strides = array<i32>} : memref<128x128xf32, #tpu.memory_space<vmem>>, vector<128x128xf32>,
    } else {
    }
    %c0 = arith.constant 0 : index
    %c0_1 = arith.constant 0 : index
    %3 = vector.load %arg7[%c0, %c0_1] : memref<128x128xf32, #tpu.memory_space<vmem>>, vector<128x128xf32>
    %c0_2 = arith.constant 0 : index
    %c0_3 = arith.constant 0 : index
    %4 = vector.load %arg3[%c0_2, %c0_3] : memref<128x16xbf16, #tpu.memory_space<vmem>>, vector<128x16xbf16>
    %c0_4 = arith.constant 0 : index
    %c0_5 = arith.constant 0 : index
    %5 = vector.load %arg4[%c0_4, %c0_5] : memref<16x128xbf16, #tpu.memory_space<vmem>>, vector<16x128xbf16>
    %cst = arith.constant dense<0.000000e+00> : vector<128x128xf32>
    %6 = tpu.matmul %4, %5, %cst {dimension_numbers = #tpu.dot_dimension_numbers<[1], [0], [0], [1], [0, 0, 1, 1], [], []>} : vector<128x16xbf16>, vector<16x128xbf16>, vector<128x128xf32> -> vector<128x128xf32>
    %7 = arith.addf %3, %6 : vector<128x128xf32>
    %c0_6 = arith.constant 0 : index
    %c0_7 = arith.constant 0 : index
    %8 = vector.load %arg7[%c0_6, %c0_7] : memref<128x128xf32, #tpu.memory_space<vmem>>, vector<128x128xf32>
    tpu.vector_store %arg7[%c0_6, %c0_7], %7 {strides = array<i32>} : memref<128x128xf32, #tpu.memory_space<vmem>>, vector<128x128xf32>,
    %c0_i32_8 = arith.constant 0 : i32
    %9 = arith.cmpi eq, %arg2, %c0_i32_8 : i32
    %10 = arith.extui %9 : i1 to i32
    %c0_i32_9 = arith.constant 0 : i32
    %11 = arith.cmpi ne, %10, %c0_i32_9 : i32
    scf.if %11 {
      %c0_10 = arith.constant 0 : index
      %c0_11 = arith.constant 0 : index
      %12 = vector.load %arg7[%c0_10, %c0_11] : memref<128x128xf32, #tpu.memory_space<vmem>>, vector<128x128xf32>
      %13 = arith.truncf %12 : vector<128x128xf32> to vector<128x128xbf16>
      %c0_12 = arith.constant 0 : index
      %c0_13 = arith.constant 0 : index
      %14 = vector.load %arg5[%c0_12, %c0_13] : memref<128x128xbf16, #tpu.memory_space<vmem>>, vector<128x128xbf16>
      tpu.vector_store %arg5[%c0_12, %c0_13], %13 {strides = array<i32>} : memref<128x128xbf16, #tpu.memory_space<vmem>>, vector<128x128xbf16>,
      %cst_14 = arith.constant dense<0.000000e+00> : vector<128xf32>
      %15 = vector.multi_reduction <add>, %12, %cst_14 [0] : vector<128x128xf32> to vector<128xf32>
      %16 = vector.shape_cast %15 : vector<128xf32> to vector<1x128xf32>
      %17 = arith.mulf %12, %12 : vector<128x128xf32>
      %cst_15 = arith.constant dense<0.000000e+00> : vector<128xf32>
      %18 = vector.multi_reduction <add>, %17, %cst_15 [0] : vector<128x128xf32> to vector<128xf32>
      %19 = vector.shape_cast %18 : vector<128xf32> to vector<1x128xf32>
      %cst_16 = arith.constant 0.000000e+00 : f32
      %20 = vector.broadcast %cst_16 : f32 to vector<6x128xf32>
      %21 = tpu.concatenate %16, %19, %20 in 0 : vector<1x128xf32>, vector<1x128xf32>, vector<6x128xf32> -> vector<8x128xf32>
      %c0_17 = arith.constant 0 : index
      %c0_18 = arith.constant 0 : index
      %22 = vector.load %arg6[%c0_17, %c0_18] : memref<8x128xf32, #tpu.memory_space<vmem>>, vector<8x128xf32>
      tpu.vector_store %arg6[%c0_17, %c0_18], %21 {strides = array<i32>} : memref<8x128xf32, #tpu.memory_space<vmem>>, vector<8x128xf32>,
    } else {
    }
    return
  }
  func.func @transform_0(%arg0: i32, %arg1: i32, %arg2: i32) -> (i32, i32) {
    %c0_i32 = arith.constant 0 : i32
    return %arg0, %arg2 : i32, i32
  }
  func.func @transform_1(%arg0: i32, %arg1: i32, %arg2: i32) -> (i32, i32) {
    %c0_i32 = arith.constant 0 : i32
    return %arg2, %arg1 : i32, i32
  }
  func.func @transform_2(%arg0: i32, %arg1: i32, %arg2: i32) -> (i32, i32) {
    %c0_i32 = arith.constant 0 : i32
    return %arg0, %arg1 : i32, i32
  }
  func.func @transform_3(%arg0: i32, %arg1: i32, %arg2: i32) -> (i32, i32) {
    %c0_i32 = arith.constant 0 : i32
    return %arg0, %arg1 : i32, i32
  }
}

module attributes {stable_mosaic.version = 11 : i64} {
  func.func @_bn_act_add_kernel(%arg0: i32, %arg1: i32, %arg2: memref<128x128xbf16, #tpu.memory_space<vmem>>, %arg3: memref<1x128xf32, #tpu.memory_space<vmem>>, %arg4: memref<1x128xf32, #tpu.memory_space<vmem>>, %arg5: memref<128x128xbf16, #tpu.memory_space<vmem>>, %arg6: memref<128x128xbf16, #tpu.memory_space<vmem>>) attributes {dimension_semantics = [#tpu.dimension_semantics<parallel>, #tpu.dimension_semantics<parallel>], iteration_bounds = array<i64: 1, 1>, scalar_prefetch = 0 : i64, scratch_operands = 0 : i64, tpu.core_type = #tpu.core_type<tc>, window_params = [{transform_indices = @transform_0, window_bounds = array<i64: 128, 128>}, {transform_indices = @transform_1, window_bounds = array<i64: 1, 128>}, {transform_indices = @transform_2, window_bounds = array<i64: 1, 128>}, {transform_indices = @transform_3, window_bounds = array<i64: 128, 128>}, {transform_indices = @transform_4, window_bounds = array<i64: 128, 128>}]} {
    %c0 = arith.constant 0 : index
    %c0_0 = arith.constant 0 : index
    %0 = vector.load %arg2[%c0, %c0_0] : memref<128x128xbf16, #tpu.memory_space<vmem>>, vector<128x128xbf16>
    %1 = arith.extf %0 : vector<128x128xbf16> to vector<128x128xf32>
    %c0_1 = arith.constant 0 : index
    %c0_2 = arith.constant 0 : index
    %2 = vector.load %arg3[%c0_1, %c0_2] : memref<1x128xf32, #tpu.memory_space<vmem>>, vector<1x128xf32>
    %3 = vector.broadcast %2 : vector<1x128xf32> to vector<128x128xf32>
    %4 = arith.mulf %1, %3 : vector<128x128xf32>
    %c0_3 = arith.constant 0 : index
    %c0_4 = arith.constant 0 : index
    %5 = vector.load %arg4[%c0_3, %c0_4] : memref<1x128xf32, #tpu.memory_space<vmem>>, vector<1x128xf32>
    %6 = vector.broadcast %5 : vector<1x128xf32> to vector<128x128xf32>
    %7 = arith.addf %4, %6 : vector<128x128xf32>
    %cst = arith.constant 0.000000e+00 : f32
    %8 = vector.broadcast %cst : f32 to vector<128x128xf32>
    %9 = arith.cmpf ogt, %7, %8 : vector<128x128xf32>
    %cst_5 = arith.constant 1.000000e-01 : f32
    %10 = vector.broadcast %cst_5 : f32 to vector<128x128xf32>
    %11 = arith.mulf %10, %7 : vector<128x128xf32>
    %12 = arith.select %9, %7, %11 : vector<128x128xi1>, vector<128x128xf32>
    %c0_6 = arith.constant 0 : index
    %c0_7 = arith.constant 0 : index
    %13 = vector.load %arg5[%c0_6, %c0_7] : memref<128x128xbf16, #tpu.memory_space<vmem>>, vector<128x128xbf16>
    %14 = arith.extf %13 : vector<128x128xbf16> to vector<128x128xf32>
    %15 = arith.addf %12, %14 : vector<128x128xf32>
    %16 = arith.truncf %15 : vector<128x128xf32> to vector<128x128xbf16>
    %c0_8 = arith.constant 0 : index
    %c0_9 = arith.constant 0 : index
    %17 = vector.load %arg6[%c0_8, %c0_9] : memref<128x128xbf16, #tpu.memory_space<vmem>>, vector<128x128xbf16>
    tpu.vector_store %arg6[%c0_8, %c0_9], %16 {strides = array<i32>} : memref<128x128xbf16, #tpu.memory_space<vmem>>, vector<128x128xbf16>,
    return
  }
  func.func @transform_0(%arg0: i32, %arg1: i32) -> (i32, i32) {
    %c0_i32 = arith.constant 0 : i32
    return %arg0, %arg1 : i32, i32
  }
  func.func @transform_1(%arg0: i32, %arg1: i32) -> (i32, i32) {
    %c0_i32 = arith.constant 0 : i32
    %c0_i32_0 = arith.constant 0 : i32
    return %c0_i32, %arg1 : i32, i32
  }
  func.func @transform_2(%arg0: i32, %arg1: i32) -> (i32, i32) {
    %c0_i32 = arith.constant 0 : i32
    %c0_i32_0 = arith.constant 0 : i32
    return %c0_i32, %arg1 : i32, i32
  }
  func.func @transform_3(%arg0: i32, %arg1: i32) -> (i32, i32) {
    %c0_i32 = arith.constant 0 : i32
    return %arg0, %arg1 : i32, i32
  }
  func.func @transform_4(%arg0: i32, %arg1: i32) -> (i32, i32) {
    %c0_i32 = arith.constant 0 : i32
    return %arg0, %arg1 : i32, i32
  }
}

module attributes {stable_mosaic.version = 11 : i64} {
  func.func @_conv_bias_act_kernel(%arg0: i32, %arg1: i32, %arg2: i32, %arg3: memref<512x16xbf16, #tpu.memory_space<vmem>>, %arg4: memref<16x128xbf16, #tpu.memory_space<vmem>>, %arg5: memref<1x128xf32, #tpu.memory_space<vmem>>, %arg6: memref<512x128xf32, #tpu.memory_space<vmem>>, %arg7: memref<512x128xf32, #tpu.memory_space<vmem>>) attributes {dimension_semantics = [#tpu.dimension_semantics<parallel>, #tpu.dimension_semantics<parallel>, #tpu.dimension_semantics<arbitrary>], iteration_bounds = array<i64: 1, 1, 1>, scalar_prefetch = 0 : i64, scratch_operands = 1 : i64, tpu.core_type = #tpu.core_type<tc>, window_params = [{transform_indices = @transform_0, window_bounds = array<i64: 512, 16>}, {transform_indices = @transform_1, window_bounds = array<i64: 16, 128>}, {transform_indices = @transform_2, window_bounds = array<i64: 1, 128>}, {transform_indices = @transform_3, window_bounds = array<i64: 512, 128>}]} {
    %c0_i32 = arith.constant 0 : i32
    %0 = arith.cmpi eq, %arg2, %c0_i32 : i32
    %1 = arith.extui %0 : i1 to i32
    %c0_i32_0 = arith.constant 0 : i32
    %2 = arith.cmpi ne, %1, %c0_i32_0 : i32
    scf.if %2 {
      %cst_10 = arith.constant 0.000000e+00 : f32
      %12 = vector.broadcast %cst_10 : f32 to vector<512x128xf32>
      %c0_11 = arith.constant 0 : index
      %c0_12 = arith.constant 0 : index
      %13 = vector.load %arg7[%c0_11, %c0_12] : memref<512x128xf32, #tpu.memory_space<vmem>>, vector<512x128xf32>
      tpu.vector_store %arg7[%c0_11, %c0_12], %12 {strides = array<i32>} : memref<512x128xf32, #tpu.memory_space<vmem>>, vector<512x128xf32>,
    } else {
    }
    %c0 = arith.constant 0 : index
    %c0_1 = arith.constant 0 : index
    %3 = vector.load %arg7[%c0, %c0_1] : memref<512x128xf32, #tpu.memory_space<vmem>>, vector<512x128xf32>
    %c0_2 = arith.constant 0 : index
    %c0_3 = arith.constant 0 : index
    %4 = vector.load %arg3[%c0_2, %c0_3] : memref<512x16xbf16, #tpu.memory_space<vmem>>, vector<512x16xbf16>
    %c0_4 = arith.constant 0 : index
    %c0_5 = arith.constant 0 : index
    %5 = vector.load %arg4[%c0_4, %c0_5] : memref<16x128xbf16, #tpu.memory_space<vmem>>, vector<16x128xbf16>
    %cst = arith.constant dense<0.000000e+00> : vector<512x128xf32>
    %6 = tpu.matmul %4, %5, %cst {dimension_numbers = #tpu.dot_dimension_numbers<[1], [0], [0], [1], [0, 0, 1, 1], [], []>} : vector<512x16xbf16>, vector<16x128xbf16>, vector<512x128xf32> -> vector<512x128xf32>
    %7 = arith.addf %3, %6 : vector<512x128xf32>
    %c0_6 = arith.constant 0 : index
    %c0_7 = arith.constant 0 : index
    %8 = vector.load %arg7[%c0_6, %c0_7] : memref<512x128xf32, #tpu.memory_space<vmem>>, vector<512x128xf32>
    tpu.vector_store %arg7[%c0_6, %c0_7], %7 {strides = array<i32>} : memref<512x128xf32, #tpu.memory_space<vmem>>, vector<512x128xf32>,
    %c0_i32_8 = arith.constant 0 : i32
    %9 = arith.cmpi eq, %arg2, %c0_i32_8 : i32
    %10 = arith.extui %9 : i1 to i32
    %c0_i32_9 = arith.constant 0 : i32
    %11 = arith.cmpi ne, %10, %c0_i32_9 : i32
    scf.if %11 {
      %c0_10 = arith.constant 0 : index
      %c0_11 = arith.constant 0 : index
      %12 = vector.load %arg7[%c0_10, %c0_11] : memref<512x128xf32, #tpu.memory_space<vmem>>, vector<512x128xf32>
      %c0_12 = arith.constant 0 : index
      %c0_13 = arith.constant 0 : index
      %13 = vector.load %arg5[%c0_12, %c0_13] : memref<1x128xf32, #tpu.memory_space<vmem>>, vector<1x128xf32>
      %14 = vector.broadcast %13 : vector<1x128xf32> to vector<512x128xf32>
      %15 = arith.addf %12, %14 : vector<512x128xf32>
      %c0_14 = arith.constant 0 : index
      %c0_15 = arith.constant 0 : index
      %16 = vector.load %arg6[%c0_14, %c0_15] : memref<512x128xf32, #tpu.memory_space<vmem>>, vector<512x128xf32>
      tpu.vector_store %arg6[%c0_14, %c0_15], %15 {strides = array<i32>} : memref<512x128xf32, #tpu.memory_space<vmem>>, vector<512x128xf32>,
    } else {
    }
    return
  }
  func.func @transform_0(%arg0: i32, %arg1: i32, %arg2: i32) -> (i32, i32) {
    %c0_i32 = arith.constant 0 : i32
    return %arg0, %arg2 : i32, i32
  }
  func.func @transform_1(%arg0: i32, %arg1: i32, %arg2: i32) -> (i32, i32) {
    %c0_i32 = arith.constant 0 : i32
    return %arg2, %arg1 : i32, i32
  }
  func.func @transform_2(%arg0: i32, %arg1: i32, %arg2: i32) -> (i32, i32) {
    %c0_i32 = arith.constant 0 : i32
    %c0_i32_0 = arith.constant 0 : i32
    return %c0_i32, %arg1 : i32, i32
  }
  func.func @transform_3(%arg0: i32, %arg1: i32, %arg2: i32) -> (i32, i32) {
    %c0_i32 = arith.constant 0 : i32
    return %arg0, %arg1 : i32, i32
  }
}

module attributes {stable_mosaic.version = 11 : i64} {
  func.func @_conv_stats_kernel(%arg0: i32, %arg1: i32, %arg2: i32, %arg3: memref<32x144xbf16, #tpu.memory_space<vmem>>, %arg4: memref<144x128xbf16, #tpu.memory_space<vmem>>, %arg5: memref<32x128xbf16, #tpu.memory_space<vmem>>, %arg6: memref<8x128xf32, #tpu.memory_space<vmem>>, %arg7: memref<32x128xf32, #tpu.memory_space<vmem>>) attributes {dimension_semantics = [#tpu.dimension_semantics<parallel>, #tpu.dimension_semantics<parallel>, #tpu.dimension_semantics<arbitrary>], iteration_bounds = array<i64: 1, 1, 1>, scalar_prefetch = 0 : i64, scratch_operands = 1 : i64, tpu.core_type = #tpu.core_type<tc>, window_params = [{transform_indices = @transform_0, window_bounds = array<i64: 32, 144>}, {transform_indices = @transform_1, window_bounds = array<i64: 144, 128>}, {transform_indices = @transform_2, window_bounds = array<i64: 32, 128>}, {transform_indices = @transform_3, window_bounds = array<i64: 8, 128>}]} {
    %c0_i32 = arith.constant 0 : i32
    %0 = arith.cmpi eq, %arg2, %c0_i32 : i32
    %1 = arith.extui %0 : i1 to i32
    %c0_i32_0 = arith.constant 0 : i32
    %2 = arith.cmpi ne, %1, %c0_i32_0 : i32
    scf.if %2 {
      %cst_10 = arith.constant 0.000000e+00 : f32
      %12 = vector.broadcast %cst_10 : f32 to vector<32x128xf32>
      %c0_11 = arith.constant 0 : index
      %c0_12 = arith.constant 0 : index
      %13 = vector.load %arg7[%c0_11, %c0_12] : memref<32x128xf32, #tpu.memory_space<vmem>>, vector<32x128xf32>
      tpu.vector_store %arg7[%c0_11, %c0_12], %12 {strides = array<i32>} : memref<32x128xf32, #tpu.memory_space<vmem>>, vector<32x128xf32>,
    } else {
    }
    %c0 = arith.constant 0 : index
    %c0_1 = arith.constant 0 : index
    %3 = vector.load %arg7[%c0, %c0_1] : memref<32x128xf32, #tpu.memory_space<vmem>>, vector<32x128xf32>
    %c0_2 = arith.constant 0 : index
    %c0_3 = arith.constant 0 : index
    %4 = vector.load %arg3[%c0_2, %c0_3] : memref<32x144xbf16, #tpu.memory_space<vmem>>, vector<32x144xbf16>
    %c0_4 = arith.constant 0 : index
    %c0_5 = arith.constant 0 : index
    %5 = vector.load %arg4[%c0_4, %c0_5] : memref<144x128xbf16, #tpu.memory_space<vmem>>, vector<144x128xbf16>
    %cst = arith.constant dense<0.000000e+00> : vector<32x128xf32>
    %6 = tpu.matmul %4, %5, %cst {dimension_numbers = #tpu.dot_dimension_numbers<[1], [0], [0], [1], [0, 0, 1, 1], [], []>} : vector<32x144xbf16>, vector<144x128xbf16>, vector<32x128xf32> -> vector<32x128xf32>
    %7 = arith.addf %3, %6 : vector<32x128xf32>
    %c0_6 = arith.constant 0 : index
    %c0_7 = arith.constant 0 : index
    %8 = vector.load %arg7[%c0_6, %c0_7] : memref<32x128xf32, #tpu.memory_space<vmem>>, vector<32x128xf32>
    tpu.vector_store %arg7[%c0_6, %c0_7], %7 {strides = array<i32>} : memref<32x128xf32, #tpu.memory_space<vmem>>, vector<32x128xf32>,
    %c0_i32_8 = arith.constant 0 : i32
    %9 = arith.cmpi eq, %arg2, %c0_i32_8 : i32
    %10 = arith.extui %9 : i1 to i32
    %c0_i32_9 = arith.constant 0 : i32
    %11 = arith.cmpi ne, %10, %c0_i32_9 : i32
    scf.if %11 {
      %c0_10 = arith.constant 0 : index
      %c0_11 = arith.constant 0 : index
      %12 = vector.load %arg7[%c0_10, %c0_11] : memref<32x128xf32, #tpu.memory_space<vmem>>, vector<32x128xf32>
      %13 = arith.truncf %12 : vector<32x128xf32> to vector<32x128xbf16>
      %c0_12 = arith.constant 0 : index
      %c0_13 = arith.constant 0 : index
      %14 = vector.load %arg5[%c0_12, %c0_13] : memref<32x128xbf16, #tpu.memory_space<vmem>>, vector<32x128xbf16>
      tpu.vector_store %arg5[%c0_12, %c0_13], %13 {strides = array<i32>} : memref<32x128xbf16, #tpu.memory_space<vmem>>, vector<32x128xbf16>,
      %cst_14 = arith.constant dense<0.000000e+00> : vector<128xf32>
      %15 = vector.multi_reduction <add>, %12, %cst_14 [0] : vector<32x128xf32> to vector<128xf32>
      %16 = vector.shape_cast %15 : vector<128xf32> to vector<1x128xf32>
      %17 = arith.mulf %12, %12 : vector<32x128xf32>
      %cst_15 = arith.constant dense<0.000000e+00> : vector<128xf32>
      %18 = vector.multi_reduction <add>, %17, %cst_15 [0] : vector<32x128xf32> to vector<128xf32>
      %19 = vector.shape_cast %18 : vector<128xf32> to vector<1x128xf32>
      %cst_16 = arith.constant 0.000000e+00 : f32
      %20 = vector.broadcast %cst_16 : f32 to vector<6x128xf32>
      %21 = tpu.concatenate %16, %19, %20 in 0 : vector<1x128xf32>, vector<1x128xf32>, vector<6x128xf32> -> vector<8x128xf32>
      %c0_17 = arith.constant 0 : index
      %c0_18 = arith.constant 0 : index
      %22 = vector.load %arg6[%c0_17, %c0_18] : memref<8x128xf32, #tpu.memory_space<vmem>>, vector<8x128xf32>
      tpu.vector_store %arg6[%c0_17, %c0_18], %21 {strides = array<i32>} : memref<8x128xf32, #tpu.memory_space<vmem>>, vector<8x128xf32>,
    } else {
    }
    return
  }
  func.func @transform_0(%arg0: i32, %arg1: i32, %arg2: i32) -> (i32, i32) {
    %c0_i32 = arith.constant 0 : i32
    return %arg0, %arg2 : i32, i32
  }
  func.func @transform_1(%arg0: i32, %arg1: i32, %arg2: i32) -> (i32, i32) {
    %c0_i32 = arith.constant 0 : i32
    return %arg2, %arg1 : i32, i32
  }
  func.func @transform_2(%arg0: i32, %arg1: i32, %arg2: i32) -> (i32, i32) {
    %c0_i32 = arith.constant 0 : i32
    return %arg0, %arg1 : i32, i32
  }
  func.func @transform_3(%arg0: i32, %arg1: i32, %arg2: i32) -> (i32, i32) {
    %c0_i32 = arith.constant 0 : i32
    return %arg0, %arg1 : i32, i32
  }
}

module attributes {stable_mosaic.version = 11 : i64} {
  func.func @_bn_act_kernel(%arg0: i32, %arg1: i32, %arg2: memref<32x128xbf16, #tpu.memory_space<vmem>>, %arg3: memref<1x128xf32, #tpu.memory_space<vmem>>, %arg4: memref<1x128xf32, #tpu.memory_space<vmem>>, %arg5: memref<32x128xbf16, #tpu.memory_space<vmem>>) attributes {dimension_semantics = [#tpu.dimension_semantics<parallel>, #tpu.dimension_semantics<parallel>], iteration_bounds = array<i64: 1, 1>, scalar_prefetch = 0 : i64, scratch_operands = 0 : i64, tpu.core_type = #tpu.core_type<tc>, window_params = [{transform_indices = @transform_0, window_bounds = array<i64: 32, 128>}, {transform_indices = @transform_1, window_bounds = array<i64: 1, 128>}, {transform_indices = @transform_2, window_bounds = array<i64: 1, 128>}, {transform_indices = @transform_3, window_bounds = array<i64: 32, 128>}]} {
    %c0 = arith.constant 0 : index
    %c0_0 = arith.constant 0 : index
    %0 = vector.load %arg2[%c0, %c0_0] : memref<32x128xbf16, #tpu.memory_space<vmem>>, vector<32x128xbf16>
    %1 = arith.extf %0 : vector<32x128xbf16> to vector<32x128xf32>
    %c0_1 = arith.constant 0 : index
    %c0_2 = arith.constant 0 : index
    %2 = vector.load %arg3[%c0_1, %c0_2] : memref<1x128xf32, #tpu.memory_space<vmem>>, vector<1x128xf32>
    %3 = vector.broadcast %2 : vector<1x128xf32> to vector<32x128xf32>
    %4 = arith.mulf %1, %3 : vector<32x128xf32>
    %c0_3 = arith.constant 0 : index
    %c0_4 = arith.constant 0 : index
    %5 = vector.load %arg4[%c0_3, %c0_4] : memref<1x128xf32, #tpu.memory_space<vmem>>, vector<1x128xf32>
    %6 = vector.broadcast %5 : vector<1x128xf32> to vector<32x128xf32>
    %7 = arith.addf %4, %6 : vector<32x128xf32>
    %cst = arith.constant 0.000000e+00 : f32
    %8 = vector.broadcast %cst : f32 to vector<32x128xf32>
    %9 = arith.cmpf ogt, %7, %8 : vector<32x128xf32>
    %cst_5 = arith.constant 1.000000e-01 : f32
    %10 = vector.broadcast %cst_5 : f32 to vector<32x128xf32>
    %11 = arith.mulf %10, %7 : vector<32x128xf32>
    %12 = arith.select %9, %7, %11 : vector<32x128xi1>, vector<32x128xf32>
    %13 = arith.truncf %12 : vector<32x128xf32> to vector<32x128xbf16>
    %c0_6 = arith.constant 0 : index
    %c0_7 = arith.constant 0 : index
    %14 = vector.load %arg5[%c0_6, %c0_7] : memref<32x128xbf16, #tpu.memory_space<vmem>>, vector<32x128xbf16>
    tpu.vector_store %arg5[%c0_6, %c0_7], %13 {strides = array<i32>} : memref<32x128xbf16, #tpu.memory_space<vmem>>, vector<32x128xbf16>,
    return
  }
  func.func @transform_0(%arg0: i32, %arg1: i32) -> (i32, i32) {
    %c0_i32 = arith.constant 0 : i32
    return %arg0, %arg1 : i32, i32
  }
  func.func @transform_1(%arg0: i32, %arg1: i32) -> (i32, i32) {
    %c0_i32 = arith.constant 0 : i32
    %c0_i32_0 = arith.constant 0 : i32
    return %c0_i32, %arg1 : i32, i32
  }
  func.func @transform_2(%arg0: i32, %arg1: i32) -> (i32, i32) {
    %c0_i32 = arith.constant 0 : i32
    %c0_i32_0 = arith.constant 0 : i32
    return %c0_i32, %arg1 : i32, i32
  }
  func.func @transform_3(%arg0: i32, %arg1: i32) -> (i32, i32) {
    %c0_i32 = arith.constant 0 : i32
    return %arg0, %arg1 : i32, i32
  }
}

module attributes {stable_mosaic.version = 11 : i64} {
  func.func @_conv_bias_act_kernel(%arg0: i32, %arg1: i32, %arg2: i32, %arg3: memref<32x32xbf16, #tpu.memory_space<vmem>>, %arg4: memref<32x128xbf16, #tpu.memory_space<vmem>>, %arg5: memref<1x128xf32, #tpu.memory_space<vmem>>, %arg6: memref<32x128xf32, #tpu.memory_space<vmem>>, %arg7: memref<32x128xf32, #tpu.memory_space<vmem>>) attributes {dimension_semantics = [#tpu.dimension_semantics<parallel>, #tpu.dimension_semantics<parallel>, #tpu.dimension_semantics<arbitrary>], iteration_bounds = array<i64: 1, 1, 1>, scalar_prefetch = 0 : i64, scratch_operands = 1 : i64, tpu.core_type = #tpu.core_type<tc>, window_params = [{transform_indices = @transform_0, window_bounds = array<i64: 32, 32>}, {transform_indices = @transform_1, window_bounds = array<i64: 32, 128>}, {transform_indices = @transform_2, window_bounds = array<i64: 1, 128>}, {transform_indices = @transform_3, window_bounds = array<i64: 32, 128>}]} {
    %c0_i32 = arith.constant 0 : i32
    %0 = arith.cmpi eq, %arg2, %c0_i32 : i32
    %1 = arith.extui %0 : i1 to i32
    %c0_i32_0 = arith.constant 0 : i32
    %2 = arith.cmpi ne, %1, %c0_i32_0 : i32
    scf.if %2 {
      %cst_10 = arith.constant 0.000000e+00 : f32
      %12 = vector.broadcast %cst_10 : f32 to vector<32x128xf32>
      %c0_11 = arith.constant 0 : index
      %c0_12 = arith.constant 0 : index
      %13 = vector.load %arg7[%c0_11, %c0_12] : memref<32x128xf32, #tpu.memory_space<vmem>>, vector<32x128xf32>
      tpu.vector_store %arg7[%c0_11, %c0_12], %12 {strides = array<i32>} : memref<32x128xf32, #tpu.memory_space<vmem>>, vector<32x128xf32>,
    } else {
    }
    %c0 = arith.constant 0 : index
    %c0_1 = arith.constant 0 : index
    %3 = vector.load %arg7[%c0, %c0_1] : memref<32x128xf32, #tpu.memory_space<vmem>>, vector<32x128xf32>
    %c0_2 = arith.constant 0 : index
    %c0_3 = arith.constant 0 : index
    %4 = vector.load %arg3[%c0_2, %c0_3] : memref<32x32xbf16, #tpu.memory_space<vmem>>, vector<32x32xbf16>
    %c0_4 = arith.constant 0 : index
    %c0_5 = arith.constant 0 : index
    %5 = vector.load %arg4[%c0_4, %c0_5] : memref<32x128xbf16, #tpu.memory_space<vmem>>, vector<32x128xbf16>
    %cst = arith.constant dense<0.000000e+00> : vector<32x128xf32>
    %6 = tpu.matmul %4, %5, %cst {dimension_numbers = #tpu.dot_dimension_numbers<[1], [0], [0], [1], [0, 0, 1, 1], [], []>} : vector<32x32xbf16>, vector<32x128xbf16>, vector<32x128xf32> -> vector<32x128xf32>
    %7 = arith.addf %3, %6 : vector<32x128xf32>
    %c0_6 = arith.constant 0 : index
    %c0_7 = arith.constant 0 : index
    %8 = vector.load %arg7[%c0_6, %c0_7] : memref<32x128xf32, #tpu.memory_space<vmem>>, vector<32x128xf32>
    tpu.vector_store %arg7[%c0_6, %c0_7], %7 {strides = array<i32>} : memref<32x128xf32, #tpu.memory_space<vmem>>, vector<32x128xf32>,
    %c0_i32_8 = arith.constant 0 : i32
    %9 = arith.cmpi eq, %arg2, %c0_i32_8 : i32
    %10 = arith.extui %9 : i1 to i32
    %c0_i32_9 = arith.constant 0 : i32
    %11 = arith.cmpi ne, %10, %c0_i32_9 : i32
    scf.if %11 {
      %c0_10 = arith.constant 0 : index
      %c0_11 = arith.constant 0 : index
      %12 = vector.load %arg7[%c0_10, %c0_11] : memref<32x128xf32, #tpu.memory_space<vmem>>, vector<32x128xf32>
      %c0_12 = arith.constant 0 : index
      %c0_13 = arith.constant 0 : index
      %13 = vector.load %arg5[%c0_12, %c0_13] : memref<1x128xf32, #tpu.memory_space<vmem>>, vector<1x128xf32>
      %14 = vector.broadcast %13 : vector<1x128xf32> to vector<32x128xf32>
      %15 = arith.addf %12, %14 : vector<32x128xf32>
      %c0_14 = arith.constant 0 : index
      %c0_15 = arith.constant 0 : index
      %16 = vector.load %arg6[%c0_14, %c0_15] : memref<32x128xf32, #tpu.memory_space<vmem>>, vector<32x128xf32>
      tpu.vector_store %arg6[%c0_14, %c0_15], %15 {strides = array<i32>} : memref<32x128xf32, #tpu.memory_space<vmem>>, vector<32x128xf32>,
    } else {
    }
    return
  }
  func.func @transform_0(%arg0: i32, %arg1: i32, %arg2: i32) -> (i32, i32) {
    %c0_i32 = arith.constant 0 : i32
    return %arg0, %arg2 : i32, i32
  }
  func.func @transform_1(%arg0: i32, %arg1: i32, %arg2: i32) -> (i32, i32) {
    %c0_i32 = arith.constant 0 : i32
    return %arg2, %arg1 : i32, i32
  }
  func.func @transform_2(%arg0: i32, %arg1: i32, %arg2: i32) -> (i32, i32) {
    %c0_i32 = arith.constant 0 : i32
    %c0_i32_0 = arith.constant 0 : i32
    return %c0_i32, %arg1 : i32, i32
  }
  func.func @transform_3(%arg0: i32, %arg1: i32, %arg2: i32) -> (i32, i32) {
    %c0_i32 = arith.constant 0 : i32
    return %arg0, %arg1 : i32, i32
  }
}

</mosaic_0001>

<bundles_post_ra>
// kernel: _lambda_.15
= control target key start
LH: loop header
LB: loop body
LE: loop exit
PB: predicated region body
PF: predicated region fallthrough
CT: control target
= control target key end

     0   :  { %s1631_s0 = inlined_call_operand.vmem [shape: bf16[512,128], index: 0, kind: input, shape index: {}]   ;;  %s1632_s1 = inlined_call_operand.vmem [shape: f32[1,128], index: 1, kind: input, shape index: {}]   ;;  %s1633_s2 = inlined_call_operand.vmem [shape: f32[1,128], index: 2, kind: input, shape index: {}]   ;;  %s1634_s3 = inlined_call_operand.vmem [shape: bf16[512,128], index: 3, kind: output, shape index: {}]  }
   0x1   :  { %v931_v0 = vld [vmem:[%s1631_s0] sm:$0xff]   ;;  %v1218_v4 = vld [vmem:[%s1631_s0 + $0x8] sm:$0xff]   ;;  %v1219_v5 = vld [vmem:[%s1631_s0 + $0x10] sm:$0xff]  }
   0x2   :  { %v1306_v1 = vld [vmem:[%s1632_s1] ss:$0 sm:$0xff]  ;;  %v932_v2 = vunpack.c.l.bf16 %v931_v0  ;;  %v933_v3 = vunpack.c.h.bf16 %v931_v0  ;;  %v1220_v6 = vld [vmem:[%s1631_s0 + $0x18] sm:$0xff]   ;;  %v936_v8 = vunpack.c.l.bf16 %v1218_v4  ;;  %v937_v9 = vunpack.c.h.bf16 %v1218_v4  ;;  %v1222_v35 = vld [vmem:[%s1631_s0 + $0x28] sm:$0xff]  }
   0x3   :  { %v1320_v7 = vld [vmem:[%s1633_s2] ss:$0 sm:$0xff]  ;;  %v940_v10 = vunpack.c.l.bf16 %v1219_v5  ;;  %v941_v11 = vunpack.c.h.bf16 %v1219_v5  ;;  %v944_v14 = vunpack.c.l.bf16 %v1220_v6  ;;  %v945_v15 = vunpack.c.h.bf16 %v1220_v6  ;;  %v1223_v48 = vld [vmem:[%s1631_s0 + $0x30] sm:$0xff]   ;;  %v1224_v4 = vld [vmem:[%s1631_s0 + $0x38] sm:$0xff]  }
   0x4   :  { %v149_v12 = vmul.f32 %v932_v2, %v1306_v1  ;;  %v150_v13 = vmul.f32 %v933_v3, %v1306_v1  ;;  %v151_v16 = vmul.f32 %v936_v8, %v1306_v1  ;;  %v152_v17 = vmul.f32 %v937_v9, %v1306_v1  ;;  %v1221_v34 = vld [vmem:[%s1631_s0 + $0x20] sm:$0xff]  }
   0x5   :  { %v153_v18 = vmul.f32 %v940_v10, %v1306_v1  ;;  %v154_v19 = vmul.f32 %v941_v11, %v1306_v1  ;;  %v155_v22 = vmul.f32 %v944_v14, %v1306_v1  ;;  %v156_v23 = vmul.f32 %v945_v15, %v1306_v1  ;;  %v1225_v15 = vld [vmem:[%s1631_s0 + $0x40] sm:$0xff]  }
   0x6   :  { %v220_v20 = vadd.f32 %v1320_v7, %v149_v12  ;;  %v221_v21 = vadd.f32 %v1320_v7, %v150_v13  ;;  %v222_v24 = vadd.f32 %v1320_v7, %v151_v16  ;;  %v223_v25 = vadd.f32 %v1320_v7, %v152_v17 }
   0x7   :  { %v224_v26 = vadd.f32 %v1320_v7, %v153_v18  ;;  %v225_v27 = vadd.f32 %v1320_v7, %v154_v19  ;;  %v226_v42 = vadd.f32 %v1320_v7, %v155_v22  ;;  %v227_v43 = vadd.f32 %v1320_v7, %v156_v23 }
   0x8   :  { %vm284_vm0 = vcmp.gt.f32.partialorder %v220_v20, 0.0  ;;  %vm285_vm1 = vcmp.gt.f32.partialorder %v221_v21, 0.0  ;;  %v348_v28 = vmul.f32 0.1, %v220_v20  ;;  %v349_v29 = vmul.f32 0.1, %v221_v21 }
   0x9   :  { %vm286_vm2 = vcmp.gt.f32.partialorder %v222_v24, 0.0  ;;  %vm287_vm3 = vcmp.gt.f32.partialorder %v223_v25, 0.0  ;;  %v350_v30 = vmul.f32 0.1, %v222_v24  ;;  %v351_v31 = vmul.f32 0.1, %v223_v25 }
   0xa   :  { %v412_v32 = vsel %vm284_vm0, %v220_v20, %v348_v28  ;;  %v413_v33 = vsel %vm285_vm1, %v221_v21, %v349_v29  ;;  %vm288_vm4 = vcmp.gt.f32.partialorder %v224_v26, 0.0  ;;  %vm289_vm5 = vcmp.gt.f32.partialorder %v225_v27, 0.0 }
   0xb   :  { %v1061_v36 = vpack.c.bf16 %v413_v33, %v412_v32  ;;  %v414_v37 = vsel %vm286_vm2, %v222_v24, %v350_v30  ;;  %v415_v38 = vsel %vm287_vm3, %v223_v25, %v351_v31  ;;  %v352_v39 = vmul.f32 0.1, %v224_v26 }
   0xc   :  { %v1066_v40 = vpack.c.bf16 %v415_v38, %v414_v37  ;;  %v353_v41 = vmul.f32 0.1, %v225_v27  ;;  %v948_v45 = vunpack.c.l.bf16 %v1221_v34  ;;  %v949_v46 = vunpack.c.h.bf16 %v1221_v34 }
   0xd   :  { %1062 = vst [vmem:[%s1634_s3] sm:$0xff] %v1061_v36   ;;  %v416_v44 = vsel %vm288_vm4, %v224_v26, %v352_v39  ;;  %v952_v47 = vunpack.c.l.bf16 %v1222_v35  ;;  %vm290_vm6 = vcmp.gt.f32.partialorder %v226_v42, 0.0  ;;  %vm291_vm7 = vcmp.gt.f32.partialorder %v227_v43, 0.0  ;;  %v1226_v26 = vld [vmem:[%s1631_s0 + $0x48] sm:$0xff]  }
   0xe   :  { %1249 = vst [vmem:[%s1634_s3 + $0x8] sm:$0xff] %v1066_v40   ;;  %v417_v49 = vsel %vm289_vm5, %v225_v27, %v353_v41  ;;  %v354_v50 = vmul.f32 0.1, %v226_v42  ;;  %v355_v52 = vmul.f32 0.1, %v227_v43  ;;  %v157_v53 = vmul.f32 %v948_v45, %v1306_v1  ;;  %v1227_v27 = vld [vmem:[%s1631_s0 + $0x50] sm:$0xff]  }
   0xf   :  { %v1071_v51 = vpack.c.bf16 %v417_v49, %v416_v44  ;;  %v158_v54 = vmul.f32 %v949_v46, %v1306_v1  ;;  %v953_v56 = vunpack.c.h.bf16 %v1222_v35  ;;  %v159_v57 = vmul.f32 %v952_v47, %v1306_v1 }
  0x10   :  { %v418_v55 = vsel %vm290_vm6, %v226_v42, %v354_v50  ;;  %v956_v58 = vunpack.c.l.bf16 %v1223_v48  ;;  %v419_v59 = vsel %vm291_vm7, %v227_v43, %v355_v52  ;;  %v228_v60 = vadd.f32 %v1320_v7, %v157_v53 }
  0x11   :  { %1250 = vst [vmem:[%s1634_s3 + $0x10] sm:$0xff] %v1071_v51   ;;  %v229_v61 = vadd.f32 %v1320_v7, %v158_v54  ;;  %v957_v62 = vunpack.c.h.bf16 %v1223_v48  ;;  %v1076_v63 = vpack.c.bf16 %v419_v59, %v418_v55  ;;  %v160_v0 = vmul.f32 %v953_v56, %v1306_v1  ;;  %v1228_v55 = vld [vmem:[%s1631_s0 + $0x58] sm:$0xff]  }
  0x12   :  { %v230_v2 = vadd.f32 %v1320_v7, %v159_v57  ;;  %v161_v3 = vmul.f32 %v956_v58, %v1306_v1  ;;  %vm292_vm8 = vcmp.gt.f32.partialorder %v228_v60, 0.0  ;;  %v356_v5 = vmul.f32 0.1, %v228_v60 }
  0x13   :  { %vm293_vm9 = vcmp.gt.f32.partialorder %v229_v61, 0.0  ;;  %v357_v6 = vmul.f32 0.1, %v229_v61  ;;  %1251 = vst [vmem:[%s1634_s3 + $0x18] sm:$0xff] %v1076_v63   ;;  %v231_v8 = vadd.f32 %v1320_v7, %v160_v0  ;;  %v162_v10 = vmul.f32 %v957_v62, %v1306_v1 }
  0x14   :  { %vm294_vm10 = vcmp.gt.f32.partialorder %v230_v2, 0.0  ;;  %v358_v9 = vmul.f32 0.1, %v230_v2  ;;  %v420_v11 = vsel %vm292_vm8, %v228_v60, %v356_v5  ;;  %v232_v13 = vadd.f32 %v1320_v7, %v161_v3  ;;  %v1229_v60 = vld [vmem:[%s1631_s0 + $0x60] sm:$0xff]  }
  0x15   :  { %v421_v12 = vsel %vm293_vm9, %v229_v61, %v357_v6  ;;  %v960_v14 = vunpack.c.l.bf16 %v1224_v4  ;;  %vm295_vm11 = vcmp.gt.f32.partialorder %v231_v8, 0.0  ;;  %v359_v17 = vmul.f32 0.1, %v231_v8 }
  0x16   :  { %v1081_v16 = vpack.c.bf16 %v421_v12, %v420_v11  ;;  %v422_v18 = vsel %vm294_vm10, %v230_v2, %v358_v9  ;;  %v233_v19 = vadd.f32 %v1320_v7, %v162_v10  ;;  %vm296_vm12 = vcmp.gt.f32.partialorder %v232_v13, 0.0  ;;  %v1230_v9 = vld [vmem:[%s1631_s0 + $0x68] sm:$0xff]  }
  0x17   :  { %v360_v20 = vmul.f32 0.1, %v232_v13  ;;  %v961_v21 = vunpack.c.h.bf16 %v1224_v4  ;;  %v423_v22 = vsel %vm295_vm11, %v231_v8, %v359_v17  ;;  %v163_v23 = vmul.f32 %v960_v14, %v1306_v1 }
  0x18   :  { %1252 = vst [vmem:[%s1634_s3 + $0x20] sm:$0xff] %v1081_v16   ;;  %v964_v24 = vunpack.c.l.bf16 %v1225_v15  ;;  %v965_v25 = vunpack.c.h.bf16 %v1225_v15  ;;  %v1086_v28 = vpack.c.bf16 %v423_v22, %v422_v18  ;;  %vm297_vm13 = vcmp.gt.f32.partialorder %v233_v19, 0.0 }
  0x19   :  { %v361_v29 = vmul.f32 0.1, %v233_v19  ;;  %v424_v30 = vsel %vm296_vm12, %v232_v13, %v360_v20  ;;  %v164_v31 = vmul.f32 %v961_v21, %v1306_v1  ;;  %v234_v32 = vadd.f32 %v1320_v7, %v163_v23 }
  0x1a   :  { %v165_v33 = vmul.f32 %v964_v24, %v1306_v1  ;;  %v166_v34 = vmul.f32 %v965_v25, %v1306_v1  ;;  %1253 = vst [vmem:[%s1634_s3 + $0x28] sm:$0xff] %v1086_v28   ;;  %v968_v36 = vunpack.c.l.bf16 %v1226_v26  ;;  %v969_v37 = vunpack.c.h.bf16 %v1226_v26  ;;  %v1231_v28 = vld [vmem:[%s1631_s0 + $0x70] sm:$0xff]  }
  0x1b   :  { %v425_v35 = vsel %vm297_vm13, %v233_v19, %v361_v29  ;;  %v972_v38 = vunpack.c.l.bf16 %v1227_v27  ;;  %v235_v40 = vadd.f32 %v1320_v7, %v164_v31  ;;  %vm298_vm14 = vcmp.gt.f32.partialorder %v234_v32, 0.0 }
  0x1c   :  { %v1091_v39 = vpack.c.bf16 %v425_v35, %v424_v30  ;;  %v362_v41 = vmul.f32 0.1, %v234_v32  ;;  %v236_v42 = vadd.f32 %v1320_v7, %v165_v33  ;;  %v237_v43 = vadd.f32 %v1320_v7, %v166_v34 }
  0x1d   :  { %v167_v44 = vmul.f32 %v968_v36, %v1306_v1  ;;  %v168_v45 = vmul.f32 %v969_v37, %v1306_v1  ;;  %vm299_vm15 = vcmp.gt.f32.partialorder %v235_v40, 0.0  ;;  %v363_v46 = vmul.f32 0.1, %v235_v40  ;;  %v1232_v37 = vld [vmem:[%s1631_s0 + $0x78] sm:$0xff]  }
  0x1e   :  { %1254 = vst [vmem:[%s1634_s3 + $0x30] sm:$0xff] %v1091_v39   ;;  %v426_v47 = vsel %vm298_vm14, %v234_v32, %v362_v41  ;;  %v973_v48 = vunpack.c.h.bf16 %v1227_v27  ;;  %vm300_vm0 = vcmp.gt.f32.partialorder %v236_v42, 0.0  ;;  %vm301_vm1 = vcmp.gt.f32.partialorder %v237_v43, 0.0 }
  0x1f   :  { %v364_v49 = vmul.f32 0.1, %v236_v42  ;;  %v365_v50 = vmul.f32 0.1, %v237_v43  ;;  %v427_v51 = vsel %vm299_vm15, %v235_v40, %v363_v46  ;;  %v238_v52 = vadd.f32 %v1320_v7, %v167_v44 }
  0x20   :  { %v239_v53 = vadd.f32 %v1320_v7, %v168_v45  ;;  %v169_v54 = vmul.f32 %v972_v38, %v1306_v1  ;;  %v1096_v56 = vpack.c.bf16 %v427_v51, %v426_v47  ;;  %v170_v59 = vmul.f32 %v973_v48, %v1306_v1 }
  0x21   :  { %v428_v57 = vsel %vm300_vm0, %v236_v42, %v364_v49  ;;  %v429_v58 = vsel %vm301_vm1, %v237_v43, %v365_v50  ;;  %vm302_vm2 = vcmp.gt.f32.partialorder %v238_v52, 0.0  ;;  %v366_v62 = vmul.f32 0.1, %v238_v52  ;;  %v1233_v42 = vld [vmem:[%s1631_s0 + $0x80] sm:$0xff]   ;;  %v1234_v50 = vld [vmem:[%s1631_s0 + $0x88] sm:$0xff]  }
  0x22   :  { %v1101_v61 = vpack.c.bf16 %v429_v58, %v428_v57  ;;  %vm303_vm3 = vcmp.gt.f32.partialorder %v239_v53, 0.0  ;;  %1255 = vst [vmem:[%s1634_s3 + $0x38] sm:$0xff] %v1096_v56   ;;  %v367_v63 = vmul.f32 0.1, %v239_v53  ;;  %v240_v0 = vadd.f32 %v1320_v7, %v169_v54 }
  0x23   :  { %v241_v2 = vadd.f32 %v1320_v7, %v170_v59  ;;  %v976_v3 = vunpack.c.l.bf16 %v1228_v55  ;;  %v430_v4 = vsel %vm302_vm2, %v238_v52, %v366_v62  ;;  %v977_v5 = vunpack.c.h.bf16 %v1228_v55 }
  0x24   :  { %1256 = vst [vmem:[%s1634_s3 + $0x40] sm:$0xff] %v1101_v61   ;;  %v980_v6 = vunpack.c.l.bf16 %v1229_v60  ;;  %v981_v8 = vunpack.c.h.bf16 %v1229_v60  ;;  %v431_v10 = vsel %vm303_vm3, %v239_v53, %v367_v63  ;;  %vm304_vm4 = vcmp.gt.f32.partialorder %v240_v0, 0.0 }
  0x25   :  { %vm305_vm5 = vcmp.gt.f32.partialorder %v241_v2, 0.0  ;;  %v368_v11 = vmul.f32 0.1, %v240_v0  ;;  %v1106_v12 = vpack.c.bf16 %v431_v10, %v430_v4  ;;  %v369_v13 = vmul.f32 0.1, %v241_v2 }
  0x26   :  { %v171_v14 = vmul.f32 %v976_v3, %v1306_v1  ;;  %v172_v15 = vmul.f32 %v977_v5, %v1306_v1  ;;  %v173_v17 = vmul.f32 %v980_v6, %v1306_v1  ;;  %v174_v18 = vmul.f32 %v981_v8, %v1306_v1 }
  0x27   :  { %v432_v16 = vsel %vm304_vm4, %v240_v0, %v368_v11  ;;  %v984_v19 = vunpack.c.l.bf16 %v1230_v9  ;;  %1257 = vst [vmem:[%s1634_s3 + $0x48] sm:$0xff] %v1106_v12   ;;  %v433_v20 = vsel %vm305_vm5, %v241_v2, %v369_v13  ;;  %v985_v23 = vunpack.c.h.bf16 %v1230_v9 }
  0x28   :  { %v242_v21 = vadd.f32 %v1320_v7, %v171_v14  ;;  %v243_v22 = vadd.f32 %v1320_v7, %v172_v15  ;;  %v1111_v24 = vpack.c.bf16 %v433_v20, %v432_v16  ;;  %v244_v25 = vadd.f32 %v1320_v7, %v173_v17  ;;  %v1235_v15 = vld [vmem:[%s1631_s0 + $0x90] sm:$0xff]   ;;  %v1236_v20 = vld [vmem:[%s1631_s0 + $0x98] sm:$0xff]  }
  0x29   :  { %v245_v26 = vadd.f32 %v1320_v7, %v174_v18  ;;  %v175_v27 = vmul.f32 %v984_v19, %v1306_v1  ;;  %v176_v35 = vmul.f32 %v985_v23, %v1306_v1  ;;  %v988_v41 = vunpack.c.l.bf16 %v1231_v28 }
  0x2a   :  { %vm306_vm6 = vcmp.gt.f32.partialorder %v242_v21, 0.0  ;;  %vm307_vm7 = vcmp.gt.f32.partialorder %v243_v22, 0.0  ;;  %v370_v29 = vmul.f32 0.1, %v242_v21  ;;  %v371_v30 = vmul.f32 0.1, %v243_v22 }
  0x2b   :  { %1258 = vst [vmem:[%s1634_s3 + $0x50] sm:$0xff] %v1111_v24   ;;  %vm308_vm8 = vcmp.gt.f32.partialorder %v244_v25, 0.0  ;;  %vm309_vm9 = vcmp.gt.f32.partialorder %v245_v26, 0.0  ;;  %v372_v31 = vmul.f32 0.1, %v244_v25  ;;  %v246_v36 = vadd.f32 %v1320_v7, %v175_v27 }
  0x2c   :  { %v373_v32 = vmul.f32 0.1, %v245_v26  ;;  %v434_v33 = vsel %vm306_vm6, %v242_v21, %v370_v29  ;;  %v435_v34 = vsel %vm307_vm7, %v243_v22, %v371_v30  ;;  %v247_v44 = vadd.f32 %v1320_v7, %v176_v35  ;;  %v1237_v21 = vld [vmem:[%s1631_s0 + $0xa0] sm:$0xff]  }
  0x2d   :  { %v1116_v38 = vpack.c.bf16 %v435_v34, %v434_v33  ;;  %v436_v39 = vsel %vm308_vm8, %v244_v25, %v372_v31  ;;  %vm310_vm10 = vcmp.gt.f32.partialorder %v246_v36, 0.0  ;;  %v374_v45 = vmul.f32 0.1, %v246_v36 }
  0x2e   :  { %v437_v40 = vsel %vm309_vm9, %v245_v26, %v373_v32  ;;  %v989_v46 = vunpack.c.h.bf16 %v1231_v28  ;;  %v177_v47 = vmul.f32 %v988_v41, %v1306_v1  ;;  %v992_v48 = vunpack.c.l.bf16 %v1232_v37 }
  0x2f   :  { %v1121_v43 = vpack.c.bf16 %v437_v40, %v436_v39  ;;  %1259 = vst [vmem:[%s1634_s3 + $0x58] sm:$0xff] %v1116_v38   ;;  %v993_v49 = vunpack.c.h.bf16 %v1232_v37  ;;  %vm311_vm11 = vcmp.gt.f32.partialorder %v247_v44, 0.0  ;;  %v375_v51 = vmul.f32 0.1, %v247_v44  ;;  %v1238_v40 = vld [vmem:[%s1631_s0 + $0xa8] sm:$0xff]  }
  0x30   :  { %v438_v52 = vsel %vm310_vm10, %v246_v36, %v374_v45  ;;  %v996_v53 = vunpack.c.l.bf16 %v1233_v42  ;;  %v178_v54 = vmul.f32 %v989_v46, %v1306_v1  ;;  %v248_v55 = vadd.f32 %v1320_v7, %v177_v47 }
  0x31   :  { %1260 = vst [vmem:[%s1634_s3 + $0x60] sm:$0xff] %v1121_v43   ;;  %v179_v56 = vmul.f32 %v992_v48, %v1306_v1  ;;  %v180_v57 = vmul.f32 %v993_v49, %v1306_v1  ;;  %v439_v58 = vsel %vm311_vm11, %v247_v44, %v375_v51  ;;  %v997_v59 = vunpack.c.h.bf16 %v1233_v42 }
  0x32   :  { %v181_v60 = vmul.f32 %v996_v53, %v1306_v1  ;;  %v1000_v61 = vunpack.c.l.bf16 %v1234_v50  ;;  %v1126_v62 = vpack.c.bf16 %v439_v58, %v438_v52  ;;  %v249_v63 = vadd.f32 %v1320_v7, %v178_v54 }
  0x33   :  { %vm312_vm12 = vcmp.gt.f32.partialorder %v248_v55, 0.0  ;;  %v376_v0 = vmul.f32 0.1, %v248_v55  ;;  %v250_v2 = vadd.f32 %v1320_v7, %v179_v56  ;;  %v251_v3 = vadd.f32 %v1320_v7, %v180_v57 }
  0x34   :  { %v182_v4 = vmul.f32 %v997_v59, %v1306_v1  ;;  %v252_v5 = vadd.f32 %v1320_v7, %v181_v60  ;;  %1261 = vst [vmem:[%s1634_s3 + $0x68] sm:$0xff] %v1126_v62   ;;  %vm313_vm13 = vcmp.gt.f32.partialorder %v249_v63, 0.0  ;;  %v377_v6 = vmul.f32 0.1, %v249_v63 }
  0x35   :  { %v440_v8 = vsel %vm312_vm12, %v248_v55, %v376_v0  ;;  %v1001_v9 = vunpack.c.h.bf16 %v1234_v50  ;;  %vm314_vm14 = vcmp.gt.f32.partialorder %v250_v2, 0.0  ;;  %vm315_vm15 = vcmp.gt.f32.partialorder %v251_v3, 0.0  ;;  %v1239_v0 = vld [vmem:[%s1631_s0 + $0xb0] sm:$0xff]  }
  0x36   :  { %v378_v10 = vmul.f32 0.1, %v250_v2  ;;  %v379_v11 = vmul.f32 0.1, %v251_v3  ;;  %v441_v12 = vsel %vm313_vm13, %v249_v63, %v377_v6  ;;  %v253_v13 = vadd.f32 %v1320_v7, %v182_v4 }
  0x37   :  { %vm316_vm0 = vcmp.gt.f32.partialorder %v252_v5, 0.0  ;;  %v380_v14 = vmul.f32 0.1, %v252_v5  ;;  %v1131_v16 = vpack.c.bf16 %v441_v12, %v440_v8  ;;  %v183_v19 = vmul.f32 %v1000_v61, %v1306_v1 }
  0x38   :  { %v442_v17 = vsel %vm314_vm14, %v250_v2, %v378_v10  ;;  %v443_v18 = vsel %vm315_vm15, %v251_v3, %v379_v11  ;;  %vm317_vm1 = vcmp.gt.f32.partialorder %v253_v13, 0.0  ;;  %v381_v23 = vmul.f32 0.1, %v253_v13  ;;  %v1240_v2 = vld [vmem:[%s1631_s0 + $0xb8] sm:$0xff]  }
  0x39   :  { %v1136_v22 = vpack.c.bf16 %v443_v18, %v442_v17  ;;  %v444_v24 = vsel %vm316_vm0, %v252_v5, %v380_v14  ;;  %1262 = vst [vmem:[%s1634_s3 + $0x70] sm:$0xff] %v1131_v16   ;;  %v184_v25 = vmul.f32 %v1001_v9, %v1306_v1  ;;  %v254_v26 = vadd.f32 %v1320_v7, %v183_v19  ;;  %v1241_v18 = vld [vmem:[%s1631_s0 + $0xc0] sm:$0xff]  }
  0x3a   :  { %v1004_v27 = vunpack.c.l.bf16 %v1235_v15  ;;  %v1005_v28 = vunpack.c.h.bf16 %v1235_v15  ;;  %v445_v29 = vsel %vm317_vm1, %v253_v13, %v381_v23  ;;  %v1008_v30 = vunpack.c.l.bf16 %v1236_v20 }
  0x3b   :  { %1263 = vst [vmem:[%s1634_s3 + $0x78] sm:$0xff] %v1136_v22   ;;  %v1009_v31 = vunpack.c.h.bf16 %v1236_v20  ;;  %v1012_v32 = vunpack.c.l.bf16 %v1237_v21  ;;  %v1141_v33 = vpack.c.bf16 %v445_v29, %v444_v24  ;;  %v255_v34 = vadd.f32 %v1320_v7, %v184_v25 }
  0x3c   :  { %vm318_vm2 = vcmp.gt.f32.partialorder %v254_v26, 0.0  ;;  %v382_v35 = vmul.f32 0.1, %v254_v26  ;;  %v185_v36 = vmul.f32 %v1004_v27, %v1306_v1  ;;  %v186_v37 = vmul.f32 %v1005_v28, %v1306_v1 }
  0x3d   :  { %v187_v38 = vmul.f32 %v1008_v30, %v1306_v1  ;;  %v188_v39 = vmul.f32 %v1009_v31, %v1306_v1  ;;  %1264 = vst [vmem:[%s1634_s3 + $0x80] sm:$0xff] %v1141_v33   ;;  %vm319_vm3 = vcmp.gt.f32.partialorder %v255_v34, 0.0  ;;  %v383_v41 = vmul.f32 0.1, %v255_v34 }
  0x3e   :  { %v446_v42 = vsel %vm318_vm2, %v254_v26, %v382_v35  ;;  %v1013_v43 = vunpack.c.h.bf16 %v1237_v21  ;;  %v256_v44 = vadd.f32 %v1320_v7, %v185_v36  ;;  %v257_v45 = vadd.f32 %v1320_v7, %v186_v37  ;;  %v1242_v36 = vld [vmem:[%s1631_s0 + $0xc8] sm:$0xff]  }
  0x3f   :  { %v258_v46 = vadd.f32 %v1320_v7, %v187_v38  ;;  %v259_v47 = vadd.f32 %v1320_v7, %v188_v39  ;;  %v447_v48 = vsel %vm319_vm3, %v255_v34, %v383_v41  ;;  %v189_v49 = vmul.f32 %v1012_v32, %v1306_v1 }
  0x40   :  { %v190_v50 = vmul.f32 %v1013_v43, %v1306_v1  ;;  %v1016_v51 = vunpack.c.l.bf16 %v1238_v40  ;;  %v1146_v52 = vpack.c.bf16 %v447_v48, %v446_v42  ;;  %vm320_vm4 = vcmp.gt.f32.partialorder %v256_v44, 0.0  ;;  %v1243_v42 = vld [vmem:[%s1631_s0 + $0xd0] sm:$0xff]  }
  0x41   :  { %vm321_vm5 = vcmp.gt.f32.partialorder %v257_v45, 0.0  ;;  %v384_v53 = vmul.f32 0.1, %v256_v44  ;;  %v385_v54 = vmul.f32 0.1, %v257_v45  ;;  %vm322_vm6 = vcmp.gt.f32.partialorder %v258_v46, 0.0 }
  0x42   :  { %vm323_vm7 = vcmp.gt.f32.partialorder %v259_v47, 0.0  ;;  %v386_v55 = vmul.f32 0.1, %v258_v46  ;;  %1265 = vst [vmem:[%s1634_s3 + $0x88] sm:$0xff] %v1146_v52   ;;  %v387_v57 = vmul.f32 0.1, %v259_v47  ;;  %v260_v58 = vadd.f32 %v1320_v7, %v189_v49 }
  0x43   :  { %v448_v56 = vsel %vm320_vm4, %v256_v44, %v384_v53  ;;  %v261_v59 = vadd.f32 %v1320_v7, %v190_v50  ;;  %v449_v60 = vsel %vm321_vm5, %v257_v45, %v385_v54  ;;  %v1017_v62 = vunpack.c.h.bf16 %v1238_v40 }
  0x44   :  { %v450_v61 = vsel %vm322_vm6, %v258_v46, %v386_v55  ;;  %v191_v63 = vmul.f32 %v1016_v51, %v1306_v1  ;;  %v1151_v3 = vpack.c.bf16 %v449_v60, %v448_v56  ;;  %v451_v4 = vsel %vm323_vm7, %v259_v47, %v387_v57  ;;  %v1244_v55 = vld [vmem:[%s1631_s0 + $0xd8] sm:$0xff]  }
  0x45   :  { %vm324_vm8 = vcmp.gt.f32.partialorder %v260_v58, 0.0  ;;  %vm325_vm9 = vcmp.gt.f32.partialorder %v261_v59, 0.0  ;;  %v1156_v5 = vpack.c.bf16 %v451_v4, %v450_v61  ;;  %v388_v6 = vmul.f32 0.1, %v260_v58 }
  0x46   :  { %v389_v8 = vmul.f32 0.1, %v261_v59  ;;  %v192_v9 = vmul.f32 %v1017_v62, %v1306_v1  ;;  %1266 = vst [vmem:[%s1634_s3 + $0x90] sm:$0xff] %v1151_v3   ;;  %v262_v10 = vadd.f32 %v1320_v7, %v191_v63  ;;  %v1020_v11 = vunpack.c.l.bf16 %v1239_v0 }
  0x47   :  { %v1021_v12 = vunpack.c.h.bf16 %v1239_v0  ;;  %v1024_v13 = vunpack.c.l.bf16 %v1240_v2  ;;  %1267 = vst [vmem:[%s1634_s3 + $0x98] sm:$0xff] %v1156_v5   ;;  %v452_v14 = vsel %vm324_vm8, %v260_v58, %v388_v6  ;;  %v1025_v17 = vunpack.c.h.bf16 %v1240_v2 }
  0x48   :  { %v453_v15 = vsel %vm325_vm9, %v261_v59, %v389_v8  ;;  %v263_v16 = vadd.f32 %v1320_v7, %v192_v9  ;;  %vm326_vm10 = vcmp.gt.f32.partialorder %v262_v10, 0.0  ;;  %v390_v20 = vmul.f32 0.1, %v262_v10 }
  0x49   :  { %v1161_v19 = vpack.c.bf16 %v453_v15, %v452_v14  ;;  %v193_v21 = vmul.f32 %v1020_v11, %v1306_v1  ;;  %v194_v23 = vmul.f32 %v1021_v12, %v1306_v1  ;;  %v195_v24 = vmul.f32 %v1024_v13, %v1306_v1  ;;  %v1246_v14 = vld [vmem:[%s1631_s0 + $0xe8] sm:$0xff]  }
  0x4a   :  { %vm327_vm11 = vcmp.gt.f32.partialorder %v263_v16, 0.0  ;;  %v391_v22 = vmul.f32 0.1, %v263_v16  ;;  %v454_v25 = vsel %vm326_vm10, %v262_v10, %v390_v20  ;;  %v196_v27 = vmul.f32 %v1025_v17, %v1306_v1  ;;  %v1245_v10 = vld [vmem:[%s1631_s0 + $0xe0] sm:$0xff]  }
  0x4b   :  { %1268 = vst [vmem:[%s1634_s3 + $0xa0] sm:$0xff] %v1161_v19   ;;  %v264_v26 = vadd.f32 %v1320_v7, %v193_v21  ;;  %v1028_v28 = vunpack.c.l.bf16 %v1241_v18  ;;  %v265_v30 = vadd.f32 %v1320_v7, %v194_v23  ;;  %v266_v31 = vadd.f32 %v1320_v7, %v195_v24 }
  0x4c   :  { %v455_v29 = vsel %vm327_vm11, %v263_v16, %v391_v22  ;;  %v1029_v32 = vunpack.c.h.bf16 %v1241_v18  ;;  %v267_v35 = vadd.f32 %v1320_v7, %v196_v27  ;;  %v1032_v46 = vunpack.c.l.bf16 %v1242_v36 }
  0x4d   :  { %v1166_v33 = vpack.c.bf16 %v455_v29, %v454_v25  ;;  %vm328_vm12 = vcmp.gt.f32.partialorder %v264_v26, 0.0  ;;  %v392_v34 = vmul.f32 0.1, %v264_v26  ;;  %vm329_vm13 = vcmp.gt.f32.partialorder %v265_v30, 0.0 }
  0x4e   :  { %v393_v37 = vmul.f32 0.1, %v265_v30  ;;  %vm330_vm14 = vcmp.gt.f32.partialorder %v266_v31, 0.0  ;;  %v394_v38 = vmul.f32 0.1, %v266_v31  ;;  %vm331_vm15 = vcmp.gt.f32.partialorder %v267_v35, 0.0 }
  0x4f   :  { %1269 = vst [vmem:[%s1634_s3 + $0xa8] sm:$0xff] %v1166_v33   ;;  %v456_v39 = vsel %vm328_vm12, %v264_v26, %v392_v34  ;;  %v395_v40 = vmul.f32 0.1, %v267_v35  ;;  %v197_v41 = vmul.f32 %v1028_v28, %v1306_v1  ;;  %v198_v45 = vmul.f32 %v1029_v32, %v1306_v1 }
  0x50   :  { %v457_v43 = vsel %vm329_vm13, %v265_v30, %v393_v37  ;;  %v458_v44 = vsel %vm330_vm14, %v266_v31, %v394_v38  ;;  %v1033_v50 = vunpack.c.h.bf16 %v1242_v36  ;;  %v199_v53 = vmul.f32 %v1032_v46, %v1306_v1  ;;  %v1247_v30 = vld [vmem:[%s1631_s0 + $0xf0] sm:$0xff]  }
  0x51   :  { %v1171_v47 = vpack.c.bf16 %v457_v43, %v456_v39  ;;  %v459_v48 = vsel %vm331_vm15, %v267_v35, %v395_v40  ;;  %v268_v49 = vadd.f32 %v1320_v7, %v197_v41  ;;  %v269_v52 = vadd.f32 %v1320_v7, %v198_v45 }
  0x52   :  { %v1176_v51 = vpack.c.bf16 %v459_v48, %v458_v44  ;;  %v1036_v54 = vunpack.c.l.bf16 %v1243_v42  ;;  %v200_v57 = vmul.f32 %v1033_v50, %v1306_v1  ;;  %v1037_v58 = vunpack.c.h.bf16 %v1243_v42  ;;  %v1248_v44 = vld [vmem:[%s1631_s0 + $0xf8] sm:$0xff]  }
  0x53   :  { %1270 = vst [vmem:[%s1634_s3 + $0xb0] sm:$0xff] %v1171_v47   ;;  %vm332_vm0 = vcmp.gt.f32.partialorder %v268_v49, 0.0  ;;  %v396_v56 = vmul.f32 0.1, %v268_v49  ;;  %vm333_vm1 = vcmp.gt.f32.partialorder %v269_v52, 0.0  ;;  %v270_v60 = vadd.f32 %v1320_v7, %v199_v53 }
  0x54   :  { %1271 = vst [vmem:[%s1634_s3 + $0xb8] sm:$0xff] %v1176_v51   ;;  %v397_v59 = vmul.f32 0.1, %v269_v52  ;;  %v201_v61 = vmul.f32 %v1036_v54, %v1306_v1  ;;  %v271_v63 = vadd.f32 %v1320_v7, %v200_v57  ;;  %v202_v0 = vmul.f32 %v1037_v58, %v1306_v1 }
  0x55   :  { %v460_v62 = vsel %vm332_vm0, %v268_v49, %v396_v56  ;;  %v1040_v2 = vunpack.c.l.bf16 %v1244_v55  ;;  %vm334_vm2 = vcmp.gt.f32.partialorder %v270_v60, 0.0  ;;  %v398_v4 = vmul.f32 0.1, %v270_v60 }
  0x56   :  { %v461_v3 = vsel %vm333_vm1, %v269_v52, %v397_v59  ;;  %v272_v5 = vadd.f32 %v1320_v7, %v201_v61  ;;  %vm335_vm3 = vcmp.gt.f32.partialorder %v271_v63, 0.0  ;;  %v399_v8 = vmul.f32 0.1, %v271_v63 }
  0x57   :  { %v1181_v6 = vpack.c.bf16 %v461_v3, %v460_v62  ;;  %v273_v9 = vadd.f32 %v1320_v7, %v202_v0  ;;  %v462_v11 = vsel %vm334_vm2, %v270_v60, %v398_v4  ;;  %v1041_v13 = vunpack.c.h.bf16 %v1244_v55 }
  0x58   :  { %vm336_vm4 = vcmp.gt.f32.partialorder %v272_v5, 0.0  ;;  %v400_v12 = vmul.f32 0.1, %v272_v5  ;;  %v463_v15 = vsel %vm335_vm3, %v271_v63, %v399_v8  ;;  %v203_v17 = vmul.f32 %v1040_v2, %v1306_v1 }
  0x59   :  { %1272 = vst [vmem:[%s1634_s3 + $0xc0] sm:$0xff] %v1181_v6   ;;  %vm337_vm5 = vcmp.gt.f32.partialorder %v273_v9, 0.0  ;;  %v401_v16 = vmul.f32 0.1, %v273_v9  ;;  %v1186_v18 = vpack.c.bf16 %v463_v15, %v462_v11  ;;  %v204_v20 = vmul.f32 %v1041_v13, %v1306_v1 }
  0x5a   :  { %v464_v19 = vsel %vm336_vm4, %v272_v5, %v400_v12  ;;  %v1044_v21 = vunpack.c.l.bf16 %v1245_v10  ;;  %v274_v23 = vadd.f32 %v1320_v7, %v203_v17  ;;  %v1045_v24 = vunpack.c.h.bf16 %v1245_v10 }
  0x5b   :  { %v465_v22 = vsel %vm337_vm5, %v273_v9, %v401_v16  ;;  %v1048_v25 = vunpack.c.l.bf16 %v1246_v14  ;;  %1273 = vst [vmem:[%s1634_s3 + $0xc8] sm:$0xff] %v1186_v18   ;;  %v275_v27 = vadd.f32 %v1320_v7, %v204_v20  ;;  %v1049_v29 = vunpack.c.h.bf16 %v1246_v14 }
  0x5c   :  { %v1191_v26 = vpack.c.bf16 %v465_v22, %v464_v19  ;;  %v205_v28 = vmul.f32 %v1044_v21, %v1306_v1  ;;  %vm338_vm6 = vcmp.gt.f32.partialorder %v274_v23, 0.0  ;;  %v402_v31 = vmul.f32 0.1, %v274_v23 }
  0x5d   :  { %v206_v32 = vmul.f32 %v1045_v24, %v1306_v1  ;;  %v207_v33 = vmul.f32 %v1048_v25, %v1306_v1  ;;  %vm339_vm7 = vcmp.gt.f32.partialorder %v275_v27, 0.0  ;;  %v403_v34 = vmul.f32 0.1, %v275_v27 }
  0x5e   :  { %1274 = vst [vmem:[%s1634_s3 + $0xd0] sm:$0xff] %v1191_v26   ;;  %v276_v35 = vadd.f32 %v1320_v7, %v205_v28  ;;  %v208_v36 = vmul.f32 %v1049_v29, %v1306_v1  ;;  %v466_v37 = vsel %vm338_vm6, %v274_v23, %v402_v31  ;;  %v1052_v40 = vunpack.c.l.bf16 %v1247_v30 }
  0x5f   :  { %v277_v38 = vadd.f32 %v1320_v7, %v206_v32  ;;  %v278_v39 = vadd.f32 %v1320_v7, %v207_v33  ;;  %v467_v41 = vsel %vm339_vm7, %v275_v27, %v403_v34  ;;  %v1053_v51 = vunpack.c.h.bf16 %v1247_v30 }
  0x60   :  { %vm340_vm8 = vcmp.gt.f32.partialorder %v276_v35, 0.0  ;;  %v404_v42 = vmul.f32 0.1, %v276_v35  ;;  %v279_v43 = vadd.f32 %v1320_v7, %v208_v36  ;;  %v1196_v45 = vpack.c.bf16 %v467_v41, %v466_v37 }
  0x61   :  { %vm341_vm9 = vcmp.gt.f32.partialorder %v277_v38, 0.0  ;;  %v405_v46 = vmul.f32 0.1, %v277_v38  ;;  %vm342_vm10 = vcmp.gt.f32.partialorder %v278_v39, 0.0  ;;  %v406_v48 = vmul.f32 0.1, %v278_v39 }
  0x62   :  { %v468_v47 = vsel %vm340_vm8, %v276_v35, %v404_v42  ;;  %vm343_vm11 = vcmp.gt.f32.partialorder %v279_v43, 0.0  ;;  %v407_v49 = vmul.f32 0.1, %v279_v43  ;;  %1275 = vst [vmem:[%s1634_s3 + $0xd8] sm:$0xff] %v1196_v45   ;;  %v209_v52 = vmul.f32 %v1052_v40, %v1306_v1 }
  0x63   :  { %v469_v50 = vsel %vm341_vm9, %v277_v38, %v405_v46  ;;  %v1056_v53 = vunpack.c.l.bf16 %v1248_v44  ;;  %v470_v55 = vsel %vm342_vm10, %v278_v39, %v406_v48  ;;  %v1057_v57 = vunpack.c.h.bf16 %v1248_v44 }
  0x64   :  { %v1201_v54 = vpack.c.bf16 %v469_v50, %v468_v47  ;;  %v471_v56 = vsel %vm343_vm11, %v279_v43, %v407_v49  ;;  %v210_v59 = vmul.f32 %v1053_v51, %v1306_v1  ;;  %v280_v60 = vadd.f32 %v1320_v7, %v209_v52 }
  0x65   :  { %v1206_v58 = vpack.c.bf16 %v471_v56, %v470_v55  ;;  %v211_v61 = vmul.f32 %v1056_v53, %v1306_v1  ;;  %v212_v62 = vmul.f32 %v1057_v57, %v1306_v1 }
  0x66   :  { %1276 = vst [vmem:[%s1634_s3 + $0xe0] sm:$0xff] %v1201_v54   ;;  %v281_v63 = vadd.f32 %v1320_v7, %v210_v59  ;;  %vm344_vm12 = vcmp.gt.f32.partialorder %v280_v60, 0.0  ;;  %v408_v0 = vmul.f32 0.1, %v280_v60 }
  0x67   :  { %1277 = vst [vmem:[%s1634_s3 + $0xe8] sm:$0xff] %v1206_v58   ;;  %v282_v2 = vadd.f32 %v1320_v7, %v211_v61  ;;  %v283_v3 = vadd.f32 %v1320_v7, %v212_v62 }
  0x68   :  { %vm345_vm13 = vcmp.gt.f32.partialorder %v281_v63, 0.0  ;;  %v409_v4 = vmul.f32 0.1, %v281_v63  ;;  %v472_v5 = vsel %vm344_vm12, %v280_v60, %v408_v0 }
  0x69   :  { %vm346_vm14 = vcmp.gt.f32.partialorder %v282_v2, 0.0  ;;  %vm347_vm15 = vcmp.gt.f32.partialorder %v283_v3, 0.0  ;;  %v410_v6 = vmul.f32 0.1, %v282_v2  ;;  %v411_v8 = vmul.f32 0.1, %v283_v3 }
  0x6a   :  { %v473_v1 = vsel %vm345_vm13, %v281_v63, %v409_v4 }
  0x6b   :  { %v1211_v9 = vpack.c.bf16 %v473_v1, %v472_v5  ;;  %v474_v10 = vsel %vm346_vm14, %v282_v2, %v410_v6  ;;  %v475_v11 = vsel %vm347_vm15, %v283_v3, %v411_v8 }
  0x6c   :  { %v1216_v12 = vpack.c.bf16 %v475_v11, %v474_v10 }
  0x6d   :  { %1278 = vst [vmem:[%s1634_s3 + $0xf0] sm:$0xff] %v1211_v9  }
  0x6e   :  { %1279 = vst [vmem:[%s1634_s3 + $0xf8] sm:$0xff] %v1216_v12  }

// kernel: _lambda_.14
= control target key start
LH: loop header
LB: loop body
LE: loop exit
PB: predicated region body
PF: predicated region fallthrough
CT: control target
= control target key end

     0   :  { %vm482_vm0 = vcmask 1044480   ;;  %vm483_vm1 = vcmask 1045504   ;;  %vm385_vm2 = vcmask 220160   ;;  %v2034_v1 = vmov 65535   ;;  %s2480_s1 = inlined_call_operand.vmem [shape: bf16[27,128], index: 1, kind: input, shape index: {}]   ;;  %s2481_s0 = inlined_call_operand.vmem [shape: bf16[512,27], index: 0, kind: input, shape index: {}]   ;;  %s2482_s2 = inlined_call_operand.vmem [shape: bf16[512,128], index: 2, kind: output, shape index: {0}]   ;;  %s2483_s3 = inlined_call_operand.vmem [shape: f32[8,128], index: 3, kind: output, shape index: {1}]  }
   0x1   :  { %v2000_v0 = vld [vmem:[%s2480_s1] sm:$0xff]   ;;  %v484_v2 = vsel %vm482_vm0, 4294967295, %v2034_v1  ;;  %v2001_v3 = vld [vmem:[%s2480_s1 + $0x8] sm:$0x3f]   ;;  %v2004_v8 = vld [vmem:[%s2481_s0 + $0x10] sm:$0xff]   ;;  %vm1495_vm3 = vcmask 1040384  }
   0x2   :  { %1927 = vmatprep.subr.bf16.mxu0 %v2000_v0  ;;  %v485_v4 = vsel %vm483_vm1, %v484_v2, 0  ;;  %v2002_v5 = vld [vmem:[%s2481_s0] sm:$0xff]   ;;  %1995 = vmatprep.subr.bf16.mxu1 %v2000_v0  ;;  %v2003_v7 = vld [vmem:[%s2481_s0 + $0x8] sm:$0xff]   ;;  %v2005_v9 = vld [vmem:[%s2481_s0 + $0x18] sm:$0xff]   ;;  %vm1497_vm4 = vcmask 1041408  }
   0x3   :  { %1928 = vmatpush3.bf16.msra.mxu0 %v2000_v0  ;;  %v487_v6 = vand.u32 %v2001_v3, %v485_v4  ;;  %1997 = vmatpush3.bf16.msra.mxu1 %v2000_v0  ;;  %v2006_v10 = vld [vmem:[%s2481_s0 + $0x20] sm:$0xff]   ;;  %v2019_v12 = vld [vmem:[%s2481_s0 + $0x88] sm:$0xff]   ;;  %v2020_v13 = vld [vmem:[%s2481_s0 + $0x90] sm:$0xff]  }
   0x4   :  { %1931 = vmatprep.mubr.msk.bf16.mxu0 %vm385_vm2, %v2002_v5  ;;  %v2018_v11 = vld [vmem:[%s2481_s0 + $0x80] sm:$0xff]   ;;  %v2007_v14 = vld [vmem:[%s2481_s0 + $0x28] sm:$0xff]   ;;  %v2008_v15 = vld [vmem:[%s2481_s0 + $0x30] sm:$0xff]  }
   0x5   :  { %1929 = vmatprep.subr.bf16.mxu0 %v487_v6  ;;  %1996 = vmatprep.subr.bf16.mxu1 %v487_v6  ;;  %v2021_v16 = vld [vmem:[%s2481_s0 + $0x98] sm:$0xff]   ;;  %v2022_v17 = vld [vmem:[%s2481_s0 + $0xa0] sm:$0xff]   ;;  %v2023_v20 = vld [vmem:[%s2481_s0 + $0xa8] sm:$0xff]  }
   0x6   :  { %1963 = vmatprep.mubr.msk.bf16.mxu1 %vm385_vm2, %v2018_v11  ;;  %v2009_v18 = vld [vmem:[%s2481_s0 + $0x38] sm:$0xff]   ;;  %v2010_v19 = vld [vmem:[%s2481_s0 + $0x40] sm:$0xff]   ;;  %v2024_v21 = vld [vmem:[%s2481_s0 + $0xb0] sm:$0xff]  }
   0x7   :  { %1930 = vmatpush3.bf16.msra.mxu0 %v487_v6  ;;  %1998 = vmatpush3.bf16.msra.mxu1 %v487_v6  ;;  %v2011_v22 = vld [vmem:[%s2481_s0 + $0x48] sm:$0xff]   ;;  %v2012_v23 = vld [vmem:[%s2481_s0 + $0x50] sm:$0xff]   ;;  %v2025_v24 = vld [vmem:[%s2481_s0 + $0xb8] sm:$0xff]  }
   0x8   :  { %v2026_v25 = vld [vmem:[%s2481_s0 + $0xc0] sm:$0xff]   ;;  %v2013_v26 = vld [vmem:[%s2481_s0 + $0x58] sm:$0xff]   ;;  %v2027_v28 = vld [vmem:[%s2481_s0 + $0xc8] sm:$0xff]  }
   0x9   :  { %v2014_v27 = vld [vmem:[%s2481_s0 + $0x60] sm:$0xff]   ;;  %v2028_v29 = vld [vmem:[%s2481_s0 + $0xd0] sm:$0xff]   ;;  %v2015_v30 = vld [vmem:[%s2481_s0 + $0x68] sm:$0xff]  }
   0xa   :  { %1932 = vmatmul.mubr.msk.bf16.vlgmr.msra.gmra.mrb[0].mxu0 %vm385_vm2, %v2003_v7  ;;  %1964 = vmatmul.mubr.msk.bf16.vlgmr.msra.gmra.mrb[0].mxu1 %vm385_vm2, %v2019_v12  ;;  %v2016_v31 = vld [vmem:[%s2481_s0 + $0x70] sm:$0xff]   ;;  %v2029_v32 = vld [vmem:[%s2481_s0 + $0xd8] sm:$0xff]   ;;  %v2030_v33 = vld [vmem:[%s2481_s0 + $0xe0] sm:$0xff]  }
   0xb   :  { %1935 = vmatprep.mubr.msk.bf16.mxu0 %vm385_vm2, %v2004_v8  ;;  %1967 = vmatprep.mubr.msk.bf16.mxu1 %vm385_vm2, %v2020_v13  ;;  %v2017_v34 = vld [vmem:[%s2481_s0 + $0x78] sm:$0xff]   ;;  %v2031_v35 = vld [vmem:[%s2481_s0 + $0xe8] sm:$0xff]   ;;  %v2032_v36 = vld [vmem:[%s2481_s0 + $0xf0] sm:$0xff]  }
   0xc   :  { %v2033_v37 = vld [vmem:[%s2481_s0 + $0xf8] sm:$0xff]  }
  0x12   :  { %1936 = vmatmul.mubr.msk.bf16.gmra.mrb[4].mxu0 %vm385_vm2, %v2005_v9  ;;  %1968 = vmatmul.mubr.msk.bf16.gmra.mrb[4].mxu1 %vm385_vm2, %v2021_v16 }
  0x13   :  { %1939 = vmatprep.mubr.msk.bf16.mxu0 %vm385_vm2, %v2006_v10  ;;  %1971 = vmatprep.mubr.msk.bf16.mxu1 %vm385_vm2, %v2022_v17 }
  0x1a   :  { %1940 = vmatmul.mubr.msk.bf16.gmra.mrb[8].mxu0 %vm385_vm2, %v2007_v14  ;;  %1972 = vmatmul.mubr.msk.bf16.gmra.mrb[8].mxu1 %vm385_vm2, %v2023_v20 }
  0x1b   :  { %1943 = vmatprep.mubr.msk.bf16.mxu0 %vm385_vm2, %v2008_v15  ;;  %1975 = vmatprep.mubr.msk.bf16.mxu1 %vm385_vm2, %v2024_v21 }
  0x22   :  { %1944 = vmatmul.mubr.msk.bf16.gmra.mrb[12].mxu0 %vm385_vm2, %v2009_v18  ;;  %1976 = vmatmul.mubr.msk.bf16.gmra.mrb[12].mxu1 %vm385_vm2, %v2025_v24 }
  0x23   :  { %1947 = vmatprep.mubr.msk.bf16.mxu0 %vm385_vm2, %v2010_v19  ;;  %1979 = vmatprep.mubr.msk.bf16.mxu1 %vm385_vm2, %v2026_v25 }
  0x2a   :  { %1948 = vmatmul.mubr.msk.bf16.gmra.mrb[16].mxu0 %vm385_vm2, %v2011_v22  ;;  %1980 = vmatmul.mubr.msk.bf16.gmra.mrb[16].mxu1 %vm385_vm2, %v2027_v28 }
  0x2b   :  { %1951 = vmatprep.mubr.msk.bf16.mxu0 %vm385_vm2, %v2012_v23  ;;  %1983 = vmatprep.mubr.msk.bf16.mxu1 %vm385_vm2, %v2028_v29 }
  0x32   :  { %1952 = vmatmul.mubr.msk.bf16.gmra.mrb[20].mxu0 %vm385_vm2, %v2013_v26  ;;  %1984 = vmatmul.mubr.msk.bf16.gmra.mrb[20].mxu1 %vm385_vm2, %v2029_v32 }
  0x33   :  { %1955 = vmatprep.mubr.msk.bf16.mxu0 %vm385_vm2, %v2014_v27  ;;  %1987 = vmatprep.mubr.msk.bf16.mxu1 %vm385_vm2, %v2030_v33 }
  0x3a   :  { %1956 = vmatmul.mubr.msk.bf16.gmra.mrb[24].mxu0 %vm385_vm2, %v2015_v30  ;;  %1988 = vmatmul.mubr.msk.bf16.gmra.mrb[24].mxu1 %vm385_vm2, %v2031_v35 }
  0x3b   :  { %1959 = vmatprep.mubr.msk.bf16.mxu0 %vm385_vm2, %v2016_v31  ;;  %1991 = vmatprep.mubr.msk.bf16.mxu1 %vm385_vm2, %v2032_v36 }
  0x42   :  { %1960 = vmatmul.mubr.msk.bf16.gmra.mrb[28].mxu0 %vm385_vm2, %v2017_v34  ;;  %1992 = vmatmul.mubr.msk.bf16.gmra.mrb[28].mxu1 %vm385_vm2, %v2033_v37 }
  0xdd   :  { %v1933_v38 = vpop.f32.mrb[0].mxu0  ;;  %v2195_v61 = vpop.f32.mrb[0].mxu1 }
  0xde   :  { %v523_v39 = vpop.f32.mrb[1].mxu0  ;;  %v1364_v47 = vmul.f32 %v1933_v38, %v1933_v38  ;;  %v2197_v2 = vpop.f32.mrb[1].mxu1 }
  0xdf   :  { %v1934_v40 = vpop.f32.mrb[2].mxu0  ;;  %v1362_v43 = vmul.f32 %v523_v39, %v523_v39  ;;  %v2202_v3 = vpop.f32.mrb[2].mxu1 }
  0xe0   :  { %v1710_v41 = vpack.c.bf16 %v1934_v40, %v1933_v38  ;;  %v526_v42 = vpop.f32.mrb[3].mxu0  ;;  %v1365_v50 = vmul.f32 %v1934_v40, %v1934_v40  ;;  %v1790_v7 = vpack.c.bf16 %v2202_v3, %v2195_v61  ;;  %v2209_v8 = vpop.f32.mrb[3].mxu1 }
  0xe1   :  { %v1705_v44 = vpack.c.bf16 %v526_v42, %v523_v39  ;;  %v1293_v45 = vadd.f32 %v526_v42, %v523_v39  ;;  %v1363_v46 = vmul.f32 %v526_v42, %v526_v42  ;;  %v1785_v9 = vpack.c.bf16 %v2209_v8, %v2197_v2 }
  0xe2   :  { %1862 = vst [vmem:[%s2482_s2 + $0x8] sm:$0xff] %v1710_v41   ;;  %1878 = vst [vmem:[%s2482_s2 + $0x88] sm:$0xff] %v1790_v7  }
  0xe3   :  { %1706 = vst [vmem:[%s2482_s2] sm:$0xff] %v1705_v44   ;;  %v1294_v48 = vadd.f32 %v1933_v38, %v1293_v45  ;;  %v1426_v49 = vadd.f32 %v1363_v46, %v1362_v43  ;;  %1877 = vst [vmem:[%s2482_s2 + $0x80] sm:$0xff] %v1785_v9  }
  0xe5   :  { %v1427_v51 = vadd.f32 %v1426_v49, %v1364_v47  ;;  %v1937_v52 = vpop.f32.mrb[4].mxu0  ;;  %v1295_v53 = vadd.f32 %v1934_v40, %v1294_v48  ;;  %v2219_v21 = vpop.f32.mrb[4].mxu1 }
  0xe6   :  { %v539_v54 = vpop.f32.mrb[5].mxu0  ;;  %v1368_v4 = vmul.f32 %v1937_v52, %v1937_v52  ;;  %v2221_v26 = vpop.f32.mrb[5].mxu1 }
  0xe7   :  { %v1296_v55 = vadd.f32 %v1295_v53, %v539_v54  ;;  %v1366_v56 = vmul.f32 %v539_v54, %v539_v54  ;;  %v1428_v57 = vadd.f32 %v1427_v51, %v1365_v50  ;;  %v1938_v58 = vpop.f32.mrb[6].mxu0  ;;  %v2226_v27 = vpop.f32.mrb[6].mxu1 }
  0xe8   :  { %v1720_v59 = vpack.c.bf16 %v1938_v58, %v1937_v52  ;;  %v542_v60 = vpop.f32.mrb[7].mxu0  ;;  %v1369_v10 = vmul.f32 %v1938_v58, %v1938_v58  ;;  %v1800_v31 = vpack.c.bf16 %v2226_v27, %v2219_v21  ;;  %v2233_v32 = vpop.f32.mrb[7].mxu1 }
  0xe9   :  { %v1429_v62 = vadd.f32 %v1428_v57, %v1366_v56  ;;  %v1715_v63 = vpack.c.bf16 %v542_v60, %v539_v54  ;;  %v1297_v0 = vadd.f32 %v1296_v55, %v542_v60  ;;  %v1367_v1 = vmul.f32 %v542_v60, %v542_v60 }
  0xea   :  { %1864 = vst [vmem:[%s2482_s2 + $0x18] sm:$0xff] %v1720_v59   ;;  %v1795_v33 = vpack.c.bf16 %v2233_v32, %v2221_v26  ;;  %1880 = vst [vmem:[%s2482_s2 + $0x98] sm:$0xff] %v1800_v31  }
  0xeb   :  { %1863 = vst [vmem:[%s2482_s2 + $0x10] sm:$0xff] %v1715_v63   ;;  %v1298_v5 = vadd.f32 %v1937_v52, %v1297_v0  ;;  %v1430_v6 = vadd.f32 %v1429_v62, %v1367_v1 }
  0xec   :  { %1879 = vst [vmem:[%s2482_s2 + $0x90] sm:$0xff] %v1795_v33  }
  0xed   :  { %v1431_v11 = vadd.f32 %v1430_v6, %v1368_v4  ;;  %v1941_v12 = vpop.f32.mrb[8].mxu0  ;;  %v1299_v13 = vadd.f32 %v1938_v58, %v1298_v5  ;;  %v2243_v45 = vpop.f32.mrb[8].mxu1 }
  0xee   :  { %v555_v14 = vpop.f32.mrb[9].mxu0  ;;  %v1372_v28 = vmul.f32 %v1941_v12, %v1941_v12  ;;  %v2245_v50 = vpop.f32.mrb[9].mxu1 }
  0xef   :  { %v1300_v15 = vadd.f32 %v1299_v13, %v555_v14  ;;  %v1370_v16 = vmul.f32 %v555_v14, %v555_v14  ;;  %v1432_v17 = vadd.f32 %v1431_v11, %v1369_v10  ;;  %v1942_v18 = vpop.f32.mrb[10].mxu0  ;;  %v2250_v51 = vpop.f32.mrb[10].mxu1 }
  0xf0   :  { %v1730_v19 = vpack.c.bf16 %v1942_v18, %v1941_v12  ;;  %v558_v20 = vpop.f32.mrb[11].mxu0  ;;  %v1373_v34 = vmul.f32 %v1942_v18, %v1942_v18  ;;  %v1810_v55 = vpack.c.bf16 %v2250_v51, %v2243_v45  ;;  %v2257_v56 = vpop.f32.mrb[11].mxu1 }
  0xf1   :  { %v1433_v22 = vadd.f32 %v1432_v17, %v1370_v16  ;;  %v1725_v23 = vpack.c.bf16 %v558_v20, %v555_v14  ;;  %v1301_v24 = vadd.f32 %v1300_v15, %v558_v20  ;;  %v1371_v25 = vmul.f32 %v558_v20, %v558_v20 }
  0xf2   :  { %1866 = vst [vmem:[%s2482_s2 + $0x28] sm:$0xff] %v1730_v19   ;;  %v1805_v57 = vpack.c.bf16 %v2257_v56, %v2245_v50  ;;  %1882 = vst [vmem:[%s2482_s2 + $0xa8] sm:$0xff] %v1810_v55  }
  0xf3   :  { %1865 = vst [vmem:[%s2482_s2 + $0x20] sm:$0xff] %v1725_v23   ;;  %v1302_v29 = vadd.f32 %v1941_v12, %v1301_v24  ;;  %v1434_v30 = vadd.f32 %v1433_v22, %v1371_v25 }
  0xf4   :  { %1881 = vst [vmem:[%s2482_s2 + $0xa0] sm:$0xff] %v1805_v57  }
  0xf5   :  { %v1435_v35 = vadd.f32 %v1434_v30, %v1372_v28  ;;  %v1945_v36 = vpop.f32.mrb[12].mxu0  ;;  %v1303_v37 = vadd.f32 %v1942_v18, %v1302_v29  ;;  %v2267_v9 = vpop.f32.mrb[12].mxu1 }
  0xf6   :  { %v571_v38 = vpop.f32.mrb[13].mxu0  ;;  %v1376_v52 = vmul.f32 %v1945_v36, %v1945_v36  ;;  %v2269_v14 = vpop.f32.mrb[13].mxu1 }
  0xf7   :  { %v1304_v39 = vadd.f32 %v1303_v37, %v571_v38  ;;  %v1374_v40 = vmul.f32 %v571_v38, %v571_v38  ;;  %v1436_v41 = vadd.f32 %v1435_v35, %v1373_v34  ;;  %v1946_v42 = vpop.f32.mrb[14].mxu0  ;;  %v2274_v15 = vpop.f32.mrb[14].mxu1 }
  0xf8   :  { %v1740_v43 = vpack.c.bf16 %v1946_v42, %v1945_v36  ;;  %v574_v44 = vpop.f32.mrb[15].mxu0  ;;  %v1377_v58 = vmul.f32 %v1946_v42, %v1946_v42  ;;  %v1820_v19 = vpack.c.bf16 %v2274_v15, %v2267_v9  ;;  %v2281_v20 = vpop.f32.mrb[15].mxu1 }
  0xf9   :  { %v1437_v46 = vadd.f32 %v1436_v41, %v1374_v40  ;;  %v1735_v47 = vpack.c.bf16 %v574_v44, %v571_v38  ;;  %v1305_v48 = vadd.f32 %v1304_v39, %v574_v44  ;;  %v1375_v49 = vmul.f32 %v574_v44, %v574_v44 }
  0xfa   :  { %1868 = vst [vmem:[%s2482_s2 + $0x38] sm:$0xff] %v1740_v43   ;;  %v1815_v22 = vpack.c.bf16 %v2281_v20, %v2269_v14  ;;  %1884 = vst [vmem:[%s2482_s2 + $0xb8] sm:$0xff] %v1820_v19  }
  0xfb   :  { %1867 = vst [vmem:[%s2482_s2 + $0x30] sm:$0xff] %v1735_v47   ;;  %v1306_v53 = vadd.f32 %v1945_v36, %v1305_v48  ;;  %v1438_v54 = vadd.f32 %v1437_v46, %v1375_v49 }
  0xfc   :  { %1883 = vst [vmem:[%s2482_s2 + $0xb0] sm:$0xff] %v1815_v22  }
  0xfd   :  { %v1439_v59 = vadd.f32 %v1438_v54, %v1376_v52  ;;  %v1949_v60 = vpop.f32.mrb[16].mxu0  ;;  %v1307_v62 = vadd.f32 %v1946_v42, %v1306_v53  ;;  %v2291_v37 = vpop.f32.mrb[16].mxu1 }
  0xfe   :  { %v587_v63 = vpop.f32.mrb[17].mxu0  ;;  %v1380_v16 = vmul.f32 %v1949_v60, %v1949_v60  ;;  %v2293_v42 = vpop.f32.mrb[17].mxu1 }
  0xff   :  { %v1308_v0 = vadd.f32 %v1307_v62, %v587_v63  ;;  %v1378_v1 = vmul.f32 %v587_v63, %v587_v63  ;;  %v1440_v4 = vadd.f32 %v1439_v59, %v1377_v58  ;;  %v1950_v5 = vpop.f32.mrb[18].mxu0  ;;  %v2298_v43 = vpop.f32.mrb[18].mxu1 }
 0x100   :  { %v1750_v6 = vpack.c.bf16 %v1950_v5, %v1949_v60  ;;  %v590_v7 = vpop.f32.mrb[19].mxu0  ;;  %v1381_v23 = vmul.f32 %v1950_v5, %v1950_v5  ;;  %v1830_v48 = vpack.c.bf16 %v2298_v43, %v2291_v37  ;;  %v2305_v49 = vpop.f32.mrb[19].mxu1 }
 0x101   :  { %v1441_v10 = vadd.f32 %v1440_v4, %v1378_v1  ;;  %v1745_v11 = vpack.c.bf16 %v590_v7, %v587_v63  ;;  %v1309_v12 = vadd.f32 %v1308_v0, %v590_v7  ;;  %v1379_v13 = vmul.f32 %v590_v7, %v590_v7 }
 0x102   :  { %1870 = vst [vmem:[%s2482_s2 + $0x48] sm:$0xff] %v1750_v6   ;;  %v1825_v52 = vpack.c.bf16 %v2305_v49, %v2293_v42  ;;  %1886 = vst [vmem:[%s2482_s2 + $0xc8] sm:$0xff] %v1830_v48  }
 0x103   :  { %1869 = vst [vmem:[%s2482_s2 + $0x40] sm:$0xff] %v1745_v11   ;;  %v1310_v17 = vadd.f32 %v1949_v60, %v1309_v12  ;;  %v1442_v18 = vadd.f32 %v1441_v10, %v1379_v13 }
 0x104   :  { %1885 = vst [vmem:[%s2482_s2 + $0xc0] sm:$0xff] %v1825_v52  }
 0x105   :  { %v1443_v24 = vadd.f32 %v1442_v18, %v1380_v16  ;;  %v1953_v25 = vpop.f32.mrb[20].mxu0  ;;  %v1311_v28 = vadd.f32 %v1950_v5, %v1310_v17  ;;  %v2315_v4 = vpop.f32.mrb[20].mxu1 }
 0x106   :  { %v603_v29 = vpop.f32.mrb[21].mxu0  ;;  %v1384_v44 = vmul.f32 %v1953_v25, %v1953_v25  ;;  %v2317_v11 = vpop.f32.mrb[21].mxu1 }
 0x107   :  { %v1312_v30 = vadd.f32 %v1311_v28, %v603_v29  ;;  %v1382_v31 = vmul.f32 %v603_v29, %v603_v29  ;;  %v1444_v33 = vadd.f32 %v1443_v24, %v1381_v23  ;;  %v1954_v34 = vpop.f32.mrb[22].mxu0  ;;  %v2322_v12 = vpop.f32.mrb[22].mxu1 }
 0x108   :  { %v1760_v35 = vpack.c.bf16 %v1954_v34, %v1953_v25  ;;  %v606_v36 = vpop.f32.mrb[23].mxu0  ;;  %v1385_v53 = vmul.f32 %v1954_v34, %v1954_v34  ;;  %v1840_v18 = vpack.c.bf16 %v2322_v12, %v2315_v4  ;;  %v2329_v19 = vpop.f32.mrb[23].mxu1 }
 0x109   :  { %v1445_v38 = vadd.f32 %v1444_v33, %v1382_v31  ;;  %v1755_v39 = vpack.c.bf16 %v606_v36, %v603_v29  ;;  %v1313_v40 = vadd.f32 %v1312_v30, %v606_v36  ;;  %v1383_v41 = vmul.f32 %v606_v36, %v606_v36 }
 0x10a   :  { %1872 = vst [vmem:[%s2482_s2 + $0x58] sm:$0xff] %v1760_v35   ;;  %v1835_v22 = vpack.c.bf16 %v2329_v19, %v2317_v11  ;;  %1888 = vst [vmem:[%s2482_s2 + $0xd8] sm:$0xff] %v1840_v18  }
 0x10b   :  { %1871 = vst [vmem:[%s2482_s2 + $0x50] sm:$0xff] %v1755_v39   ;;  %v1314_v46 = vadd.f32 %v1953_v25, %v1313_v40  ;;  %v1446_v47 = vadd.f32 %v1445_v38, %v1383_v41 }
 0x10c   :  { %1887 = vst [vmem:[%s2482_s2 + $0xd0] sm:$0xff] %v1835_v22  }
 0x10d   :  { %v1447_v54 = vadd.f32 %v1446_v47, %v1384_v44  ;;  %v1957_v55 = vpop.f32.mrb[24].mxu0  ;;  %v1315_v57 = vadd.f32 %v1954_v34, %v1314_v46  ;;  %v2339_v38 = vpop.f32.mrb[24].mxu1 }
 0x10e   :  { %v619_v58 = vpop.f32.mrb[25].mxu0  ;;  %v1388_v13 = vmul.f32 %v1957_v55, %v1957_v55  ;;  %v2341_v46 = vpop.f32.mrb[25].mxu1 }
 0x10f   :  { %v1316_v59 = vadd.f32 %v1315_v57, %v619_v58  ;;  %v1386_v60 = vmul.f32 %v619_v58, %v619_v58  ;;  %v1448_v62 = vadd.f32 %v1447_v54, %v1385_v53  ;;  %v1958_v63 = vpop.f32.mrb[26].mxu0  ;;  %v2346_v47 = vpop.f32.mrb[26].mxu1 }
 0x110   :  { %v1770_v0 = vpack.c.bf16 %v1958_v63, %v1957_v55  ;;  %v622_v1 = vpop.f32.mrb[27].mxu0  ;;  %v1389_v23 = vmul.f32 %v1958_v63, %v1958_v63  ;;  %v1850_v54 = vpack.c.bf16 %v2346_v47, %v2339_v38 }
 0x111   :  { %v1449_v5 = vadd.f32 %v1448_v62, %v1386_v60  ;;  %v1765_v6 = vpack.c.bf16 %v622_v1, %v619_v58  ;;  %v1317_v7 = vadd.f32 %v1316_v59, %v622_v1  ;;  %v1387_v10 = vmul.f32 %v622_v1, %v622_v1 }
 0x112   :  { %1874 = vst [vmem:[%s2482_s2 + $0x68] sm:$0xff] %v1770_v0   ;;  %v1394_v62 = vmul.f32 %v2197_v2, %v2197_v2  ;;  %1890 = vst [vmem:[%s2482_s2 + $0xe8] sm:$0xff] %v1850_v54  }
 0x113   :  { %1873 = vst [vmem:[%s2482_s2 + $0x60] sm:$0xff] %v1765_v6   ;;  %v1318_v16 = vadd.f32 %v1957_v55, %v1317_v7  ;;  %v1450_v17 = vadd.f32 %v1449_v5, %v1387_v10  ;;  %v2353_v55 = vpop.f32.mrb[27].mxu1  ;;  %v1395_v7 = vmul.f32 %v2209_v8, %v2209_v8 }
 0x114   :  { %v1845_v57 = vpack.c.bf16 %v2353_v55, %v2341_v46 }
 0x115   :  { %v1451_v24 = vadd.f32 %v1450_v17, %v1388_v13  ;;  %v1961_v25 = vpop.f32.mrb[28].mxu0  ;;  %v1319_v28 = vadd.f32 %v1958_v63, %v1318_v16  ;;  %v2366_v1 = vpop.f32.mrb[28].mxu1  ;;  %v1396_v16 = vmul.f32 %v2195_v61, %v2195_v61 }
 0x116   :  { %v635_v29 = vpop.f32.mrb[29].mxu0  ;;  %v1392_v48 = vmul.f32 %v1961_v25, %v1961_v25  ;;  %1889 = vst [vmem:[%s2482_s2 + $0xe0] sm:$0xff] %v1845_v57   ;;  %v2371_v10 = vpop.f32.mrb[29].mxu1 }
 0x117   :  { %v1320_v30 = vadd.f32 %v1319_v28, %v635_v29  ;;  %v1390_v31 = vmul.f32 %v635_v29, %v635_v29  ;;  %v1452_v33 = vadd.f32 %v1451_v24, %v1389_v23  ;;  %v1962_v34 = vpop.f32.mrb[30].mxu0  ;;  %v2373_v13 = vpop.f32.mrb[30].mxu1  ;;  %v1398_v28 = vmul.f32 %v2221_v26, %v2221_v26 }
 0x118   :  { %v1780_v35 = vpack.c.bf16 %v1962_v34, %v1961_v25  ;;  %v638_v36 = vpop.f32.mrb[31].mxu0  ;;  %v1393_v58 = vmul.f32 %v1962_v34, %v1962_v34  ;;  %v2380_v22 = vpop.f32.mrb[31].mxu1 }
 0x119   :  { %v1453_v39 = vadd.f32 %v1452_v33, %v1390_v31  ;;  %v1775_v40 = vpack.c.bf16 %v638_v36, %v635_v29  ;;  %v1321_v41 = vadd.f32 %v1320_v30, %v638_v36  ;;  %v1391_v44 = vmul.f32 %v638_v36, %v638_v36 }
 0x11a   :  { %1876 = vst [vmem:[%s2482_s2 + $0x78] sm:$0xff] %v1780_v35   ;;  %v1855_v23 = vpack.c.bf16 %v2380_v22, %v2371_v10  ;;  %v1400_v33 = vmul.f32 %v2219_v21, %v2219_v21  ;;  %v1401_v36 = vmul.f32 %v2226_v27, %v2226_v27 }
 0x11b   :  { %1875 = vst [vmem:[%s2482_s2 + $0x70] sm:$0xff] %v1775_v40   ;;  %v1322_v52 = vadd.f32 %v1961_v25, %v1321_v41  ;;  %v1454_v53 = vadd.f32 %v1453_v39, %v1391_v44 }
 0x11c   :  { %1891 = vst [vmem:[%s2482_s2 + $0xf0] sm:$0xff] %v1855_v23  }
 0x11d   :  { %v1455_v59 = vadd.f32 %v1454_v53, %v1392_v48  ;;  %v1323_v60 = vadd.f32 %v1962_v34, %v1322_v52  ;;  %v1403_v52 = vmul.f32 %v2257_v56, %v2257_v56 }
 0x11f   :  { %v1324_v63 = vadd.f32 %v1323_v60, %v2197_v2  ;;  %v1456_v0 = vadd.f32 %v1455_v59, %v1393_v58  ;;  %v1860_v2 = vpack.c.bf16 %v2373_v13, %v2366_v1 }
 0x121   :  { %v1457_v5 = vadd.f32 %v1456_v0, %v1394_v62  ;;  %v1325_v6 = vadd.f32 %v1324_v63, %v2209_v8  ;;  %v1397_v8 = vmul.f32 %v2202_v3, %v2202_v3  ;;  %1892 = vst [vmem:[%s2482_s2 + $0xf8] sm:$0xff] %v1860_v2   ;;  %v1407_v63 = vmul.f32 %v2281_v20, %v2281_v20 }
 0x122   :  { %v1411_v2 = vmul.f32 %v2305_v49, %v2305_v49 }
 0x123   :  { %v1326_v17 = vadd.f32 %v2195_v61, %v1325_v6  ;;  %v1458_v18 = vadd.f32 %v1457_v5, %v1395_v7 }
 0x125   :  { %v1459_v24 = vadd.f32 %v1458_v18, %v1396_v16  ;;  %v1327_v25 = vadd.f32 %v2202_v3, %v1326_v17  ;;  %v1399_v3 = vmul.f32 %v2233_v32, %v2233_v32 }
 0x127   :  { %v1328_v61 = vadd.f32 %v1327_v25, %v2221_v26  ;;  %v1460_v29 = vadd.f32 %v1459_v24, %v1397_v8  ;;  %v1402_v26 = vmul.f32 %v2245_v50, %v2245_v50 }
 0x129   :  { %v1461_v30 = vadd.f32 %v1460_v29, %v1398_v28  ;;  %v1329_v31 = vadd.f32 %v1328_v61, %v2233_v32 }
 0x12b   :  { %v1330_v34 = vadd.f32 %v2219_v21, %v1329_v31  ;;  %v1462_v35 = vadd.f32 %v1461_v30, %v1399_v3  ;;  %v1404_v21 = vmul.f32 %v2243_v45, %v2243_v45  ;;  %v1415_v30 = vmul.f32 %v2329_v19, %v2329_v19 }
 0x12d   :  { %v1463_v39 = vadd.f32 %v1462_v35, %v1400_v33  ;;  %v1331_v40 = vadd.f32 %v2226_v27, %v1330_v34  ;;  %v1405_v27 = vmul.f32 %v2250_v51, %v2250_v51 }
 0x12f   :  { %v1332_v41 = vadd.f32 %v1331_v40, %v2245_v50  ;;  %v1464_v44 = vadd.f32 %v1463_v39, %v1401_v36  ;;  %v1406_v50 = vmul.f32 %v2269_v14, %v2269_v14  ;;  %v1419_v40 = vmul.f32 %v2353_v55, %v2353_v55 }
 0x131   :  { %v1465_v48 = vadd.f32 %v1464_v44, %v1402_v26  ;;  %v1333_v32 = vadd.f32 %v1332_v41, %v2257_v56 }
 0x133   :  { %v1334_v53 = vadd.f32 %v2243_v45, %v1333_v32  ;;  %v1466_v54 = vadd.f32 %v1465_v48, %v1403_v52  ;;  %v1408_v45 = vmul.f32 %v2267_v9, %v2267_v9 }
 0x135   :  { %v1467_v57 = vadd.f32 %v1466_v54, %v1404_v21  ;;  %v1335_v58 = vadd.f32 %v2250_v51, %v1334_v53  ;;  %v1409_v51 = vmul.f32 %v2274_v15, %v2274_v15  ;;  %v1423_v53 = vmul.f32 %v2380_v22, %v2380_v22 }
 0x137   :  { %v1336_v59 = vadd.f32 %v1335_v58, %v2269_v14  ;;  %v1468_v60 = vadd.f32 %v1467_v57, %v1405_v27  ;;  %v1410_v14 = vmul.f32 %v2293_v42, %v2293_v42 }
 0x139   :  { %v1469_v62 = vadd.f32 %v1468_v60, %v1406_v50  ;;  %v1337_v56 = vadd.f32 %v1336_v59, %v2281_v20 }
 0x13b   :  { %v1338_v0 = vadd.f32 %v2267_v9, %v1337_v56  ;;  %v1470_v5 = vadd.f32 %v1469_v62, %v1407_v63  ;;  %v1412_v9 = vmul.f32 %v2291_v37, %v2291_v37 }
 0x13d   :  { %v1471_v6 = vadd.f32 %v1470_v5, %v1408_v45  ;;  %v1339_v7 = vadd.f32 %v2274_v15, %v1338_v0  ;;  %v1413_v15 = vmul.f32 %v2298_v43, %v2298_v43 }
 0x13f   :  { %v1340_v16 = vadd.f32 %v1339_v7, %v2293_v42  ;;  %v1472_v17 = vadd.f32 %v1471_v6, %v1409_v51  ;;  %v1414_v42 = vmul.f32 %v2317_v11, %v2317_v11 }
 0x141   :  { %v1473_v18 = vadd.f32 %v1472_v17, %v1410_v14  ;;  %v1341_v20 = vadd.f32 %v1340_v16, %v2305_v49 }
 0x143   :  { %v1342_v23 = vadd.f32 %v2291_v37, %v1341_v20  ;;  %v1474_v8 = vadd.f32 %v1473_v18, %v1411_v2  ;;  %v1416_v37 = vmul.f32 %v2315_v4, %v2315_v4 }
 0x145   :  { %v1475_v24 = vadd.f32 %v1474_v8, %v1412_v9  ;;  %v1343_v25 = vadd.f32 %v2298_v43, %v1342_v23  ;;  %v1417_v43 = vmul.f32 %v2322_v12, %v2322_v12 }
 0x147   :  { %v1344_v28 = vadd.f32 %v1343_v25, %v2317_v11  ;;  %v1476_v61 = vadd.f32 %v1475_v24, %v1413_v15  ;;  %v1418_v11 = vmul.f32 %v2341_v46, %v2341_v46 }
 0x149   :  { %v1477_v29 = vadd.f32 %v1476_v61, %v1414_v42  ;;  %v1345_v49 = vadd.f32 %v1344_v28, %v2329_v19 }
 0x14b   :  { %v1346_v31 = vadd.f32 %v2315_v4, %v1345_v49  ;;  %v1478_v3 = vadd.f32 %v1477_v29, %v1415_v30  ;;  %v1420_v4 = vmul.f32 %v2339_v38, %v2339_v38 }
 0x14d   :  { %v1479_v33 = vadd.f32 %v1478_v3, %v1416_v37  ;;  %v1347_v34 = vadd.f32 %v2322_v12, %v1346_v31  ;;  %v1421_v12 = vmul.f32 %v2346_v47, %v2346_v47 }
 0x14f   :  { %v1348_v35 = vadd.f32 %v1347_v34, %v2341_v46  ;;  %v1480_v36 = vadd.f32 %v1479_v33, %v1417_v43  ;;  %v1422_v46 = vmul.f32 %v2371_v10, %v2371_v10 }
 0x151   :  { %v1481_v39 = vadd.f32 %v1480_v36, %v1418_v11  ;;  %v1349_v19 = vadd.f32 %v1348_v35, %v2353_v55 }
 0x153   :  { %v1350_v26 = vadd.f32 %v2339_v38, %v1349_v19  ;;  %v1482_v41 = vadd.f32 %v1481_v39, %v1419_v40  ;;  %v1424_v38 = vmul.f32 %v2366_v1, %v2366_v1 }
 0x155   :  { %v1483_v44 = vadd.f32 %v1482_v41, %v1420_v4  ;;  %v1351_v48 = vadd.f32 %v2346_v47, %v1350_v26  ;;  %v1425_v47 = vmul.f32 %v2373_v13, %v2373_v13 }
 0x157   :  { %v1352_v32 = vadd.f32 %v1351_v48, %v2371_v10  ;;  %v1484_v52 = vadd.f32 %v1483_v44, %v1421_v12 }
 0x159   :  { %v1485_v21 = vadd.f32 %v1484_v52, %v1422_v46  ;;  %v1353_v55 = vadd.f32 %v1352_v32, %v2380_v22 }
 0x15b   :  { %v1354_v54 = vadd.f32 %v2366_v1, %v1353_v55  ;;  %v1486_v27 = vadd.f32 %v1485_v21, %v1423_v53 }
 0x15d   :  { %v1355_v57 = vadd.f32 %v2373_v13, %v1354_v54  ;;  %v1487_v58 = vadd.f32 %v1486_v27, %v1424_v38 }
 0x15f   :  { %v1356_v10 = vrot.slane %v1355_v57, 4  ;;  %v1488_v50 = vadd.f32 %v1487_v58, %v1425_v47 }
 0x161   :  { %v1357_v59 = vadd.f32 %v1356_v10, %v1355_v57  ;;  %v1489_v60 = vrot.slane %v1488_v50, 4 }
 0x163   :  { %v1358_v62 = vrot.slane %v1357_v59, 2  ;;  %v1490_v56 = vadd.f32 %v1489_v60, %v1488_v50 }
 0x165   :  { %v1359_v63 = vadd.f32 %v1358_v62, %v1357_v59  ;;  %v1491_v22 = vrot.slane %v1490_v56, 2 }
 0x167   :  { %v1360_v45 = vrot.slane %v1359_v63, 1  ;;  %v1492_v0 = vadd.f32 %v1491_v22, %v1490_v56 }
 0x169   :  { %v1493_v5 = vrot.slane %v1492_v0, 1  ;;  %v1361_v1 = vadd.f32 %v1360_v45, %v1359_v63 }
 0x16b   :  { %v1494_v51 = vadd.f32 %v1493_v5, %v1492_v0 }
 0x16d   :  { %v1496_v6 = vsel %vm1495_vm3, %v1361_v1, %v1494_v51 }
 0x16e   :  { %v1498_v7 = vsel %vm1497_vm4, %v1496_v6, 0.0 }
 0x16f   :  { %1499 = vst [vmem:[%s2483_s3] sm:$0xff] %v1498_v7 }

// kernel: _lambda_.16
= control target key start
LH: loop header
LB: loop body
LE: loop exit
PB: predicated region body
PF: predicated region fallthrough
CT: control target
= control target key end

     0   :  { %vm142_vm0 = vcmask 588800   ;;  %vm167_vm1 = vcmask 1043456   ;;  %vm457_vm2 = vcmask 1040384   ;;  %vm459_vm3 = vcmask 1041408   ;;  %s728_s1 = inlined_call_operand.vmem [shape: bf16[72,128], index: 1, kind: input, shape index: {}]   ;;  %s729_s0 = inlined_call_operand.vmem [shape: bf16[128,72], index: 0, kind: input, shape index: {}]   ;;  %s730_s2 = inlined_call_operand.vmem [shape: bf16[128,128], index: 2, kind: output, shape index: {0}]   ;;  %s731_s3 = inlined_call_operand.vmem [shape: f32[8,128], index: 3, kind: output, shape index: {1}]  }
   0x1   :  { %v621_v0 = vld [vmem:[%s728_s1] sm:$0xff]   ;;  %v622_v1 = vld [vmem:[%s728_s1 + $0x8] sm:$0xff]   ;;  %v623_v2 = vld [vmem:[%s728_s1 + $0x10] sm:$0xff]  }
   0x2   :  { %583 = vmatprep.subr.bf16.mxu0 %v621_v0  ;;  %609 = vmatprep.subr.bf16.mxu1 %v621_v0  ;;  %v626_v3 = vld [vmem:[%s729_s0] sm:$0xff]   ;;  %v624_v4 = vld [vmem:[%s728_s1 + $0x18] sm:$0xff]   ;;  %v627_v8 = vld [vmem:[%s729_s0 + $0x8] sm:$0xff]  }
   0x3   :  { %584 = vmatpush3.bf16.msra.mxu0 %v621_v0  ;;  %614 = vmatpush3.bf16.msra.mxu1 %v621_v0  ;;  %v630_v5 = vld [vmem:[%s729_s0 + $0x20] sm:$0xff]   ;;  %v631_v9 = vld [vmem:[%s729_s0 + $0x28] sm:$0xff]   ;;  %v628_v10 = vld [vmem:[%s729_s0 + $0x10] sm:$0xff]  }
   0x4   :  { %585 = vmatprep.subr.bf16.mxu0 %v622_v1  ;;  %610 = vmatprep.subr.bf16.mxu1 %v622_v1  ;;  %v625_v6 = vld [vmem:[%s728_s1 + $0x20] ss:$0 sps:$4 sm:$0xff]   ;;  %v632_v11 = vld [vmem:[%s729_s0 + $0x30] sm:$0xff]   ;;  %v629_v12 = vld [vmem:[%s729_s0 + $0x18] sm:$0xff]  }
   0x5   :  { %593 = vmatprep.mubr.msk.bf16.mxu0 %vm142_vm0, %v626_v3  ;;  %601 = vmatprep.mubr.msk.bf16.mxu1 %vm142_vm0, %v630_v5  ;;  %v169_v7 = vsel %vm167_vm1, %v625_v6, 0  ;;  %v633_v13 = vld [vmem:[%s729_s0 + $0x38] sm:$0xff]  }
   0x7   :  { %586 = vmatpush3.bf16.msra.mxu0 %v622_v1  ;;  %615 = vmatpush3.bf16.msra.mxu1 %v622_v1 }
   0x8   :  { %587 = vmatprep.subr.bf16.mxu0 %v623_v2  ;;  %611 = vmatprep.subr.bf16.mxu1 %v623_v2 }
   0xb   :  { %588 = vmatpush3.bf16.msra.mxu0 %v623_v2  ;;  %616 = vmatpush3.bf16.msra.mxu1 %v623_v2 }
   0xc   :  { %589 = vmatprep.subr.bf16.mxu0 %v624_v4  ;;  %612 = vmatprep.subr.bf16.mxu1 %v624_v4 }
   0xf   :  { %590 = vmatpush3.bf16.msra.mxu0 %v624_v4  ;;  %617 = vmatpush3.bf16.msra.mxu1 %v624_v4 }
  0x10   :  { %619 = vmatprep.subr.msk.bf16.mxu0 %vm167_vm1, %v625_v6  ;;  %620 = vmatprep.subr.msk.bf16.mxu1 %vm167_vm1, %v625_v6 }
  0x13   :  { %592 = vmatpush3.bf16.msra.mxu0 %v169_v7  ;;  %618 = vmatpush3.bf16.msra.mxu1 %v169_v7 }
  0x16   :  { %594 = vmatmul.mubr.msk.bf16.vlgmr.msra.gmra.mrb[0].mxu0 %vm142_vm0, %v627_v8  ;;  %602 = vmatmul.mubr.msk.bf16.vlgmr.msra.gmra.mrb[0].mxu1 %vm142_vm0, %v631_v9 }
  0x17   :  { %597 = vmatprep.mubr.msk.bf16.mxu0 %vm142_vm0, %v628_v10  ;;  %605 = vmatprep.mubr.msk.bf16.mxu1 %vm142_vm0, %v632_v11 }
  0x1e   :  { %598 = vmatmul.mubr.msk.bf16.gmra.mrb[4].mxu0 %vm142_vm0, %v629_v12  ;;  %606 = vmatmul.mubr.msk.bf16.gmra.mrb[4].mxu1 %vm142_vm0, %v633_v13 }
  0xe9   :  { %v595_v14 = vpop.f32.mrb[0].mxu0  ;;  %v603_v15 = vpop.f32.mrb[0].mxu1 }
  0xea   :  { %v205_v16 = vpop.f32.mrb[1].mxu0  ;;  %v237_v17 = vpop.f32.mrb[1].mxu1  ;;  %v422_v29 = vmul.f32 %v595_v14, %v595_v14  ;;  %v430_v1 = vmul.f32 %v603_v15, %v603_v15 }
  0xeb   :  { %v596_v18 = vpop.f32.mrb[2].mxu0  ;;  %v604_v19 = vpop.f32.mrb[2].mxu1  ;;  %v420_v20 = vmul.f32 %v205_v16, %v205_v16  ;;  %v428_v59 = vmul.f32 %v237_v17, %v237_v17 }
  0xec   :  { %v531_v21 = vpack.c.bf16 %v596_v18, %v595_v14  ;;  %v208_v22 = vpop.f32.mrb[3].mxu0  ;;  %v551_v23 = vpack.c.bf16 %v604_v19, %v603_v15  ;;  %v240_v24 = vpop.f32.mrb[3].mxu1  ;;  %v423_v32 = vmul.f32 %v596_v18, %v596_v18  ;;  %v431_v4 = vmul.f32 %v604_v19, %v604_v19 }
  0xed   :  { %v526_v25 = vpack.c.bf16 %v208_v22, %v205_v16  ;;  %v399_v26 = vadd.f32 %v208_v22, %v205_v16  ;;  %v421_v27 = vmul.f32 %v208_v22, %v208_v22  ;;  %v546_v28 = vpack.c.bf16 %v240_v24, %v237_v17 }
  0xee   :  { %563 = vst [vmem:[%s730_s2 + $0x8] sm:$0xff] %v531_v21   ;;  %567 = vst [vmem:[%s730_s2 + $0x28] sm:$0xff] %v551_v23   ;;  %v429_v0 = vmul.f32 %v240_v24, %v240_v24 }
  0xef   :  { %527 = vst [vmem:[%s730_s2] sm:$0xff] %v526_v25   ;;  %v400_v30 = vadd.f32 %v595_v14, %v399_v26  ;;  %v436_v31 = vadd.f32 %v421_v27, %v420_v20  ;;  %566 = vst [vmem:[%s730_s2 + $0x20] sm:$0xff] %v546_v28  }
  0xf1   :  { %v437_v33 = vadd.f32 %v436_v31, %v422_v29  ;;  %v599_v34 = vpop.f32.mrb[4].mxu0  ;;  %v401_v35 = vadd.f32 %v596_v18, %v400_v30  ;;  %v607_v36 = vpop.f32.mrb[4].mxu1 }
  0xf2   :  { %v221_v37 = vpop.f32.mrb[5].mxu0  ;;  %v253_v38 = vpop.f32.mrb[5].mxu1  ;;  %v426_v53 = vmul.f32 %v599_v34, %v599_v34  ;;  %v434_v13 = vmul.f32 %v607_v36, %v607_v36 }
  0xf3   :  { %v402_v39 = vadd.f32 %v401_v35, %v221_v37  ;;  %v424_v40 = vmul.f32 %v221_v37, %v221_v37  ;;  %v438_v41 = vadd.f32 %v437_v33, %v423_v32  ;;  %v600_v42 = vpop.f32.mrb[6].mxu0  ;;  %v608_v43 = vpop.f32.mrb[6].mxu1  ;;  %v432_v7 = vmul.f32 %v253_v38, %v253_v38 }
  0xf4   :  { %v541_v44 = vpack.c.bf16 %v600_v42, %v599_v34  ;;  %v224_v45 = vpop.f32.mrb[7].mxu0  ;;  %v561_v46 = vpack.c.bf16 %v608_v43, %v607_v36  ;;  %v256_v47 = vpop.f32.mrb[7].mxu1  ;;  %v427_v56 = vmul.f32 %v600_v42, %v600_v42 }
  0xf5   :  { %v439_v48 = vadd.f32 %v438_v41, %v424_v40  ;;  %v536_v49 = vpack.c.bf16 %v224_v45, %v221_v37  ;;  %v403_v50 = vadd.f32 %v402_v39, %v224_v45  ;;  %v425_v51 = vmul.f32 %v224_v45, %v224_v45 }
  0xf6   :  { %565 = vst [vmem:[%s730_s2 + $0x18] sm:$0xff] %v541_v44   ;;  %569 = vst [vmem:[%s730_s2 + $0x38] sm:$0xff] %v561_v46   ;;  %v556_v52 = vpack.c.bf16 %v256_v47, %v253_v38  ;;  %v433_v12 = vmul.f32 %v256_v47, %v256_v47 }
  0xf7   :  { %564 = vst [vmem:[%s730_s2 + $0x10] sm:$0xff] %v536_v49   ;;  %v404_v54 = vadd.f32 %v599_v34, %v403_v50  ;;  %v440_v55 = vadd.f32 %v439_v48, %v425_v51 }
  0xf8   :  { %568 = vst [vmem:[%s730_s2 + $0x30] sm:$0xff] %v556_v52  }
  0xf9   :  { %v441_v57 = vadd.f32 %v440_v55, %v426_v53  ;;  %v405_v58 = vadd.f32 %v600_v42, %v404_v54 }
  0xfb   :  { %v406_v60 = vadd.f32 %v405_v58, %v237_v17  ;;  %v442_v61 = vadd.f32 %v441_v57, %v427_v56  ;;  %v435_v17 = vmul.f32 %v608_v43, %v608_v43 }
  0xfd   :  { %v443_v62 = vadd.f32 %v442_v61, %v428_v59  ;;  %v407_v63 = vadd.f32 %v406_v60, %v240_v24 }
  0xff   :  { %v408_v2 = vadd.f32 %v603_v15, %v407_v63  ;;  %v444_v3 = vadd.f32 %v443_v62, %v429_v0 }
 0x101   :  { %v445_v5 = vadd.f32 %v444_v3, %v430_v1  ;;  %v409_v6 = vadd.f32 %v604_v19, %v408_v2 }
 0x103   :  { %v410_v8 = vadd.f32 %v409_v6, %v253_v38  ;;  %v446_v9 = vadd.f32 %v445_v5, %v431_v4 }
 0x105   :  { %v447_v10 = vadd.f32 %v446_v9, %v432_v7  ;;  %v411_v11 = vadd.f32 %v410_v8, %v256_v47 }
 0x107   :  { %v412_v14 = vadd.f32 %v607_v36, %v411_v11  ;;  %v448_v16 = vadd.f32 %v447_v10, %v433_v12 }
 0x109   :  { %v413_v18 = vadd.f32 %v608_v43, %v412_v14  ;;  %v449_v20 = vadd.f32 %v448_v16, %v434_v13 }
 0x10b   :  { %v414_v21 = vrot.slane %v413_v18, 4  ;;  %v450_v22 = vadd.f32 %v449_v20, %v435_v17 }
 0x10d   :  { %v415_v23 = vadd.f32 %v414_v21, %v413_v18  ;;  %v451_v15 = vrot.slane %v450_v22, 4 }
 0x10f   :  { %v416_v24 = vrot.slane %v415_v23, 2  ;;  %v452_v25 = vadd.f32 %v451_v15, %v450_v22 }
 0x111   :  { %v417_v26 = vadd.f32 %v416_v24, %v415_v23  ;;  %v453_v19 = vrot.slane %v452_v25, 2 }
 0x113   :  { %v418_v27 = vrot.slane %v417_v26, 1  ;;  %v454_v28 = vadd.f32 %v453_v19, %v452_v25 }
 0x115   :  { %v455_v29 = vrot.slane %v454_v28, 1  ;;  %v419_v30 = vadd.f32 %v418_v27, %v417_v26 }
 0x117   :  { %v456_v31 = vadd.f32 %v455_v29, %v454_v28 }
 0x119   :  { %v458_v32 = vsel %vm457_vm2, %v419_v30, %v456_v31 }
 0x11a   :  { %v460_v33 = vsel %vm459_vm3, %v458_v32, 0.0 }
 0x11b   :  { %461 = vst [vmem:[%s731_s3] sm:$0xff] %v460_v33 }

// kernel: _lambda_.17
= control target key start
LH: loop header
LB: loop body
LE: loop exit
PB: predicated region body
PF: predicated region fallthrough
CT: control target
= control target key end

     0   :  { %s455_s0 = inlined_call_operand.vmem [shape: bf16[128,128], index: 0, kind: input, shape index: {}]   ;;  %s456_s1 = inlined_call_operand.vmem [shape: f32[1,128], index: 1, kind: input, shape index: {}]   ;;  %s457_s2 = inlined_call_operand.vmem [shape: f32[1,128], index: 2, kind: input, shape index: {}]   ;;  %s458_s3 = inlined_call_operand.vmem [shape: bf16[128,128], index: 3, kind: output, shape index: {}]  }
   0x1   :  { %v259_v0 = vld [vmem:[%s455_s0] sm:$0xff]   ;;  %v330_v4 = vld [vmem:[%s455_s0 + $0x8] sm:$0xff]   ;;  %v331_v5 = vld [vmem:[%s455_s0 + $0x10] sm:$0xff]  }
   0x2   :  { %v370_v1 = vld [vmem:[%s456_s1] ss:$0 sm:$0xff]  ;;  %v260_v2 = vunpack.c.l.bf16 %v259_v0  ;;  %v261_v3 = vunpack.c.h.bf16 %v259_v0  ;;  %v332_v6 = vld [vmem:[%s455_s0 + $0x18] sm:$0xff]   ;;  %v264_v8 = vunpack.c.l.bf16 %v330_v4  ;;  %v265_v9 = vunpack.c.h.bf16 %v330_v4  ;;  %v334_v35 = vld [vmem:[%s455_s0 + $0x28] sm:$0xff]  }
   0x3   :  { %v384_v7 = vld [vmem:[%s457_s2] ss:$0 sm:$0xff]  ;;  %v268_v10 = vunpack.c.l.bf16 %v331_v5  ;;  %v269_v11 = vunpack.c.h.bf16 %v331_v5  ;;  %v272_v14 = vunpack.c.l.bf16 %v332_v6  ;;  %v273_v15 = vunpack.c.h.bf16 %v332_v6  ;;  %v335_v48 = vld [vmem:[%s455_s0 + $0x30] sm:$0xff]   ;;  %v336_v4 = vld [vmem:[%s455_s0 + $0x38] sm:$0xff]  }
   0x4   :  { %v53_v12 = vmul.f32 %v260_v2, %v370_v1  ;;  %v54_v13 = vmul.f32 %v261_v3, %v370_v1  ;;  %v55_v16 = vmul.f32 %v264_v8, %v370_v1  ;;  %v56_v17 = vmul.f32 %v265_v9, %v370_v1  ;;  %v333_v34 = vld [vmem:[%s455_s0 + $0x20] sm:$0xff]  }
   0x5   :  { %v57_v18 = vmul.f32 %v268_v10, %v370_v1  ;;  %v58_v19 = vmul.f32 %v269_v11, %v370_v1  ;;  %v59_v22 = vmul.f32 %v272_v14, %v370_v1  ;;  %v60_v23 = vmul.f32 %v273_v15, %v370_v1 }
   0x6   :  { %v76_v20 = vadd.f32 %v384_v7, %v53_v12  ;;  %v77_v21 = vadd.f32 %v384_v7, %v54_v13  ;;  %v78_v24 = vadd.f32 %v384_v7, %v55_v16  ;;  %v79_v25 = vadd.f32 %v384_v7, %v56_v17 }
   0x7   :  { %v80_v26 = vadd.f32 %v384_v7, %v57_v18  ;;  %v81_v27 = vadd.f32 %v384_v7, %v58_v19  ;;  %v82_v42 = vadd.f32 %v384_v7, %v59_v22  ;;  %v83_v43 = vadd.f32 %v384_v7, %v60_v23 }
   0x8   :  { %vm92_vm0 = vcmp.gt.f32.partialorder %v76_v20, 0.0  ;;  %vm93_vm1 = vcmp.gt.f32.partialorder %v77_v21, 0.0  ;;  %v108_v28 = vmul.f32 0.1, %v76_v20  ;;  %v109_v29 = vmul.f32 0.1, %v77_v21 }
   0x9   :  { %vm94_vm2 = vcmp.gt.f32.partialorder %v78_v24, 0.0  ;;  %vm95_vm3 = vcmp.gt.f32.partialorder %v79_v25, 0.0  ;;  %v110_v30 = vmul.f32 0.1, %v78_v24  ;;  %v111_v31 = vmul.f32 0.1, %v79_v25 }
   0xa   :  { %v124_v32 = vsel %vm92_vm0, %v76_v20, %v108_v28  ;;  %v125_v33 = vsel %vm93_vm1, %v77_v21, %v109_v29  ;;  %vm96_vm4 = vcmp.gt.f32.partialorder %v80_v26, 0.0  ;;  %vm97_vm5 = vcmp.gt.f32.partialorder %v81_v27, 0.0 }
   0xb   :  { %v293_v36 = vpack.c.bf16 %v125_v33, %v124_v32  ;;  %v126_v37 = vsel %vm94_vm2, %v78_v24, %v110_v30  ;;  %v127_v38 = vsel %vm95_vm3, %v79_v25, %v111_v31  ;;  %v112_v39 = vmul.f32 0.1, %v80_v26 }
   0xc   :  { %v298_v40 = vpack.c.bf16 %v127_v38, %v126_v37  ;;  %v113_v41 = vmul.f32 0.1, %v81_v27  ;;  %v276_v45 = vunpack.c.l.bf16 %v333_v34  ;;  %v277_v46 = vunpack.c.h.bf16 %v333_v34 }
   0xd   :  { %294 = vst [vmem:[%s458_s3] sm:$0xff] %v293_v36   ;;  %v128_v44 = vsel %vm96_vm4, %v80_v26, %v112_v39  ;;  %v280_v47 = vunpack.c.l.bf16 %v334_v35  ;;  %vm98_vm6 = vcmp.gt.f32.partialorder %v82_v42, 0.0  ;;  %vm99_vm7 = vcmp.gt.f32.partialorder %v83_v43, 0.0 }
   0xe   :  { %337 = vst [vmem:[%s458_s3 + $0x8] sm:$0xff] %v298_v40   ;;  %v129_v49 = vsel %vm97_vm5, %v81_v27, %v113_v41  ;;  %v114_v50 = vmul.f32 0.1, %v82_v42  ;;  %v115_v52 = vmul.f32 0.1, %v83_v43  ;;  %v61_v53 = vmul.f32 %v276_v45, %v370_v1 }
   0xf   :  { %v303_v51 = vpack.c.bf16 %v129_v49, %v128_v44  ;;  %v62_v54 = vmul.f32 %v277_v46, %v370_v1  ;;  %v281_v56 = vunpack.c.h.bf16 %v334_v35  ;;  %v63_v57 = vmul.f32 %v280_v47, %v370_v1 }
  0x10   :  { %v130_v55 = vsel %vm98_vm6, %v82_v42, %v114_v50  ;;  %v284_v58 = vunpack.c.l.bf16 %v335_v48  ;;  %v131_v59 = vsel %vm99_vm7, %v83_v43, %v115_v52  ;;  %v84_v60 = vadd.f32 %v384_v7, %v61_v53 }
  0x11   :  { %338 = vst [vmem:[%s458_s3 + $0x10] sm:$0xff] %v303_v51   ;;  %v85_v61 = vadd.f32 %v384_v7, %v62_v54  ;;  %v285_v62 = vunpack.c.h.bf16 %v335_v48  ;;  %v308_v63 = vpack.c.bf16 %v131_v59, %v130_v55  ;;  %v64_v0 = vmul.f32 %v281_v56, %v370_v1 }
  0x12   :  { %v86_v2 = vadd.f32 %v384_v7, %v63_v57  ;;  %v65_v3 = vmul.f32 %v284_v58, %v370_v1  ;;  %vm100_vm8 = vcmp.gt.f32.partialorder %v84_v60, 0.0  ;;  %v116_v5 = vmul.f32 0.1, %v84_v60 }
  0x13   :  { %vm101_vm9 = vcmp.gt.f32.partialorder %v85_v61, 0.0  ;;  %v117_v6 = vmul.f32 0.1, %v85_v61  ;;  %339 = vst [vmem:[%s458_s3 + $0x18] sm:$0xff] %v308_v63   ;;  %v87_v8 = vadd.f32 %v384_v7, %v64_v0  ;;  %v66_v10 = vmul.f32 %v285_v62, %v370_v1 }
  0x14   :  { %vm102_vm10 = vcmp.gt.f32.partialorder %v86_v2, 0.0  ;;  %v118_v9 = vmul.f32 0.1, %v86_v2  ;;  %v132_v11 = vsel %vm100_vm8, %v84_v60, %v116_v5  ;;  %v88_v13 = vadd.f32 %v384_v7, %v65_v3 }
  0x15   :  { %v133_v12 = vsel %vm101_vm9, %v85_v61, %v117_v6  ;;  %v288_v14 = vunpack.c.l.bf16 %v336_v4  ;;  %vm103_vm11 = vcmp.gt.f32.partialorder %v87_v8, 0.0  ;;  %v119_v16 = vmul.f32 0.1, %v87_v8 }
  0x16   :  { %v313_v15 = vpack.c.bf16 %v133_v12, %v132_v11  ;;  %v134_v17 = vsel %vm102_vm10, %v86_v2, %v118_v9  ;;  %v89_v18 = vadd.f32 %v384_v7, %v66_v10  ;;  %vm104_vm12 = vcmp.gt.f32.partialorder %v88_v13, 0.0 }
  0x17   :  { %v120_v19 = vmul.f32 0.1, %v88_v13  ;;  %v289_v20 = vunpack.c.h.bf16 %v336_v4  ;;  %v135_v21 = vsel %vm103_vm11, %v87_v8, %v119_v16  ;;  %v67_v22 = vmul.f32 %v288_v14, %v370_v1 }
  0x18   :  { %340 = vst [vmem:[%s458_s3 + $0x20] sm:$0xff] %v313_v15   ;;  %v318_v23 = vpack.c.bf16 %v135_v21, %v134_v17  ;;  %vm105_vm13 = vcmp.gt.f32.partialorder %v89_v18, 0.0  ;;  %v121_v24 = vmul.f32 0.1, %v89_v18 }
  0x19   :  { %v136_v25 = vsel %vm104_vm12, %v88_v13, %v120_v19  ;;  %v68_v26 = vmul.f32 %v289_v20, %v370_v1  ;;  %v90_v27 = vadd.f32 %v384_v7, %v67_v22 }
  0x1a   :  { %341 = vst [vmem:[%s458_s3 + $0x28] sm:$0xff] %v318_v23   ;;  %v137_v28 = vsel %vm105_vm13, %v89_v18, %v121_v24 }
  0x1b   :  { %v323_v29 = vpack.c.bf16 %v137_v28, %v136_v25  ;;  %v91_v30 = vadd.f32 %v384_v7, %v68_v26  ;;  %vm106_vm14 = vcmp.gt.f32.partialorder %v90_v27, 0.0  ;;  %v122_v31 = vmul.f32 0.1, %v90_v27 }
  0x1d   :  { %342 = vst [vmem:[%s458_s3 + $0x30] sm:$0xff] %v323_v29   ;;  %vm107_vm15 = vcmp.gt.f32.partialorder %v91_v30, 0.0  ;;  %v123_v32 = vmul.f32 0.1, %v91_v30  ;;  %v138_v33 = vsel %vm106_vm14, %v90_v27, %v122_v31 }
  0x1f   :  { %v139_v1 = vsel %vm107_vm15, %v91_v30, %v123_v32 }
  0x20   :  { %v328_v34 = vpack.c.bf16 %v139_v1, %v138_v33 }
  0x22   :  { %343 = vst [vmem:[%s458_s3 + $0x38] sm:$0xff] %v328_v34  }

// kernel: _lambda_.18
= control target key start
LH: loop header
LB: loop body
LE: loop exit
PB: predicated region body
PF: predicated region fallthrough
CT: control target
= control target key end

     0   :  { %vm114_vm0 = vcmask 130048   ;;  %vm425_vm1 = vcmask 1040384   ;;  %vm427_vm2 = vcmask 1041408   ;;  %s654_s1 = inlined_call_operand.vmem [shape: bf16[16,128], index: 1, kind: input, shape index: {}]   ;;  %s655_s0 = inlined_call_operand.vmem [shape: bf16[128,16], index: 0, kind: input, shape index: {}]   ;;  %s656_s2 = inlined_call_operand.vmem [shape: bf16[128,128], index: 2, kind: output, shape index: {0}]   ;;  %s657_s3 = inlined_call_operand.vmem [shape: f32[8,128], index: 3, kind: output, shape index: {1}]  }
   0x1   :  { %v563_v0 = vld [vmem:[%s654_s1] sm:$0xff]   ;;  %v565_v2 = vld [vmem:[%s655_s0 + $0x8] sm:$0xff]   ;;  %v566_v3 = vld [vmem:[%s655_s0 + $0x10] sm:$0xff]  }
   0x2   :  { %v564_v1 = vld [vmem:[%s655_s0] sm:$0xff]   ;;  %543 = vmatprep.subr.bf16.mxu0 %v563_v0  ;;  %561 = vmatprep.subr.bf16.mxu1 %v563_v0  ;;  %v569_v5 = vld [vmem:[%s655_s0 + $0x28] sm:$0xff]   ;;  %v570_v6 = vld [vmem:[%s655_s0 + $0x30] sm:$0xff]  }
   0x3   :  { %544 = vmatpush3.bf16.msra.mxu0 %v563_v0  ;;  %545 = vmatprep.mubr.msk.bf16.mxu0 %vm114_vm0, %v564_v1  ;;  %v568_v4 = vld [vmem:[%s655_s0 + $0x20] sm:$0xff]   ;;  %v567_v7 = vld [vmem:[%s655_s0 + $0x18] sm:$0xff]  }
   0x4   :  { %562 = vmatpush3.bf16.msra.mxu1 %v563_v0  ;;  %553 = vmatprep.mubr.msk.bf16.mxu1 %vm114_vm0, %v568_v4  ;;  %v571_v8 = vld [vmem:[%s655_s0 + $0x38] sm:$0xff]  }
   0x6   :  { %546 = vmatmul.mubr.msk.bf16.vlgmr.msra.gmra.mrb[0].mxu0 %vm114_vm0, %v565_v2 }
   0x7   :  { %549 = vmatprep.mubr.msk.bf16.mxu0 %vm114_vm0, %v566_v3  ;;  %554 = vmatmul.mubr.msk.bf16.vlgmr.msra.gmra.mrb[0].mxu1 %vm114_vm0, %v569_v5 }
   0x8   :  { %557 = vmatprep.mubr.msk.bf16.mxu1 %vm114_vm0, %v570_v6 }
   0xe   :  { %550 = vmatmul.mubr.msk.bf16.gmra.mrb[4].mxu0 %vm114_vm0, %v567_v7 }
   0xf   :  { %558 = vmatmul.mubr.msk.bf16.gmra.mrb[4].mxu1 %vm114_vm0, %v571_v8 }
  0xd9   :  { %v547_v9 = vpop.f32.mrb[0].mxu0 }
  0xda   :  { %v173_v10 = vpop.f32.mrb[1].mxu0  ;;  %v555_v12 = vpop.f32.mrb[0].mxu1  ;;  %v390_v23 = vmul.f32 %v547_v9, %v547_v9 }
  0xdb   :  { %v548_v11 = vpop.f32.mrb[2].mxu0  ;;  %v205_v15 = vpop.f32.mrb[1].mxu1  ;;  %v388_v16 = vmul.f32 %v173_v10, %v173_v10  ;;  %v398_v60 = vmul.f32 %v555_v12, %v555_v12 }
  0xdc   :  { %v495_v13 = vpack.c.bf16 %v548_v11, %v547_v9  ;;  %v176_v14 = vpop.f32.mrb[3].mxu0  ;;  %v556_v20 = vpop.f32.mrb[2].mxu1  ;;  %v391_v27 = vmul.f32 %v548_v11, %v548_v11  ;;  %v396_v54 = vmul.f32 %v205_v15, %v205_v15 }
  0xdd   :  { %v490_v17 = vpack.c.bf16 %v176_v14, %v173_v10  ;;  %v367_v18 = vadd.f32 %v176_v14, %v173_v10  ;;  %v389_v19 = vmul.f32 %v176_v14, %v176_v14  ;;  %v515_v21 = vpack.c.bf16 %v556_v20, %v555_v12  ;;  %v208_v22 = vpop.f32.mrb[3].mxu1 }
  0xde   :  { %527 = vst [vmem:[%s656_s2 + $0x8] sm:$0xff] %v495_v13   ;;  %v510_v26 = vpack.c.bf16 %v208_v22, %v205_v15  ;;  %v397_v59 = vmul.f32 %v208_v22, %v208_v22  ;;  %v399_v63 = vmul.f32 %v556_v20, %v556_v20 }
  0xdf   :  { %491 = vst [vmem:[%s656_s2] sm:$0xff] %v490_v17   ;;  %v368_v24 = vadd.f32 %v547_v9, %v367_v18  ;;  %v404_v25 = vadd.f32 %v389_v19, %v388_v16  ;;  %531 = vst [vmem:[%s656_s2 + $0x28] sm:$0xff] %v515_v21  }
  0xe0   :  { %530 = vst [vmem:[%s656_s2 + $0x20] sm:$0xff] %v510_v26  }
  0xe1   :  { %v405_v28 = vadd.f32 %v404_v25, %v390_v23  ;;  %v551_v29 = vpop.f32.mrb[4].mxu0  ;;  %v369_v30 = vadd.f32 %v548_v11, %v368_v24 }
  0xe2   :  { %v189_v31 = vpop.f32.mrb[5].mxu0  ;;  %v559_v36 = vpop.f32.mrb[4].mxu1  ;;  %v394_v47 = vmul.f32 %v551_v29, %v551_v29 }
  0xe3   :  { %v370_v32 = vadd.f32 %v369_v30, %v189_v31  ;;  %v392_v33 = vmul.f32 %v189_v31, %v189_v31  ;;  %v406_v34 = vadd.f32 %v405_v28, %v391_v27  ;;  %v552_v35 = vpop.f32.mrb[6].mxu0  ;;  %v221_v39 = vpop.f32.mrb[5].mxu1  ;;  %v402_v8 = vmul.f32 %v559_v36, %v559_v36 }
  0xe4   :  { %v505_v37 = vpack.c.bf16 %v552_v35, %v551_v29  ;;  %v192_v38 = vpop.f32.mrb[7].mxu0  ;;  %v560_v44 = vpop.f32.mrb[6].mxu1  ;;  %v395_v51 = vmul.f32 %v552_v35, %v552_v35  ;;  %v400_v2 = vmul.f32 %v221_v39, %v221_v39 }
  0xe5   :  { %v407_v40 = vadd.f32 %v406_v34, %v392_v33  ;;  %v500_v41 = vpack.c.bf16 %v192_v38, %v189_v31  ;;  %v371_v42 = vadd.f32 %v370_v32, %v192_v38  ;;  %v393_v43 = vmul.f32 %v192_v38, %v192_v38  ;;  %v224_v46 = vpop.f32.mrb[7].mxu1 }
  0xe6   :  { %529 = vst [vmem:[%s656_s2 + $0x18] sm:$0xff] %v505_v37   ;;  %v525_v45 = vpack.c.bf16 %v560_v44, %v559_v36  ;;  %v520_v50 = vpack.c.bf16 %v224_v46, %v221_v39  ;;  %v401_v7 = vmul.f32 %v224_v46, %v224_v46  ;;  %v403_v11 = vmul.f32 %v560_v44, %v560_v44 }
  0xe7   :  { %528 = vst [vmem:[%s656_s2 + $0x10] sm:$0xff] %v500_v41   ;;  %v372_v48 = vadd.f32 %v551_v29, %v371_v42  ;;  %v408_v49 = vadd.f32 %v407_v40, %v393_v43 }
  0xe8   :  { %533 = vst [vmem:[%s656_s2 + $0x38] sm:$0xff] %v525_v45   ;;  %532 = vst [vmem:[%s656_s2 + $0x30] sm:$0xff] %v520_v50  }
  0xe9   :  { %v409_v52 = vadd.f32 %v408_v49, %v394_v47  ;;  %v373_v53 = vadd.f32 %v552_v35, %v372_v48 }
  0xeb   :  { %v374_v55 = vadd.f32 %v373_v53, %v205_v15  ;;  %v410_v56 = vadd.f32 %v409_v52, %v395_v51 }
  0xed   :  { %v411_v57 = vadd.f32 %v410_v56, %v396_v54  ;;  %v375_v58 = vadd.f32 %v374_v55, %v208_v22 }
  0xef   :  { %v376_v61 = vadd.f32 %v555_v12, %v375_v58  ;;  %v412_v62 = vadd.f32 %v411_v57, %v397_v59 }
  0xf1   :  { %v413_v0 = vadd.f32 %v412_v62, %v398_v60  ;;  %v377_v1 = vadd.f32 %v556_v20, %v376_v61 }
  0xf3   :  { %v378_v3 = vadd.f32 %v377_v1, %v221_v39  ;;  %v414_v4 = vadd.f32 %v413_v0, %v399_v63 }
  0xf5   :  { %v415_v5 = vadd.f32 %v414_v4, %v400_v2  ;;  %v379_v6 = vadd.f32 %v378_v3, %v224_v46 }
  0xf7   :  { %v380_v9 = vadd.f32 %v559_v36, %v379_v6  ;;  %v416_v10 = vadd.f32 %v415_v5, %v401_v7 }
  0xf9   :  { %v381_v13 = vadd.f32 %v560_v44, %v380_v9  ;;  %v417_v14 = vadd.f32 %v416_v10, %v402_v8 }
  0xfb   :  { %v382_v15 = vrot.slane %v381_v13, 4  ;;  %v418_v16 = vadd.f32 %v417_v14, %v403_v11 }
  0xfd   :  { %v383_v17 = vadd.f32 %v382_v15, %v381_v13  ;;  %v419_v12 = vrot.slane %v418_v16, 4 }
  0xff   :  { %v384_v18 = vrot.slane %v383_v17, 2  ;;  %v420_v19 = vadd.f32 %v419_v12, %v418_v16 }
 0x101   :  { %v385_v21 = vadd.f32 %v384_v18, %v383_v17  ;;  %v421_v20 = vrot.slane %v420_v19, 2 }
 0x103   :  { %v386_v22 = vrot.slane %v385_v21, 1  ;;  %v422_v23 = vadd.f32 %v421_v20, %v420_v19 }
 0x105   :  { %v423_v24 = vrot.slane %v422_v23, 1  ;;  %v387_v25 = vadd.f32 %v386_v22, %v385_v21 }
 0x107   :  { %v424_v26 = vadd.f32 %v423_v24, %v422_v23 }
 0x109   :  { %v426_v27 = vsel %vm425_vm1, %v387_v25, %v424_v26 }
 0x10a   :  { %v428_v28 = vsel %vm427_vm2, %v426_v27, 0.0 }
 0x10b   :  { %429 = vst [vmem:[%s657_s3] sm:$0xff] %v428_v28 }

// kernel: _lambda_.21
= control target key start
LH: loop header
LB: loop body
LE: loop exit
PB: predicated region body
PF: predicated region fallthrough
CT: control target
= control target key end

     0   :  { %s573_s0 = inlined_call_operand.vmem [shape: bf16[128,128], index: 0, kind: input, shape index: {}]   ;;  %s574_s1 = inlined_call_operand.vmem [shape: f32[1,128], index: 1, kind: input, shape index: {}]   ;;  %s575_s2 = inlined_call_operand.vmem [shape: f32[1,128], index: 2, kind: input, shape index: {}]   ;;  %s576_s3 = inlined_call_operand.vmem [shape: bf16[128,128], index: 3, kind: input, shape index: {}]   ;;  %s577_s4 = inlined_call_operand.vmem [shape: bf16[128,128], index: 4, kind: output, shape index: {}]  }
   0x1   :  { %v310_v0 = vld [vmem:[%s573_s0] sm:$0xff]   ;;  %v413_v5 = vld [vmem:[%s573_s0 + $0x8] sm:$0xff]   ;;  %v414_v12 = vld [vmem:[%s573_s0 + $0x10] sm:$0xff]  }
   0x2   :  { %v465_v1 = vld [vmem:[%s574_s1] ss:$0 sm:$0xff]  ;;  %v311_v2 = vunpack.c.l.bf16 %v310_v0  ;;  %v312_v3 = vunpack.c.h.bf16 %v310_v0  ;;  %v420_v6 = vld [vmem:[%s576_s3 + $0x8] sm:$0xff]   ;;  %v315_v10 = vunpack.c.l.bf16 %v413_v5  ;;  %v316_v11 = vunpack.c.h.bf16 %v413_v5  ;;  %v421_v13 = vld [vmem:[%s576_s3 + $0x10] sm:$0xff]  }
   0x3   :  { %v342_v4 = vld [vmem:[%s576_s3] sm:$0xff]   ;;  %v347_v16 = vunpack.c.l.bf16 %v420_v6  ;;  %v348_v17 = vunpack.c.h.bf16 %v420_v6  ;;  %v319_v20 = vunpack.c.l.bf16 %v414_v12  ;;  %v320_v21 = vunpack.c.h.bf16 %v414_v12  ;;  %v415_v38 = vld [vmem:[%s573_s0 + $0x18] sm:$0xff]   ;;  %v417_v60 = vld [vmem:[%s573_s0 + $0x28] sm:$0xff]  }
   0x4   :  { %v479_v7 = vld [vmem:[%s575_s2] ss:$0 sm:$0xff]  ;;  %v343_v8 = vunpack.c.l.bf16 %v342_v4  ;;  %v344_v9 = vunpack.c.h.bf16 %v342_v4  ;;  %v56_v14 = vmul.f32 %v311_v2, %v465_v1  ;;  %v57_v15 = vmul.f32 %v312_v3, %v465_v1  ;;  %v422_v43 = vld [vmem:[%s576_s3 + $0x18] sm:$0xff]  }
   0x5   :  { %v58_v18 = vmul.f32 %v315_v10, %v465_v1  ;;  %v59_v19 = vmul.f32 %v316_v11, %v465_v1  ;;  %v351_v24 = vunpack.c.l.bf16 %v421_v13  ;;  %v352_v25 = vunpack.c.h.bf16 %v421_v13  ;;  %v416_v46 = vld [vmem:[%s573_s0 + $0x20] sm:$0xff]  }
   0x6   :  { %v79_v22 = vadd.f32 %v479_v7, %v56_v14  ;;  %v80_v23 = vadd.f32 %v479_v7, %v57_v15  ;;  %v60_v28 = vmul.f32 %v319_v20, %v465_v1  ;;  %v61_v29 = vmul.f32 %v320_v21, %v465_v1  ;;  %v423_v55 = vld [vmem:[%s576_s3 + $0x20] sm:$0xff]   ;;  %v424_v20 = vld [vmem:[%s576_s3 + $0x28] sm:$0xff]  }
   0x7   :  { %v81_v26 = vadd.f32 %v479_v7, %v58_v18  ;;  %v82_v27 = vadd.f32 %v479_v7, %v59_v19  ;;  %v323_v50 = vunpack.c.l.bf16 %v415_v38  ;;  %v324_v52 = vunpack.c.h.bf16 %v415_v38 }
   0x8   :  { %vm95_vm0 = vcmp.gt.f32.partialorder %v79_v22, 0.0  ;;  %vm96_vm1 = vcmp.gt.f32.partialorder %v80_v23, 0.0  ;;  %v111_v30 = vmul.f32 0.1, %v79_v22  ;;  %v112_v31 = vmul.f32 0.1, %v80_v23 }
   0x9   :  { %vm97_vm2 = vcmp.gt.f32.partialorder %v81_v26, 0.0  ;;  %vm98_vm3 = vcmp.gt.f32.partialorder %v82_v27, 0.0  ;;  %v113_v32 = vmul.f32 0.1, %v81_v26  ;;  %v114_v33 = vmul.f32 0.1, %v82_v27 }
   0xa   :  { %v127_v34 = vsel %vm95_vm0, %v79_v22, %v111_v30  ;;  %v128_v35 = vsel %vm96_vm1, %v80_v23, %v112_v31  ;;  %v83_v36 = vadd.f32 %v479_v7, %v60_v28  ;;  %v84_v37 = vadd.f32 %v479_v7, %v61_v29  ;;  %v418_v28 = vld [vmem:[%s573_s0 + $0x30] sm:$0xff]  }
   0xb   :  { %v175_v39 = vadd.f32 %v343_v8, %v127_v34  ;;  %v176_v40 = vadd.f32 %v344_v9, %v128_v35  ;;  %v129_v41 = vsel %vm97_vm2, %v81_v26, %v113_v32  ;;  %v130_v42 = vsel %vm98_vm3, %v82_v27, %v114_v33  ;;  %v419_v33 = vld [vmem:[%s573_s0 + $0x38] sm:$0xff]  }
   0xc   :  { %v177_v44 = vadd.f32 %v347_v16, %v129_v41  ;;  %v178_v45 = vadd.f32 %v348_v17, %v130_v42  ;;  %vm99_vm4 = vcmp.gt.f32.partialorder %v83_v36, 0.0  ;;  %vm100_vm5 = vcmp.gt.f32.partialorder %v84_v37, 0.0  ;;  %v425_v41 = vld [vmem:[%s576_s3 + $0x30] sm:$0xff]  }
   0xd   :  { %v376_v47 = vpack.c.bf16 %v176_v40, %v175_v39  ;;  %v115_v48 = vmul.f32 0.1, %v83_v36  ;;  %v116_v49 = vmul.f32 0.1, %v84_v37  ;;  %v355_v53 = vunpack.c.l.bf16 %v422_v43 }
   0xe   :  { %v381_v51 = vpack.c.bf16 %v178_v45, %v177_v44  ;;  %v356_v54 = vunpack.c.h.bf16 %v422_v43  ;;  %v62_v58 = vmul.f32 %v323_v50, %v465_v1  ;;  %v327_v59 = vunpack.c.l.bf16 %v416_v46 }
   0xf   :  { %377 = vst [vmem:[%s577_s4] sm:$0xff] %v376_v47   ;;  %v131_v56 = vsel %vm99_vm4, %v83_v36, %v115_v48  ;;  %v132_v57 = vsel %vm100_vm5, %v84_v37, %v116_v49  ;;  %v63_v63 = vmul.f32 %v324_v52, %v465_v1  ;;  %v328_v0 = vunpack.c.h.bf16 %v416_v46 }
  0x10   :  { %427 = vst [vmem:[%s577_s4 + $0x8] sm:$0xff] %v381_v51   ;;  %v179_v61 = vadd.f32 %v351_v24, %v131_v56  ;;  %v180_v62 = vadd.f32 %v352_v25, %v132_v57  ;;  %v85_v2 = vadd.f32 %v479_v7, %v62_v58  ;;  %v64_v3 = vmul.f32 %v327_v59, %v465_v1 }
  0x11   :  { %v359_v4 = vunpack.c.l.bf16 %v423_v55  ;;  %v360_v5 = vunpack.c.h.bf16 %v423_v55  ;;  %v86_v8 = vadd.f32 %v479_v7, %v63_v63  ;;  %v65_v9 = vmul.f32 %v328_v0, %v465_v1 }
  0x12   :  { %v386_v6 = vpack.c.bf16 %v180_v62, %v179_v61  ;;  %v331_v10 = vunpack.c.l.bf16 %v417_v60  ;;  %vm101_vm6 = vcmp.gt.f32.partialorder %v85_v2, 0.0  ;;  %v117_v11 = vmul.f32 0.1, %v85_v2 }
  0x13   :  { %v87_v12 = vadd.f32 %v479_v7, %v64_v3  ;;  %v332_v13 = vunpack.c.h.bf16 %v417_v60  ;;  %vm102_vm7 = vcmp.gt.f32.partialorder %v86_v8, 0.0  ;;  %v118_v14 = vmul.f32 0.1, %v86_v8 }
  0x14   :  { %428 = vst [vmem:[%s577_s4 + $0x10] sm:$0xff] %v386_v6   ;;  %v88_v15 = vadd.f32 %v479_v7, %v65_v9  ;;  %v66_v16 = vmul.f32 %v331_v10, %v465_v1  ;;  %v133_v17 = vsel %vm101_vm6, %v85_v2, %v117_v11  ;;  %v363_v31 = vunpack.c.l.bf16 %v424_v20 }
  0x15   :  { %vm103_vm8 = vcmp.gt.f32.partialorder %v87_v12, 0.0  ;;  %v119_v18 = vmul.f32 0.1, %v87_v12  ;;  %v67_v19 = vmul.f32 %v332_v13, %v465_v1  ;;  %v134_v21 = vsel %vm102_vm7, %v86_v8, %v118_v14 }
  0x16   :  { %v181_v22 = vadd.f32 %v355_v53, %v133_v17  ;;  %vm104_vm9 = vcmp.gt.f32.partialorder %v88_v15, 0.0  ;;  %v120_v23 = vmul.f32 0.1, %v88_v15  ;;  %v182_v24 = vadd.f32 %v356_v54, %v134_v21  ;;  %v426_v54 = vld [vmem:[%s576_s3 + $0x38] sm:$0xff]  }
  0x17   :  { %v135_v25 = vsel %vm103_vm8, %v87_v12, %v119_v18  ;;  %v89_v26 = vadd.f32 %v479_v7, %v66_v16  ;;  %v90_v27 = vadd.f32 %v479_v7, %v67_v19  ;;  %v364_v32 = vunpack.c.h.bf16 %v424_v20 }
  0x18   :  { %v136_v29 = vsel %vm104_vm9, %v88_v15, %v120_v23  ;;  %v183_v30 = vadd.f32 %v359_v4, %v135_v25  ;;  %v391_v34 = vpack.c.bf16 %v182_v24, %v181_v22  ;;  %v335_v38 = vunpack.c.l.bf16 %v418_v28 }
  0x19   :  { %v184_v35 = vadd.f32 %v360_v5, %v136_v29  ;;  %vm105_vm10 = vcmp.gt.f32.partialorder %v89_v26, 0.0  ;;  %vm106_vm11 = vcmp.gt.f32.partialorder %v90_v27, 0.0  ;;  %v121_v36 = vmul.f32 0.1, %v89_v26 }
  0x1a   :  { %v122_v37 = vmul.f32 0.1, %v90_v27  ;;  %v336_v39 = vunpack.c.h.bf16 %v418_v28  ;;  %429 = vst [vmem:[%s577_s4 + $0x18] sm:$0xff] %v391_v34   ;;  %v339_v42 = vunpack.c.l.bf16 %v419_v33  ;;  %v68_v45 = vmul.f32 %v335_v38, %v465_v1 }
  0x1b   :  { %v396_v40 = vpack.c.bf16 %v184_v35, %v183_v30  ;;  %v137_v43 = vsel %vm105_vm10, %v89_v26, %v121_v36  ;;  %v340_v49 = vunpack.c.h.bf16 %v419_v33  ;;  %v367_v53 = vunpack.c.l.bf16 %v425_v41 }
  0x1c   :  { %v138_v44 = vsel %vm106_vm11, %v90_v27, %v122_v37  ;;  %v69_v46 = vmul.f32 %v336_v39, %v465_v1  ;;  %v185_v47 = vadd.f32 %v363_v31, %v137_v43  ;;  %v70_v50 = vmul.f32 %v339_v42, %v465_v1 }
  0x1d   :  { %430 = vst [vmem:[%s577_s4 + $0x20] sm:$0xff] %v396_v40   ;;  %v186_v48 = vadd.f32 %v364_v32, %v138_v44  ;;  %v91_v51 = vadd.f32 %v479_v7, %v68_v45  ;;  %v368_v56 = vunpack.c.h.bf16 %v425_v41  ;;  %v71_v57 = vmul.f32 %v340_v49, %v465_v1 }
  0x1e   :  { %v92_v52 = vadd.f32 %v479_v7, %v69_v46  ;;  %v93_v58 = vadd.f32 %v479_v7, %v70_v50  ;;  %v371_v63 = vunpack.c.l.bf16 %v426_v54  ;;  %v372_v3 = vunpack.c.h.bf16 %v426_v54 }
  0x1f   :  { %v401_v55 = vpack.c.bf16 %v186_v48, %v185_v47  ;;  %vm107_vm12 = vcmp.gt.f32.partialorder %v91_v51, 0.0  ;;  %v123_v59 = vmul.f32 0.1, %v91_v51  ;;  %v94_v61 = vadd.f32 %v479_v7, %v71_v57 }
  0x20   :  { %vm108_vm13 = vcmp.gt.f32.partialorder %v92_v52, 0.0  ;;  %v124_v60 = vmul.f32 0.1, %v92_v52  ;;  %vm109_vm14 = vcmp.gt.f32.partialorder %v93_v58, 0.0  ;;  %v125_v62 = vmul.f32 0.1, %v93_v58 }
  0x21   :  { %431 = vst [vmem:[%s577_s4 + $0x28] sm:$0xff] %v401_v55   ;;  %v139_v0 = vsel %vm107_vm12, %v91_v51, %v123_v59  ;;  %vm110_vm15 = vcmp.gt.f32.partialorder %v94_v61, 0.0  ;;  %v126_v5 = vmul.f32 0.1, %v94_v61 }
  0x22   :  { %v140_v2 = vsel %vm108_vm13, %v92_v52, %v124_v60  ;;  %v187_v4 = vadd.f32 %v367_v53, %v139_v0  ;;  %v141_v6 = vsel %vm109_vm14, %v93_v58, %v125_v62 }
  0x23   :  { %v188_v1 = vadd.f32 %v368_v56, %v140_v2  ;;  %v142_v9 = vsel %vm110_vm15, %v94_v61, %v126_v5  ;;  %v189_v10 = vadd.f32 %v371_v63, %v141_v6 }
  0x24   :  { %v190_v11 = vadd.f32 %v372_v3, %v142_v9 }
  0x25   :  { %v406_v8 = vpack.c.bf16 %v188_v1, %v187_v4 }
  0x26   :  { %v411_v7 = vpack.c.bf16 %v190_v11, %v189_v10 }
  0x27   :  { %432 = vst [vmem:[%s577_s4 + $0x30] sm:$0xff] %v406_v8  }
  0x28   :  { %433 = vst [vmem:[%s577_s4 + $0x38] sm:$0xff] %v411_v7  }

// kernel: _lambda_.27
= control target key start
LH: loop header
LB: loop body
LE: loop exit
PB: predicated region body
PF: predicated region fallthrough
CT: control target
= control target key end

     0   :  { %vm379_vm0 = vcmask 130048   ;;  %s1711_s1 = inlined_call_operand.vmem [shape: bf16[16,128], index: 1, kind: input, shape index: {}]   ;;  %s1712_s0 = inlined_call_operand.vmem [shape: bf16[512,16], index: 0, kind: input, shape index: {}]   ;;  %s1713_s2 = inlined_call_operand.vmem [shape: f32[1,128], index: 2, kind: input, shape index: {}]   ;;  %s1714_s3 = inlined_call_operand.vmem [shape: f32[512,128], index: 3, kind: output, shape index: {}]  }
   0x1   :  { %v1266_v0 = vld [vmem:[%s1711_s1] sm:$0xff]   ;;  %v1269_v3 = vld [vmem:[%s1712_s0 + $0x8] sm:$0xff]   ;;  %v1271_v5 = vld [vmem:[%s1712_s0 + $0x10] sm:$0xff]  }
   0x2   :  { %v1267_v1 = vld [vmem:[%s1712_s0] sm:$0xff]   ;;  %1198 = vmatprep.subr.bf16.mxu0 %v1266_v0  ;;  %1264 = vmatprep.subr.bf16.mxu1 %v1266_v0  ;;  %v1270_v4 = vld [vmem:[%s1712_s0 + $0x88] sm:$0xff]   ;;  %v1272_v6 = vld [vmem:[%s1712_s0 + $0x90] sm:$0xff]  }
   0x3   :  { %v1268_v2 = vld [vmem:[%s1712_s0 + $0x80] sm:$0xff]   ;;  %1199 = vmatpush3.bf16.msra.mxu0 %v1266_v0  ;;  %1265 = vmatpush3.bf16.msra.mxu1 %v1266_v0  ;;  %v1273_v7 = vld [vmem:[%s1712_s0 + $0x18] sm:$0xff]   ;;  %v1277_v11 = vld [vmem:[%s1712_s0 + $0x28] sm:$0xff]  }
   0x4   :  { %1200 = vmatprep.mubr.msk.bf16.mxu0 %vm379_vm0, %v1267_v1  ;;  %1232 = vmatprep.mubr.msk.bf16.mxu1 %vm379_vm0, %v1268_v2  ;;  %v1274_v8 = vld [vmem:[%s1712_s0 + $0x98] sm:$0xff]   ;;  %v1275_v9 = vld [vmem:[%s1712_s0 + $0x20] sm:$0xff]   ;;  %v1278_v12 = vld [vmem:[%s1712_s0 + $0xa8] sm:$0xff]  }
   0x5   :  { %v1276_v10 = vld [vmem:[%s1712_s0 + $0xa0] sm:$0xff]   ;;  %v1279_v13 = vld [vmem:[%s1712_s0 + $0x30] sm:$0xff]   ;;  %v1281_v15 = vld [vmem:[%s1712_s0 + $0x38] sm:$0xff]  }
   0x6   :  { %1201 = vmatmul.mubr.msk.bf16.vlgmr.msra.gmra.mrb[0].mxu0 %vm379_vm0, %v1269_v3  ;;  %1233 = vmatmul.mubr.msk.bf16.vlgmr.msra.gmra.mrb[0].mxu1 %vm379_vm0, %v1270_v4  ;;  %v1280_v14 = vld [vmem:[%s1712_s0 + $0xb0] sm:$0xff]   ;;  %v1282_v16 = vld [vmem:[%s1712_s0 + $0xb8] sm:$0xff]   ;;  %v1283_v17 = vld [vmem:[%s1712_s0 + $0x40] sm:$0xff]  }
   0x7   :  { %1204 = vmatprep.mubr.msk.bf16.mxu0 %vm379_vm0, %v1271_v5  ;;  %1236 = vmatprep.mubr.msk.bf16.mxu1 %vm379_vm0, %v1272_v6  ;;  %v1284_v18 = vld [vmem:[%s1712_s0 + $0xc0] sm:$0xff]   ;;  %v1285_v19 = vld [vmem:[%s1712_s0 + $0x48] sm:$0xff]   ;;  %v1287_v21 = vld [vmem:[%s1712_s0 + $0x50] sm:$0xff]  }
   0x8   :  { %v1286_v20 = vld [vmem:[%s1712_s0 + $0xc8] sm:$0xff]   ;;  %v1288_v22 = vld [vmem:[%s1712_s0 + $0xd0] sm:$0xff]   ;;  %v1289_v23 = vld [vmem:[%s1712_s0 + $0x58] sm:$0xff]  }
   0x9   :  { %v1290_v24 = vld [vmem:[%s1712_s0 + $0xd8] sm:$0xff]   ;;  %v1291_v25 = vld [vmem:[%s1712_s0 + $0x60] sm:$0xff]   ;;  %v1293_v27 = vld [vmem:[%s1712_s0 + $0x68] sm:$0xff]  }
   0xa   :  { %v1292_v26 = vld [vmem:[%s1712_s0 + $0xe0] sm:$0xff]   ;;  %v1294_v28 = vld [vmem:[%s1712_s0 + $0xe8] sm:$0xff]   ;;  %v1295_v29 = vld [vmem:[%s1712_s0 + $0x70] sm:$0xff]  }
   0xb   :  { %v1296_v30 = vld [vmem:[%s1712_s0 + $0xf0] sm:$0xff]   ;;  %v1297_v31 = vld [vmem:[%s1712_s0 + $0x78] sm:$0xff]   ;;  %v1453_v33 = vld [vmem:[%s1713_s2] ss:$0 sm:$0xff] }
   0xc   :  { %v1298_v32 = vld [vmem:[%s1712_s0 + $0xf8] sm:$0xff]  }
   0xe   :  { %1205 = vmatmul.mubr.msk.bf16.gmra.mrb[4].mxu0 %vm379_vm0, %v1273_v7  ;;  %1237 = vmatmul.mubr.msk.bf16.gmra.mrb[4].mxu1 %vm379_vm0, %v1274_v8 }
   0xf   :  { %1208 = vmatprep.mubr.msk.bf16.mxu0 %vm379_vm0, %v1275_v9  ;;  %1240 = vmatprep.mubr.msk.bf16.mxu1 %vm379_vm0, %v1276_v10 }
  0x16   :  { %1209 = vmatmul.mubr.msk.bf16.gmra.mrb[8].mxu0 %vm379_vm0, %v1277_v11  ;;  %1241 = vmatmul.mubr.msk.bf16.gmra.mrb[8].mxu1 %vm379_vm0, %v1278_v12 }
  0x17   :  { %1212 = vmatprep.mubr.msk.bf16.mxu0 %vm379_vm0, %v1279_v13  ;;  %1244 = vmatprep.mubr.msk.bf16.mxu1 %vm379_vm0, %v1280_v14 }
  0x1e   :  { %1213 = vmatmul.mubr.msk.bf16.gmra.mrb[12].mxu0 %vm379_vm0, %v1281_v15  ;;  %1245 = vmatmul.mubr.msk.bf16.gmra.mrb[12].mxu1 %vm379_vm0, %v1282_v16 }
  0x1f   :  { %1216 = vmatprep.mubr.msk.bf16.mxu0 %vm379_vm0, %v1283_v17  ;;  %1248 = vmatprep.mubr.msk.bf16.mxu1 %vm379_vm0, %v1284_v18 }
  0x26   :  { %1217 = vmatmul.mubr.msk.bf16.gmra.mrb[16].mxu0 %vm379_vm0, %v1285_v19  ;;  %1249 = vmatmul.mubr.msk.bf16.gmra.mrb[16].mxu1 %vm379_vm0, %v1286_v20 }
  0x27   :  { %1220 = vmatprep.mubr.msk.bf16.mxu0 %vm379_vm0, %v1287_v21  ;;  %1252 = vmatprep.mubr.msk.bf16.mxu1 %vm379_vm0, %v1288_v22 }
  0x2e   :  { %1221 = vmatmul.mubr.msk.bf16.gmra.mrb[20].mxu0 %vm379_vm0, %v1289_v23  ;;  %1253 = vmatmul.mubr.msk.bf16.gmra.mrb[20].mxu1 %vm379_vm0, %v1290_v24 }
  0x2f   :  { %1224 = vmatprep.mubr.msk.bf16.mxu0 %vm379_vm0, %v1291_v25  ;;  %1256 = vmatprep.mubr.msk.bf16.mxu1 %vm379_vm0, %v1292_v26 }
  0x36   :  { %1225 = vmatmul.mubr.msk.bf16.gmra.mrb[24].mxu0 %vm379_vm0, %v1293_v27  ;;  %1257 = vmatmul.mubr.msk.bf16.gmra.mrb[24].mxu1 %vm379_vm0, %v1294_v28 }
  0x37   :  { %1228 = vmatprep.mubr.msk.bf16.mxu0 %vm379_vm0, %v1295_v29  ;;  %1260 = vmatprep.mubr.msk.bf16.mxu1 %vm379_vm0, %v1296_v30 }
  0x3e   :  { %1229 = vmatmul.mubr.msk.bf16.gmra.mrb[28].mxu0 %vm379_vm0, %v1297_v31  ;;  %1261 = vmatmul.mubr.msk.bf16.gmra.mrb[28].mxu1 %vm379_vm0, %v1298_v32 }
  0xd9   :  { %v1202_v34 = vpop.f32.mrb[0].mxu0  ;;  %v1234_v35 = vpop.f32.mrb[0].mxu1 }
  0xda   :  { %v969_v36 = vadd.f32 %v1202_v34, %v1453_v33  ;;  %v1001_v37 = vadd.f32 %v1234_v35, %v1453_v33  ;;  %v510_v38 = vpop.f32.mrb[1].mxu0  ;;  %v638_v39 = vpop.f32.mrb[1].mxu1 }
  0xdb   :  { %v967_v40 = vadd.f32 %v1453_v33, %v510_v38  ;;  %v999_v41 = vadd.f32 %v1453_v33, %v638_v39  ;;  %v1203_v42 = vpop.f32.mrb[2].mxu0  ;;  %v1235_v43 = vpop.f32.mrb[2].mxu1 }
  0xdc   :  { %1033 = vst [vmem:[%s1714_s3 + $0x10] sm:$0xff] %v969_v36  ;;  %1065 = vst [vmem:[%s1714_s3 + $0x110] sm:$0xff] %v1001_v37  ;;  %v970_v44 = vadd.f32 %v1203_v42, %v1453_v33  ;;  %v1002_v45 = vadd.f32 %v1235_v43, %v1453_v33  ;;  %v513_v46 = vpop.f32.mrb[3].mxu0  ;;  %v641_v47 = vpop.f32.mrb[3].mxu1 }
  0xdd   :  { %1031 = vst [vmem:[%s1714_s3] sm:$0xff] %v967_v40  ;;  %1063 = vst [vmem:[%s1714_s3 + $0x100] sm:$0xff] %v999_v41  ;;  %v968_v48 = vadd.f32 %v1453_v33, %v513_v46  ;;  %v1000_v49 = vadd.f32 %v1453_v33, %v641_v47 }
  0xde   :  { %1034 = vst [vmem:[%s1714_s3 + $0x18] sm:$0xff] %v970_v44  ;;  %1066 = vst [vmem:[%s1714_s3 + $0x118] sm:$0xff] %v1002_v45 }
  0xdf   :  { %1032 = vst [vmem:[%s1714_s3 + $0x8] sm:$0xff] %v968_v48  ;;  %1064 = vst [vmem:[%s1714_s3 + $0x108] sm:$0xff] %v1000_v49 }
  0xe1   :  { %v1206_v50 = vpop.f32.mrb[4].mxu0  ;;  %v1238_v51 = vpop.f32.mrb[4].mxu1 }
  0xe2   :  { %v973_v52 = vadd.f32 %v1206_v50, %v1453_v33  ;;  %v1005_v53 = vadd.f32 %v1238_v51, %v1453_v33  ;;  %v526_v54 = vpop.f32.mrb[5].mxu0  ;;  %v654_v55 = vpop.f32.mrb[5].mxu1 }
  0xe3   :  { %v971_v56 = vadd.f32 %v1453_v33, %v526_v54  ;;  %v1003_v57 = vadd.f32 %v1453_v33, %v654_v55  ;;  %v1207_v58 = vpop.f32.mrb[6].mxu0  ;;  %v1239_v59 = vpop.f32.mrb[6].mxu1 }
  0xe4   :  { %1037 = vst [vmem:[%s1714_s3 + $0x30] sm:$0xff] %v973_v52  ;;  %1069 = vst [vmem:[%s1714_s3 + $0x130] sm:$0xff] %v1005_v53  ;;  %v974_v60 = vadd.f32 %v1207_v58, %v1453_v33  ;;  %v1006_v61 = vadd.f32 %v1239_v59, %v1453_v33  ;;  %v529_v62 = vpop.f32.mrb[7].mxu0  ;;  %v657_v63 = vpop.f32.mrb[7].mxu1 }
  0xe5   :  { %1035 = vst [vmem:[%s1714_s3 + $0x20] sm:$0xff] %v971_v56  ;;  %1067 = vst [vmem:[%s1714_s3 + $0x120] sm:$0xff] %v1003_v57  ;;  %v972_v0 = vadd.f32 %v1453_v33, %v529_v62  ;;  %v1004_v1 = vadd.f32 %v1453_v33, %v657_v63 }
  0xe6   :  { %1038 = vst [vmem:[%s1714_s3 + $0x38] sm:$0xff] %v974_v60  ;;  %1070 = vst [vmem:[%s1714_s3 + $0x138] sm:$0xff] %v1006_v61 }
  0xe7   :  { %1036 = vst [vmem:[%s1714_s3 + $0x28] sm:$0xff] %v972_v0  ;;  %1068 = vst [vmem:[%s1714_s3 + $0x128] sm:$0xff] %v1004_v1 }
  0xe9   :  { %v1210_v2 = vpop.f32.mrb[8].mxu0  ;;  %v1242_v3 = vpop.f32.mrb[8].mxu1 }
  0xea   :  { %v977_v4 = vadd.f32 %v1210_v2, %v1453_v33  ;;  %v1009_v5 = vadd.f32 %v1242_v3, %v1453_v33  ;;  %v542_v6 = vpop.f32.mrb[9].mxu0  ;;  %v670_v7 = vpop.f32.mrb[9].mxu1 }
  0xeb   :  { %v975_v8 = vadd.f32 %v1453_v33, %v542_v6  ;;  %v1007_v9 = vadd.f32 %v1453_v33, %v670_v7  ;;  %v1211_v10 = vpop.f32.mrb[10].mxu0  ;;  %v1243_v11 = vpop.f32.mrb[10].mxu1 }
  0xec   :  { %1041 = vst [vmem:[%s1714_s3 + $0x50] sm:$0xff] %v977_v4  ;;  %1073 = vst [vmem:[%s1714_s3 + $0x150] sm:$0xff] %v1009_v5  ;;  %v978_v12 = vadd.f32 %v1211_v10, %v1453_v33  ;;  %v1010_v13 = vadd.f32 %v1243_v11, %v1453_v33  ;;  %v545_v14 = vpop.f32.mrb[11].mxu0  ;;  %v673_v15 = vpop.f32.mrb[11].mxu1 }
  0xed   :  { %1039 = vst [vmem:[%s1714_s3 + $0x40] sm:$0xff] %v975_v8  ;;  %1071 = vst [vmem:[%s1714_s3 + $0x140] sm:$0xff] %v1007_v9  ;;  %v976_v16 = vadd.f32 %v1453_v33, %v545_v14  ;;  %v1008_v17 = vadd.f32 %v1453_v33, %v673_v15 }
  0xee   :  { %1042 = vst [vmem:[%s1714_s3 + $0x58] sm:$0xff] %v978_v12  ;;  %1074 = vst [vmem:[%s1714_s3 + $0x158] sm:$0xff] %v1010_v13 }
  0xef   :  { %1040 = vst [vmem:[%s1714_s3 + $0x48] sm:$0xff] %v976_v16  ;;  %1072 = vst [vmem:[%s1714_s3 + $0x148] sm:$0xff] %v1008_v17 }
  0xf1   :  { %v1214_v18 = vpop.f32.mrb[12].mxu0  ;;  %v1246_v19 = vpop.f32.mrb[12].mxu1 }
  0xf2   :  { %v981_v20 = vadd.f32 %v1214_v18, %v1453_v33  ;;  %v1013_v21 = vadd.f32 %v1246_v19, %v1453_v33  ;;  %v558_v22 = vpop.f32.mrb[13].mxu0  ;;  %v686_v23 = vpop.f32.mrb[13].mxu1 }
  0xf3   :  { %v979_v24 = vadd.f32 %v1453_v33, %v558_v22  ;;  %v1011_v25 = vadd.f32 %v1453_v33, %v686_v23  ;;  %v1215_v26 = vpop.f32.mrb[14].mxu0  ;;  %v1247_v27 = vpop.f32.mrb[14].mxu1 }
  0xf4   :  { %1045 = vst [vmem:[%s1714_s3 + $0x70] sm:$0xff] %v981_v20  ;;  %1077 = vst [vmem:[%s1714_s3 + $0x170] sm:$0xff] %v1013_v21  ;;  %v982_v28 = vadd.f32 %v1215_v26, %v1453_v33  ;;  %v1014_v29 = vadd.f32 %v1247_v27, %v1453_v33  ;;  %v561_v30 = vpop.f32.mrb[15].mxu0  ;;  %v689_v31 = vpop.f32.mrb[15].mxu1 }
  0xf5   :  { %1043 = vst [vmem:[%s1714_s3 + $0x60] sm:$0xff] %v979_v24  ;;  %1075 = vst [vmem:[%s1714_s3 + $0x160] sm:$0xff] %v1011_v25  ;;  %v980_v32 = vadd.f32 %v1453_v33, %v561_v30  ;;  %v1012_v34 = vadd.f32 %v1453_v33, %v689_v31 }
  0xf6   :  { %1046 = vst [vmem:[%s1714_s3 + $0x78] sm:$0xff] %v982_v28  ;;  %1078 = vst [vmem:[%s1714_s3 + $0x178] sm:$0xff] %v1014_v29 }
  0xf7   :  { %1044 = vst [vmem:[%s1714_s3 + $0x68] sm:$0xff] %v980_v32  ;;  %1076 = vst [vmem:[%s1714_s3 + $0x168] sm:$0xff] %v1012_v34 }
  0xf9   :  { %v1218_v35 = vpop.f32.mrb[16].mxu0  ;;  %v1250_v36 = vpop.f32.mrb[16].mxu1 }
  0xfa   :  { %v985_v37 = vadd.f32 %v1218_v35, %v1453_v33  ;;  %v1017_v38 = vadd.f32 %v1250_v36, %v1453_v33  ;;  %v574_v39 = vpop.f32.mrb[17].mxu0  ;;  %v702_v40 = vpop.f32.mrb[17].mxu1 }
  0xfb   :  { %v983_v41 = vadd.f32 %v1453_v33, %v574_v39  ;;  %v1015_v42 = vadd.f32 %v1453_v33, %v702_v40  ;;  %v1219_v43 = vpop.f32.mrb[18].mxu0  ;;  %v1251_v44 = vpop.f32.mrb[18].mxu1 }
  0xfc   :  { %1049 = vst [vmem:[%s1714_s3 + $0x90] sm:$0xff] %v985_v37  ;;  %1081 = vst [vmem:[%s1714_s3 + $0x190] sm:$0xff] %v1017_v38  ;;  %v986_v45 = vadd.f32 %v1219_v43, %v1453_v33  ;;  %v1018_v46 = vadd.f32 %v1251_v44, %v1453_v33  ;;  %v577_v47 = vpop.f32.mrb[19].mxu0  ;;  %v705_v48 = vpop.f32.mrb[19].mxu1 }
  0xfd   :  { %1047 = vst [vmem:[%s1714_s3 + $0x80] sm:$0xff] %v983_v41  ;;  %1079 = vst [vmem:[%s1714_s3 + $0x180] sm:$0xff] %v1015_v42  ;;  %v984_v49 = vadd.f32 %v1453_v33, %v577_v47  ;;  %v1016_v50 = vadd.f32 %v1453_v33, %v705_v48 }
  0xfe   :  { %1050 = vst [vmem:[%s1714_s3 + $0x98] sm:$0xff] %v986_v45  ;;  %1082 = vst [vmem:[%s1714_s3 + $0x198] sm:$0xff] %v1018_v46 }
  0xff   :  { %1048 = vst [vmem:[%s1714_s3 + $0x88] sm:$0xff] %v984_v49  ;;  %1080 = vst [vmem:[%s1714_s3 + $0x188] sm:$0xff] %v1016_v50 }
 0x101   :  { %v1222_v51 = vpop.f32.mrb[20].mxu0  ;;  %v1254_v52 = vpop.f32.mrb[20].mxu1 }
 0x102   :  { %v989_v53 = vadd.f32 %v1222_v51, %v1453_v33  ;;  %v1021_v54 = vadd.f32 %v1254_v52, %v1453_v33  ;;  %v590_v55 = vpop.f32.mrb[21].mxu0  ;;  %v718_v56 = vpop.f32.mrb[21].mxu1 }
 0x103   :  { %v987_v57 = vadd.f32 %v1453_v33, %v590_v55  ;;  %v1019_v58 = vadd.f32 %v1453_v33, %v718_v56  ;;  %v1223_v59 = vpop.f32.mrb[22].mxu0  ;;  %v1255_v60 = vpop.f32.mrb[22].mxu1 }
 0x104   :  { %1053 = vst [vmem:[%s1714_s3 + $0xb0] sm:$0xff] %v989_v53  ;;  %1085 = vst [vmem:[%s1714_s3 + $0x1b0] sm:$0xff] %v1021_v54  ;;  %v990_v61 = vadd.f32 %v1223_v59, %v1453_v33  ;;  %v1022_v62 = vadd.f32 %v1255_v60, %v1453_v33  ;;  %v593_v63 = vpop.f32.mrb[23].mxu0  ;;  %v721_v0 = vpop.f32.mrb[23].mxu1 }
 0x105   :  { %1051 = vst [vmem:[%s1714_s3 + $0xa0] sm:$0xff] %v987_v57  ;;  %1083 = vst [vmem:[%s1714_s3 + $0x1a0] sm:$0xff] %v1019_v58  ;;  %v988_v1 = vadd.f32 %v1453_v33, %v593_v63  ;;  %v1020_v2 = vadd.f32 %v1453_v33, %v721_v0 }
 0x106   :  { %1054 = vst [vmem:[%s1714_s3 + $0xb8] sm:$0xff] %v990_v61  ;;  %1086 = vst [vmem:[%s1714_s3 + $0x1b8] sm:$0xff] %v1022_v62 }
 0x107   :  { %1052 = vst [vmem:[%s1714_s3 + $0xa8] sm:$0xff] %v988_v1  ;;  %1084 = vst [vmem:[%s1714_s3 + $0x1a8] sm:$0xff] %v1020_v2 }
 0x109   :  { %v1226_v3 = vpop.f32.mrb[24].mxu0  ;;  %v1258_v4 = vpop.f32.mrb[24].mxu1 }
 0x10a   :  { %v993_v5 = vadd.f32 %v1226_v3, %v1453_v33  ;;  %v1025_v6 = vadd.f32 %v1258_v4, %v1453_v33  ;;  %v606_v7 = vpop.f32.mrb[25].mxu0  ;;  %v734_v8 = vpop.f32.mrb[25].mxu1 }
 0x10b   :  { %v991_v9 = vadd.f32 %v1453_v33, %v606_v7  ;;  %v1023_v10 = vadd.f32 %v1453_v33, %v734_v8  ;;  %v1227_v11 = vpop.f32.mrb[26].mxu0  ;;  %v1259_v12 = vpop.f32.mrb[26].mxu1 }
 0x10c   :  { %1057 = vst [vmem:[%s1714_s3 + $0xd0] sm:$0xff] %v993_v5  ;;  %1089 = vst [vmem:[%s1714_s3 + $0x1d0] sm:$0xff] %v1025_v6  ;;  %v994_v13 = vadd.f32 %v1227_v11, %v1453_v33  ;;  %v1026_v14 = vadd.f32 %v1259_v12, %v1453_v33  ;;  %v609_v15 = vpop.f32.mrb[27].mxu0  ;;  %v737_v16 = vpop.f32.mrb[27].mxu1 }
 0x10d   :  { %1055 = vst [vmem:[%s1714_s3 + $0xc0] sm:$0xff] %v991_v9  ;;  %1087 = vst [vmem:[%s1714_s3 + $0x1c0] sm:$0xff] %v1023_v10  ;;  %v992_v17 = vadd.f32 %v1453_v33, %v609_v15  ;;  %v1024_v18 = vadd.f32 %v1453_v33, %v737_v16 }
 0x10e   :  { %1058 = vst [vmem:[%s1714_s3 + $0xd8] sm:$0xff] %v994_v13  ;;  %1090 = vst [vmem:[%s1714_s3 + $0x1d8] sm:$0xff] %v1026_v14 }
 0x10f   :  { %1056 = vst [vmem:[%s1714_s3 + $0xc8] sm:$0xff] %v992_v17  ;;  %1088 = vst [vmem:[%s1714_s3 + $0x1c8] sm:$0xff] %v1024_v18 }
 0x111   :  { %v1230_v19 = vpop.f32.mrb[28].mxu0  ;;  %v1262_v20 = vpop.f32.mrb[28].mxu1 }
 0x112   :  { %v997_v21 = vadd.f32 %v1230_v19, %v1453_v33  ;;  %v1029_v22 = vadd.f32 %v1262_v20, %v1453_v33  ;;  %v622_v23 = vpop.f32.mrb[29].mxu0  ;;  %v750_v24 = vpop.f32.mrb[29].mxu1 }
 0x113   :  { %v995_v25 = vadd.f32 %v1453_v33, %v622_v23  ;;  %v1027_v26 = vadd.f32 %v1453_v33, %v750_v24  ;;  %v1231_v27 = vpop.f32.mrb[30].mxu0  ;;  %v1263_v28 = vpop.f32.mrb[30].mxu1 }
 0x114   :  { %1061 = vst [vmem:[%s1714_s3 + $0xf0] sm:$0xff] %v997_v21  ;;  %1093 = vst [vmem:[%s1714_s3 + $0x1f0] sm:$0xff] %v1029_v22  ;;  %v998_v29 = vadd.f32 %v1231_v27, %v1453_v33  ;;  %v1030_v30 = vadd.f32 %v1263_v28, %v1453_v33  ;;  %v625_v31 = vpop.f32.mrb[31].mxu0  ;;  %v753_v32 = vpop.f32.mrb[31].mxu1 }
 0x115   :  { %1059 = vst [vmem:[%s1714_s3 + $0xe0] sm:$0xff] %v995_v25  ;;  %1091 = vst [vmem:[%s1714_s3 + $0x1e0] sm:$0xff] %v1027_v26  ;;  %v996_v34 = vadd.f32 %v1453_v33, %v625_v31  ;;  %v1028_v35 = vadd.f32 %v1453_v33, %v753_v32 }
 0x116   :  { %1062 = vst [vmem:[%s1714_s3 + $0xf8] sm:$0xff] %v998_v29  ;;  %1094 = vst [vmem:[%s1714_s3 + $0x1f8] sm:$0xff] %v1030_v30 }
 0x117   :  { %1060 = vst [vmem:[%s1714_s3 + $0xe8] sm:$0xff] %v996_v34  ;;  %1092 = vst [vmem:[%s1714_s3 + $0x1e8] sm:$0xff] %v1028_v35 }

// kernel: _lambda_.23
= control target key start
LH: loop header
LB: loop body
LE: loop exit
PB: predicated region body
PF: predicated region fallthrough
CT: control target
= control target key end

     0   :  { %s148_s0 = inlined_call_operand.vmem [shape: bf16[32,128], index: 0, kind: input, shape index: {}]   ;;  %s149_s1 = inlined_call_operand.vmem [shape: f32[1,128], index: 1, kind: input, shape index: {}]   ;;  %s150_s2 = inlined_call_operand.vmem [shape: f32[1,128], index: 2, kind: input, shape index: {}]   ;;  %s151_s3 = inlined_call_operand.vmem [shape: bf16[32,128], index: 3, kind: output, shape index: {}]  }
   0x1   :  { %v91_v0 = vld [vmem:[%s148_s0] sm:$0xff]   ;;  %v108_v4 = vld [vmem:[%s148_s0 + $0x8] sm:$0xff]  }
   0x2   :  { %v80_v1 = vld [vmem:[%s149_s1] ss:$0 sm:$0xff]  ;;  %v92_v2 = vunpack.c.l.bf16 %v91_v0  ;;  %v93_v3 = vunpack.c.h.bf16 %v91_v0  ;;  %v96_v6 = vunpack.c.l.bf16 %v108_v4  ;;  %v97_v7 = vunpack.c.h.bf16 %v108_v4 }
   0x3   :  { %v81_v5 = vld [vmem:[%s150_s2] ss:$0 sm:$0xff] }
   0x4   :  { %v29_v8 = vmul.f32 %v92_v2, %v80_v1  ;;  %v30_v9 = vmul.f32 %v93_v3, %v80_v1  ;;  %v31_v10 = vmul.f32 %v96_v6, %v80_v1  ;;  %v32_v11 = vmul.f32 %v97_v7, %v80_v1 }
   0x6   :  { %v40_v12 = vadd.f32 %v81_v5, %v29_v8  ;;  %v41_v13 = vadd.f32 %v81_v5, %v30_v9  ;;  %v42_v14 = vadd.f32 %v81_v5, %v31_v10  ;;  %v43_v15 = vadd.f32 %v81_v5, %v32_v11 }
   0x8   :  { %vm44_vm0 = vcmp.gt.f32.partialorder %v40_v12, 0.0  ;;  %vm45_vm1 = vcmp.gt.f32.partialorder %v41_v13, 0.0  ;;  %v48_v16 = vmul.f32 0.1, %v40_v12  ;;  %v49_v17 = vmul.f32 0.1, %v41_v13 }
   0x9   :  { %vm46_vm2 = vcmp.gt.f32.partialorder %v42_v14, 0.0  ;;  %vm47_vm3 = vcmp.gt.f32.partialorder %v43_v15, 0.0  ;;  %v50_v18 = vmul.f32 0.1, %v42_v14  ;;  %v51_v19 = vmul.f32 0.1, %v43_v15 }
   0xa   :  { %v52_v20 = vsel %vm44_vm0, %v40_v12, %v48_v16  ;;  %v53_v21 = vsel %vm45_vm1, %v41_v13, %v49_v17 }
   0xb   :  { %v101_v22 = vpack.c.bf16 %v53_v21, %v52_v20  ;;  %v54_v23 = vsel %vm46_vm2, %v42_v14, %v50_v18  ;;  %v55_v24 = vsel %vm47_vm3, %v43_v15, %v51_v19 }
   0xc   :  { %v106_v25 = vpack.c.bf16 %v55_v24, %v54_v23 }
   0xd   :  { %102 = vst [vmem:[%s151_s3] sm:$0xff] %v101_v22  }
   0xe   :  { %109 = vst [vmem:[%s151_s3 + $0x8] sm:$0xff] %v106_v25  }

// kernel: _lambda_.22
= control target key start
LH: loop header
LB: loop body
LE: loop exit
PB: predicated region body
PF: predicated region fallthrough
CT: control target
= control target key end

     0   :  { %v314_v0 = vmov 0   ;;  %vm120_vm0 = vcmask 130048   ;;  %vm233_vm1 = vcmask 1040384   ;;  %vm235_vm2 = vcmask 1041408   ;;  %s383_s1 = inlined_call_operand.vmem [shape: bf16[144,128], index: 1, kind: input, shape index: {}]   ;;  %s384_s0 = inlined_call_operand.vmem [shape: bf16[32,144], index: 0, kind: input, shape index: {}]   ;;  %s385_s2 = inlined_call_operand.vmem [shape: bf16[32,128], index: 2, kind: output, shape index: {0}]   ;;  %s386_s3 = inlined_call_operand.vmem [shape: f32[8,128], index: 3, kind: output, shape index: {1}]  }
   0x1   :  { %127 = vmatprep.subr.bf16.mxu0 %v314_v0  ;;  %280 = vmatprep.subr.bf16.mxu1 %v314_v0  ;;  %v299_v1 = vld [vmem:[%s383_s1] sm:$0xff]   ;;  %v300_v2 = vld [vmem:[%s383_s1 + $0x8] sm:$0xff]   ;;  %v301_v3 = vld [vmem:[%s383_s1 + $0x10] sm:$0xff]  }
   0x2   :  { %128 = vmatpush1.bf16.msra.mxu0 %v299_v1  ;;  %289 = vmatpush1.bf16.msra.mxu1 %v299_v1  ;;  %v302_v4 = vld [vmem:[%s383_s1 + $0x18] sm:$0xff]   ;;  %v310_v5 = vld [vmem:[%s384_s0 + $0x4] ss:$8 sps:$4 sm:$0xff]   ;;  %v305_v9 = vld [vmem:[%s383_s1 + $0x30] sm:$0xff]  }
   0x3   :  { %129 = vmatprep.subr.bf16.mxu0 %v314_v0  ;;  %281 = vmatprep.subr.bf16.mxu1 %v314_v0  ;;  %v313_v6 = vld [vmem:[%s384_s0 + $0x14] ss:$8 sps:$4 sm:$0xff]   ;;  %v303_v7 = vld [vmem:[%s383_s1 + $0x20] sm:$0xff]   ;;  %v304_v8 = vld [vmem:[%s383_s1 + $0x28] sm:$0xff]  }
   0x4   :  { %259 = vmatprep.mubr.msk.bf16.mxu0 %vm120_vm0, %v310_v5  ;;  %260 = vmatprep.mubr.msk.bf16.mxu1 %vm120_vm0, %v313_v6  ;;  %v306_v10 = vld [vmem:[%s383_s1 + $0x38] sm:$0xff]   ;;  %v307_v11 = vld [vmem:[%s383_s1 + $0x40] sm:$0xff]  }
   0x5   :  { %v308_v12 = vld [vmem:[%s384_s0] ss:$8 sps:$4 sm:$0xff]   ;;  %v311_v13 = vld [vmem:[%s384_s0 + $0x10] ss:$8 sps:$4 sm:$0xff]  }
   0x6   :  { %130 = vmatpush1.bf16.msra.mxu0 %v300_v2  ;;  %290 = vmatpush1.bf16.msra.mxu1 %v300_v2 }
   0x7   :  { %131 = vmatprep.subr.bf16.mxu0 %v314_v0  ;;  %282 = vmatprep.subr.bf16.mxu1 %v314_v0 }
   0xa   :  { %132 = vmatpush1.bf16.msra.mxu0 %v301_v3  ;;  %291 = vmatpush1.bf16.msra.mxu1 %v301_v3 }
   0xb   :  { %133 = vmatprep.subr.bf16.mxu0 %v314_v0  ;;  %283 = vmatprep.subr.bf16.mxu1 %v314_v0 }
   0xe   :  { %134 = vmatpush1.bf16.msra.mxu0 %v302_v4  ;;  %292 = vmatpush1.bf16.msra.mxu1 %v302_v4 }
   0xf   :  { %135 = vmatprep.subr.bf16.mxu0 %v314_v0  ;;  %284 = vmatprep.subr.bf16.mxu1 %v314_v0 }
  0x12   :  { %136 = vmatpush1.bf16.msra.mxu0 %v303_v7  ;;  %293 = vmatpush1.bf16.msra.mxu1 %v303_v7 }
  0x13   :  { %137 = vmatprep.subr.bf16.mxu0 %v314_v0  ;;  %285 = vmatprep.subr.bf16.mxu1 %v314_v0 }
  0x16   :  { %138 = vmatpush1.bf16.msra.mxu0 %v304_v8  ;;  %294 = vmatpush1.bf16.msra.mxu1 %v304_v8 }
  0x17   :  { %139 = vmatprep.subr.bf16.mxu0 %v314_v0  ;;  %286 = vmatprep.subr.bf16.mxu1 %v314_v0 }
  0x1a   :  { %140 = vmatpush1.bf16.msra.mxu0 %v305_v9  ;;  %295 = vmatpush1.bf16.msra.mxu1 %v305_v9 }
  0x1b   :  { %141 = vmatprep.subr.bf16.mxu0 %v314_v0  ;;  %287 = vmatprep.subr.bf16.mxu1 %v314_v0 }
  0x1e   :  { %142 = vmatpush1.bf16.msra.mxu0 %v306_v10  ;;  %296 = vmatpush1.bf16.msra.mxu1 %v306_v10 }
  0x1f   :  { %143 = vmatprep.subr.bf16.mxu0 %v314_v0  ;;  %288 = vmatprep.subr.bf16.mxu1 %v314_v0 }
  0x22   :  { %144 = vmatpush1.bf16.msra.mxu0 %v307_v11  ;;  %297 = vmatpush1.bf16.msra.mxu1 %v307_v11 }
  0x25   :  { %160 = vmatmul.mubr.bf16.vlgmr.msra.gmra.mrb[0].mxu0 %v308_v12  ;;  %168 = vmatmul.mubr.bf16.vlgmr.msra.gmra.mrb[0].mxu1 %v311_v13 }
  0xf8   :  { %v161_v14 = vpop.f32.mrb[0].mxu0  ;;  %v169_v15 = vpop.f32.mrb[0].mxu1 }
  0xf9   :  { %v163_v16 = vpop.f32.mrb[1].mxu0  ;;  %v171_v17 = vpop.f32.mrb[1].mxu1  ;;  %v220_v18 = vmul.f32 %v161_v14, %v161_v14  ;;  %v222_v19 = vmul.f32 %v169_v15, %v169_v15 }
  0xfa   :  { %v164_v20 = vpop.f32.mrb[2].mxu0  ;;  %v172_v21 = vpop.f32.mrb[2].mxu1 }
  0xfb   :  { %v272_v22 = vpack.c.bf16 %v164_v20, %v161_v14  ;;  %v211_v23 = vadd.f32 %v164_v20, %v161_v14  ;;  %v221_v24 = vmul.f32 %v164_v20, %v164_v20  ;;  %v166_v25 = vpop.f32.mrb[3].mxu0  ;;  %v277_v26 = vpack.c.bf16 %v172_v21, %v169_v15  ;;  %v174_v27 = vpop.f32.mrb[3].mxu1 }
  0xfc   :  { %v223_v31 = vmul.f32 %v172_v21, %v172_v21 }
  0xfd   :  { %273 = vst [vmem:[%s385_s2] sm:$0xff] %v272_v22   ;;  %v224_v28 = vadd.f32 %v221_v24, %v220_v18  ;;  %279 = vst [vmem:[%s385_s2 + $0x8] sm:$0xff] %v277_v26   ;;  %v212_v29 = vadd.f32 %v211_v23, %v169_v15 }
  0xff   :  { %v213_v30 = vadd.f32 %v212_v29, %v172_v21  ;;  %v225_v32 = vadd.f32 %v224_v28, %v222_v19 }
 0x101   :  { %v214_v33 = vrot.slane %v213_v30, 4  ;;  %v226_v34 = vadd.f32 %v225_v32, %v223_v31 }
 0x103   :  { %v215_v35 = vadd.f32 %v214_v33, %v213_v30  ;;  %v227_v36 = vrot.slane %v226_v34, 4 }
 0x105   :  { %v216_v37 = vrot.slane %v215_v35, 2  ;;  %v228_v38 = vadd.f32 %v227_v36, %v226_v34 }
 0x107   :  { %v217_v39 = vadd.f32 %v216_v37, %v215_v35  ;;  %v229_v40 = vrot.slane %v228_v38, 2 }
 0x109   :  { %v218_v41 = vrot.slane %v217_v39, 1  ;;  %v230_v42 = vadd.f32 %v229_v40, %v228_v38 }
 0x10b   :  { %v231_v43 = vrot.slane %v230_v42, 1  ;;  %v219_v44 = vadd.f32 %v218_v41, %v217_v39 }
 0x10d   :  { %v232_v45 = vadd.f32 %v231_v43, %v230_v42 }
 0x10f   :  { %v234_v46 = vsel %vm233_vm1, %v219_v44, %v232_v45 }
 0x110   :  { %v236_v47 = vsel %vm235_vm2, %v234_v46, 0.0 }
 0x111   :  { %237 = vst [vmem:[%s386_s3] sm:$0xff] %v236_v47 }

// kernel: _lambda_.24
= control target key start
LH: loop header
LB: loop body
LE: loop exit
PB: predicated region body
PF: predicated region fallthrough
CT: control target
= control target key end

     0   :  { %vm57_vm0 = vcmask 261120   ;;  %s217_s1 = inlined_call_operand.vmem [shape: bf16[32,128], index: 1, kind: input, shape index: {}]   ;;  %s218_s0 = inlined_call_operand.vmem [shape: bf16[32,32], index: 0, kind: input, shape index: {}]   ;;  %s219_s2 = inlined_call_operand.vmem [shape: f32[1,128], index: 2, kind: input, shape index: {}]   ;;  %s220_s3 = inlined_call_operand.vmem [shape: f32[32,128], index: 3, kind: output, shape index: {}]  }
   0x1   :  { %v166_v0 = vld [vmem:[%s217_s1] sm:$0xff]   ;;  %v167_v1 = vld [vmem:[%s217_s1 + $0x8] sm:$0xff]  }
   0x2   :  { %158 = vmatprep.subr.bf16.mxu0 %v166_v0  ;;  %v168_v2 = vld [vmem:[%s218_s0] sm:$0xff]   ;;  %v169_v3 = vld [vmem:[%s218_s0 + $0x8] sm:$0xff]  }
   0x3   :  { %159 = vmatpush3.bf16.msra.mxu0 %v166_v0  ;;  %162 = vmatprep.mubr.msk.bf16.mxu0 %vm57_vm0, %v168_v2  ;;  %v153_v4 = vld [vmem:[%s219_s2] ss:$0 sm:$0xff] }
   0x4   :  { %160 = vmatprep.subr.bf16.mxu0 %v167_v1 }
   0x7   :  { %161 = vmatpush3.bf16.msra.mxu0 %v167_v1 }
   0xa   :  { %163 = vmatmul.mubr.msk.bf16.vlgmr.msra.gmra.mrb[0].mxu0 %vm57_vm0, %v169_v3 }
  0xdd   :  { %v164_v5 = vpop.f32.mrb[0].mxu0 }
  0xde   :  { %v137_v6 = vadd.f32 %v164_v5, %v153_v4  ;;  %v98_v7 = vpop.f32.mrb[1].mxu0 }
  0xdf   :  { %v135_v8 = vadd.f32 %v153_v4, %v98_v7  ;;  %v165_v9 = vpop.f32.mrb[2].mxu0 }
  0xe0   :  { %141 = vst [vmem:[%s220_s3 + $0x10] sm:$0xff] %v137_v6  ;;  %v138_v10 = vadd.f32 %v165_v9, %v153_v4  ;;  %v101_v11 = vpop.f32.mrb[3].mxu0 }
  0xe1   :  { %139 = vst [vmem:[%s220_s3] sm:$0xff] %v135_v8  ;;  %v136_v12 = vadd.f32 %v153_v4, %v101_v11 }
  0xe2   :  { %142 = vst [vmem:[%s220_s3 + $0x18] sm:$0xff] %v138_v10 }
  0xe3   :  { %140 = vst [vmem:[%s220_s3 + $0x8] sm:$0xff] %v136_v12 }

</bundles_post_ra>
